<compile_context>
chip_gen: v7x
topology: tpu7x:2x2x1
jax: 0.10.0
libtpu: 0.0.40
codegen_flags: <defaults>
</compile_context>

<pallas_src>
import jax
import jax.numpy as jnp
from jax.experimental import pallas as pl
from jax.experimental.pallas import tpu as pltpu

N_INPUTS = 4
N_ATOMS = 5
N_HID1 = 10
N_HID2 = 20
DEV_INPUT = 8
DEV_HIDDEN = 3  # se(2) -> 3x3 matrices
SLAB_W = 128    # single lane-tile wide weight slab

# ----------------------------- weight slab packing -----------------------------
_SLAB_ENTRIES = (
    # name, rows, cols  (rows padded up to a multiple of 8 inside the slab)
    ("w1bd", N_ATOMS * N_INPUTS, N_ATOMS * N_HID1),   # block-diag fc1_1
    ("b1bd", 1, N_ATOMS * N_HID1),
    ("w2bd", N_ATOMS * N_HID1, N_ATOMS * N_HID1),     # block-diag fc1_2
    ("b2bd", 1, N_ATOMS * N_HID1),
    ("wih", N_ATOMS * N_HID1, 4 * N_HID2),            # LSTM input proj, gates [i|f|o|g]
    ("whh", N_HID2, 4 * N_HID2),                      # LSTM recurrent proj, gates [i|f|o|g]
    ("blstm", 1, 4 * N_HID2),                         # b_ih + b_hh, gates [i|f|o|g]
    ("wfc2", N_HID2, DEV_INPUT),                      # fc2_1
    ("bfc2", 1, DEV_INPUT),
    ("acat", DEV_INPUT, 3 * N_ATOMS),                 # se(2) coord map [theta | a | b]
)


def _round8(n):
    return ((n + 7) // 8) * 8


def _slab_layout():
    layout, r = {}, 0
    for name, rows, cols in _SLAB_ENTRIES:
        layout[name] = (r, rows, cols)
        r += _round8(rows)          # keep every row offset 8-aligned (sublane tile)
    return layout, r


_SLAB_LAYOUT, SLAB_ROWS = _slab_layout()


def pack_weight_slab(tensors):
    """Pack all weights/biases into one (SLAB_ROWS, 128) f32 slab (done once at init)."""
    slab = jnp.zeros((SLAB_ROWS, SLAB_W), jnp.float32)
    for name, rows, cols in _SLAB_ENTRIES:
        r0, _, _ = _SLAB_LAYOUT[name]
        slab = slab.at[r0:r0 + rows, :cols].set(tensors[name].astype(jnp.float32))
    return slab


# --------------------------- fused forward kernel ---------------------------
def _make_kernel(T, nb):
    K, C, H1, H2, DIN = N_ATOMS, N_INPUTS, N_HID1, N_HID2, DEV_INPUT
    KC, KH1, G4 = K * C, K * H1, 4 * H2

    def kernel(x_ref, xy_ref, w_ref, o_ref, h_scr):
        # x_ref : (T, 1, nb, K*C)   time-major batch block, atom/channel pre-flattened
        # xy_ref: (2, 1, nb, K)     last-frame (x, y) per atom
        # w_ref : (SLAB_ROWS, 128)  packed weight slab
        # o_ref : (1, nb, 2*K)      [x'(K) | y'(K)]
        # h_scr : (T, nb, H2)       hidden states (feeds the one-shot fc2 matmul)

        def wsl(name):                       # static, 8-aligned slab slice
            r0, rows, cols = _SLAB_LAYOUT[name]
            return w_ref[r0:r0 + rows, :cols]

        # ---- Stage 1: per-atom MLP (fc1_1 -> ReLU -> fc1_2 -> ReLU) via block-diag
        #      weights; rows stay (T*nb, .) with no lane<->sublane reshapes.
        x2d = x_ref[...].reshape(T * nb, KC)
        h1 = jnp.maximum(
            jnp.dot(x2d, wsl("w1bd"), preferred_element_type=jnp.float32) + wsl("b1bd"), 0.0)
        h2 = jnp.maximum(
            jnp.dot(h1, wsl("w2bd"), preferred_element_type=jnp.float32) + wsl("b2bd"), 0.0)

        # ---- Stage 2: LSTM input projection hoisted out of the recurrence ----
        z = (jnp.dot(h2, wsl("wih"), preferred_element_type=jnp.float32)
             + wsl("blstm")).reshape(T, nb, G4)          # gates [i|f|o|g]

        # ---- Stage 3: LSTM recurrence: h@Whh + 1 sigmoid + 2 tanh per step ----
        # Fully unrolled Python loop (T is tiny); static z[t] slices, no scratch traffic.
        whh = wsl("whh")
        h = jnp.zeros((nb, H2), jnp.float32)
        c = jnp.zeros((nb, H2), jnp.float32)
        for t in range(T):
            g = z[t] + jnp.dot(h, whh, preferred_element_type=jnp.float32)   # (nb, 4*H2)
            sg = jax.nn.sigmoid(g[:, :3 * H2])           # [i | f | o] in one EUP pass
            gg = jnp.tanh(g[:, 3 * H2:])                 # g-gate
            c = sg[:, H2:2 * H2] * c + sg[:, :H2] * gg
            h = sg[:, 2 * H2:3 * H2] * jnp.tanh(c)
            h_scr[t] = h

        # ---- Stage 4: fc2_1 as one matmul over all timesteps ----
        hall = h_scr[...].reshape(T * nb, H2)
        y = (jnp.dot(hall, wsl("wfc2"), preferred_element_type=jnp.float32)
             + wsl("bfc2")).reshape(T, nb, DIN)

        # ---- Stage 5: SE(2) path development (matmul + trig fully vectorized) ----
        dx = (y[1:] - y[:-1]).reshape((T - 1) * nb, DIN)                 # ((T-1)*nb, 8)
        tab = jnp.dot(dx, wsl("acat"),
                      preferred_element_type=jnp.float32).reshape(T - 1, nb, 3 * K)
        th = tab[..., :K]
        a = tab[..., K:2 * K]
        b = tab[..., 2 * K:]
        cth = jnp.cos(th)
        sth = jnp.sin(th)
        sh2 = jnp.sin(0.5 * th)
        small = jnp.abs(th) < 1e-4
        th_safe = jnp.where(small, 1.0, th)
        s_a = jnp.where(small, 1.0 - th * th / 6.0, sth / th_safe)       # sin(th)/th
        s_b = jnp.where(small, 0.5 * th, 2.0 * sh2 * sh2 / th_safe)      # (1-cos th)/th
        # closed-form exp of se(2): [[c, -s, s_a*a - s_b*b], [s, c, s_b*a + s_a*b], [0,0,1]]
        m00, m01, m02 = cth, -sth, s_a * a - s_b * b
        m10, m11, m12 = sth, cth, s_b * a + s_a * b

        # time-ordered product  P <- P @ M_t ; values only, pure VPU FMAs, no scratch.
        nc = (nb, K)
        p00 = jnp.ones(nc, jnp.float32)
        p01 = jnp.zeros(nc, jnp.float32)
        p02 = jnp.zeros(nc, jnp.float32)
        p10 = jnp.zeros(nc, jnp.float32)
        p11 = jnp.ones(nc, jnp.float32)
        p12 = jnp.zeros(nc, jnp.float32)
        for t in range(T - 1):
            n00, n01, n02 = m00[t], m01[t], m02[t]
            n10, n11, n12 = m10[t], m11[t], m12[t]
            q00 = p00 * n00 + p01 * n10
            q01 = p00 * n01 + p01 * n11
            q02 = p00 * n02 + p01 * n12 + p02
            q10 = p10 * n00 + p11 * n10
            q11 = p10 * n01 + p11 * n11
            q12 = p10 * n02 + p11 * n12 + p12
            p00, p01, p02, p10, p11, p12 = q00, q01, q02, q10, q11, q12

        # apply each atom's SE(2) matrix to its last-frame (x, y, 1); single block store
        xy = xy_ref[...]
        xv = xy[0, 0]                                                    # (nb, K)
        yv = xy[1, 0]                                                    # (nb, K)
        o_ref[0] = jnp.concatenate([p00 * xv + p01 * yv + p02,
                                    p10 * xv + p11 * yv + p12], axis=-1)

    return kernel


# ------------------------------ wrapper (single launch) ------------------------------
def _num_grid_blocks(n):
    """Split the batch over the grid only where there are 2 TensorCores (v7x)."""
    try:
        kind = jax.devices()[0].device_kind.lower()
    except Exception:
        kind = ""
    if ("v7" in kind or "tpu7" in kind) and n >= 2 and n % 2 == 0:
        return 2
    return 1   # v5e/v6e: single TC -> a multi-step grid is pure overhead


@jax.jit
def lstm_development_forward(params, X):
    N, T, K, C = X.shape
    num_blocks = _num_grid_blocks(N)
    nb = N // num_blocks
    # NOTE: for real (large-N) throughput, grow nb (multiple of 8, T*nb >= 128/256)
    # and re-check the VMEM budget on v7x (64 MiB) — trivial at these sizes.

    # time-major; (K, C) flattened in the wrapper (XLA fuses it); batch pre-split into
    # (num_blocks, nb) so every BlockSpec keeps full last-two dims.
    x_tm = jnp.transpose(X, (1, 0, 2, 3)).reshape(T, num_blocks, nb, K * C)
    # last-frame (x, y) per atom, extracted here instead of strided lane slicing in-kernel
    xy_last = jnp.transpose(X[:, -1, :, :2], (2, 0, 1)).reshape(2, num_blocks, nb, K)

    out = pl.pallas_call(
        _make_kernel(T, nb),
        out_shape=jax.ShapeDtypeStruct((num_blocks, nb, 2 * K), jnp.float32),
        grid_spec=pltpu.PrefetchScalarGridSpec(
            num_scalar_prefetch=0,
            grid=(num_blocks,),
            in_specs=[
                pl.BlockSpec((T, 1, nb, K * C), lambda i: (0, i, 0, 0)),   # X block
                pl.BlockSpec((2, 1, nb, K), lambda i: (0, i, 0, 0)),       # last-frame xy
                pl.BlockSpec((SLAB_ROWS, SLAB_W), lambda i: (0, 0)),       # weight slab
            ],
            out_specs=pl.BlockSpec((1, nb, 2 * K), lambda i: (i, 0, 0)),
            scratch_shapes=[
                pltpu.VMEM((T, nb, N_HID2), jnp.float32),                  # hidden states h_t
            ],
        ),
        compiler_params=pltpu.CompilerParams(dimension_semantics=("parallel",)),
    )(x_tm, xy_last, params["slab"])

    # (num_blocks, nb, 2K) -> (N, 2, K) -> (N, n_atoms, 2), matching the torch output
    return jnp.transpose(out.reshape(N, 2, K), (0, 2, 1))


# ------------------------------ parameters (synthetic) ------------------------------
def init_params(key):
    ks = jax.random.split(key, 10)
    s = 0.3
    K, C, H1, H2, DIN = N_ATOMS, N_INPUTS, N_HID1, N_HID2, DEV_INPUT
    w1 = jax.random.normal(ks[0], (C, H1), jnp.float32) * s
    b1 = jax.random.normal(ks[1], (1, H1), jnp.float32) * s
    w2 = jax.random.normal(ks[2], (H1, H1), jnp.float32) * s
    b2 = jax.random.normal(ks[3], (1, H1), jnp.float32) * s
    # LSTM weights, transposed, gates concatenated [i|f|o|g] along the output axis.
    # (From a torch checkpoint: transpose weight_ih/hh_l0, permute gate blocks from
    #  torch's (i,f,g,o) to (i,f,o,g), and fold blstm = b_ih + b_hh in the same order.)
    wih = jax.random.normal(ks[4], (K * H1, 4 * H2), jnp.float32) * s
    whh = jax.random.normal(ks[5], (H2, 4 * H2), jnp.float32) * s
    blstm = jax.random.normal(ks[6], (1, 4 * H2), jnp.float32) * s
    wfc2 = jax.random.normal(ks[7], (H2, DIN), jnp.float32) * s
    bfc2 = jax.random.normal(ks[8], (1, DIN), jnp.float32) * s
    # raw development parameter (channels, 3, 3, dev_input); se(2) projection done once.
    a_raw = jax.random.normal(ks[9], (K, DEV_HIDDEN, DEV_HIDDEN, DIN), jnp.float32) * s
    ath = jnp.transpose((a_raw[:, 1, 0, :] - a_raw[:, 0, 1, :]) * 0.5)   # (8, K)
    aa = jnp.transpose(a_raw[:, 0, 2, :])                                # (8, K)
    ab = jnp.transpose(a_raw[:, 1, 2, :])                                # (8, K)
    eye = jnp.eye(K, dtype=jnp.float32)
    tensors = dict(
        w1bd=jnp.kron(eye, w1), b1bd=jnp.tile(b1, (1, K)),               # block-diag fc1_1
        w2bd=jnp.kron(eye, w2), b2bd=jnp.tile(b2, (1, K)),               # block-diag fc1_2
        wih=wih, whh=whh, blstm=blstm, wfc2=wfc2, bfc2=bfc2,
        acat=jnp.concatenate([ath, aa, ab], axis=1),                     # (8, 3K)
    )
    return dict(slab=pack_weight_slab(tensors))


if __name__ == "__main__":
    key = jax.random.PRNGKey(0)
    kx, kp = jax.random.split(key)
    N, T, K, C = 2, 8, N_ATOMS, N_INPUTS
    X = jax.random.normal(kx, (N, T, K, C), jnp.float32)
    params = init_params(kp)
    out = lstm_development_forward(params, X)
    jax.block_until_ready(out)
    assert out.shape == (N, N_ATOMS, 2), out.shape
    assert bool(jnp.all(jnp.isfinite(out)))
    print("KERNEL_OK")
</pallas_src>

<mosaic_0001>
module attributes {stable_mosaic.version = 11 : i64} {
  func.func @kernel(%arg0: i32, %arg1: memref<8x1x2x20xf32, #tpu.memory_space<vmem>>, %arg2: memref<2x1x2x5xf32, #tpu.memory_space<vmem>>, %arg3: memref<224x128xf32, #tpu.memory_space<vmem>>, %arg4: memref<1x2x10xf32, #tpu.memory_space<vmem>>, %arg5: memref<8x2x20xf32, #tpu.memory_space<vmem>>) attributes {dimension_semantics = [#tpu.dimension_semantics<parallel>], iteration_bounds = array<i64: 1>, scalar_prefetch = 0 : i64, scratch_operands = 1 : i64, tpu.core_type = #tpu.core_type<tc>, window_params = [{transform_indices = @transform_0, window_bounds = array<i64: 8, 1, 2, 20>}, {transform_indices = @transform_1, window_bounds = array<i64: 2, 1, 2, 5>}, {pipeline_mode = #tpu.pipeline_mode<synchronous>, transform_indices = @transform_2, window_bounds = array<i64: 224, 128>}, {transform_indices = @transform_3, window_bounds = array<i64: 1, 2, 10>}]} {
    %c0 = arith.constant 0 : index
    %c0_0 = arith.constant 0 : index
    %c0_1 = arith.constant 0 : index
    %c0_2 = arith.constant 0 : index
    %0 = vector.load %arg1[%c0, %c0_0, %c0_1, %c0_2] : memref<8x1x2x20xf32, #tpu.memory_space<vmem>>, vector<8x1x2x20xf32>
    %1 = vector.shape_cast %0 : vector<8x1x2x20xf32> to vector<16x20xf32>
    %c0_3 = arith.constant 0 : index
    %c0_4 = arith.constant 0 : index
    %2 = vector.load %arg3[%c0_3, %c0_4] : memref<224x128xf32, #tpu.memory_space<vmem>>, vector<20x50xf32>
    %cst = arith.constant dense<0.000000e+00> : vector<16x50xf32>
    %3 = tpu.matmul %1, %2, %cst {dimension_numbers = #tpu.dot_dimension_numbers<[1], [0], [0], [1], [0, 0, 1, 1], [], []>} : vector<16x20xf32>, vector<20x50xf32>, vector<16x50xf32> -> vector<16x50xf32>
    %c24 = arith.constant 24 : index
    %c0_5 = arith.constant 0 : index
    %4 = vector.load %arg3[%c24, %c0_5] : memref<224x128xf32, #tpu.memory_space<vmem>>, vector<1x50xf32>
    %5 = vector.broadcast %4 : vector<1x50xf32> to vector<16x50xf32>
    %6 = arith.addf %3, %5 : vector<16x50xf32>
    %cst_6 = arith.constant 0.000000e+00 : f32
    %7 = vector.broadcast %cst_6 : f32 to vector<16x50xf32>
    %8 = arith.maximumf %6, %7 : vector<16x50xf32>
    %c32 = arith.constant 32 : index
    %c0_7 = arith.constant 0 : index
    %9 = vector.load %arg3[%c32, %c0_7] : memref<224x128xf32, #tpu.memory_space<vmem>>, vector<50x50xf32>
    %cst_8 = arith.constant dense<0.000000e+00> : vector<16x50xf32>
    %10 = tpu.matmul %8, %9, %cst_8 {dimension_numbers = #tpu.dot_dimension_numbers<[1], [0], [0], [1], [0, 0, 1, 1], [], []>} : vector<16x50xf32>, vector<50x50xf32>, vector<16x50xf32> -> vector<16x50xf32>
    %c88 = arith.constant 88 : index
    %c0_9 = arith.constant 0 : index
    %11 = vector.load %arg3[%c88, %c0_9] : memref<224x128xf32, #tpu.memory_space<vmem>>, vector<1x50xf32>
    %12 = vector.broadcast %11 : vector<1x50xf32> to vector<16x50xf32>
    %13 = arith.addf %10, %12 : vector<16x50xf32>
    %cst_10 = arith.constant 0.000000e+00 : f32
    %14 = vector.broadcast %cst_10 : f32 to vector<16x50xf32>
    %15 = arith.maximumf %13, %14 : vector<16x50xf32>
    %c96 = arith.constant 96 : index
    %c0_11 = arith.constant 0 : index
    %16 = vector.load %arg3[%c96, %c0_11] : memref<224x128xf32, #tpu.memory_space<vmem>>, vector<50x80xf32>
    %cst_12 = arith.constant dense<0.000000e+00> : vector<16x80xf32>
    %17 = tpu.matmul %15, %16, %cst_12 {dimension_numbers = #tpu.dot_dimension_numbers<[1], [0], [0], [1], [0, 0, 1, 1], [], []>} : vector<16x50xf32>, vector<50x80xf32>, vector<16x80xf32> -> vector<16x80xf32>
    %c176 = arith.constant 176 : index
    %c0_13 = arith.constant 0 : index
    %18 = vector.load %arg3[%c176, %c0_13] : memref<224x128xf32, #tpu.memory_space<vmem>>, vector<1x80xf32>
    %19 = vector.broadcast %18 : vector<1x80xf32> to vector<16x80xf32>
    %20 = arith.addf %17, %19 : vector<16x80xf32>
    %21 = vector.shape_cast %20 : vector<16x80xf32> to vector<8x2x80xf32>
    %c152 = arith.constant 152 : index
    %c0_14 = arith.constant 0 : index
    %22 = vector.load %arg3[%c152, %c0_14] : memref<224x128xf32, #tpu.memory_space<vmem>>, vector<20x80xf32>
    %cst_15 = arith.constant 0.000000e+00 : f32
    %23 = vector.broadcast %cst_15 : f32 to vector<2x20xf32>
    %cst_16 = arith.constant 0.000000e+00 : f32
    %24 = vector.broadcast %cst_16 : f32 to vector<2x20xf32>
    %25 = vector.extract_strided_slice %21 {offsets = [0, 0, 0], sizes = [1, 2, 80], strides = [1, 1, 1]} : vector<8x2x80xf32> to vector<1x2x80xf32>
    %26 = vector.shape_cast %25 : vector<1x2x80xf32> to vector<2x80xf32>
    %cst_17 = arith.constant dense<0.000000e+00> : vector<2x80xf32>
    %27 = tpu.matmul %23, %22, %cst_17 {dimension_numbers = #tpu.dot_dimension_numbers<[1], [0], [0], [1], [0, 0, 1, 1], [], []>} : vector<2x20xf32>, vector<20x80xf32>, vector<2x80xf32> -> vector<2x80xf32>
    %28 = arith.addf %26, %27 : vector<2x80xf32>
    %29 = vector.extract_strided_slice %28 {offsets = [0, 0], sizes = [2, 60], strides = [1, 1]} : vector<2x80xf32> to vector<2x60xf32>
    %30 = arith.negf %29 : vector<2x60xf32>
    %31 = math.exp %30 : vector<2x60xf32>
    %cst_18 = arith.constant 1.000000e+00 : f32
    %32 = vector.broadcast %cst_18 : f32 to vector<2x60xf32>
    %33 = arith.addf %32, %31 : vector<2x60xf32>
    %34 = arith.divf %32, %33 : vector<2x60xf32>
    %35 = vector.extract_strided_slice %28 {offsets = [0, 60], sizes = [2, 20], strides = [1, 1]} : vector<2x80xf32> to vector<2x20xf32>
    %36 = math.tanh %35 : vector<2x20xf32>
    %37 = vector.extract_strided_slice %34 {offsets = [0, 20], sizes = [2, 20], strides = [1, 1]} : vector<2x60xf32> to vector<2x20xf32>
    %38 = arith.mulf %37, %24 : vector<2x20xf32>
    %39 = vector.extract_strided_slice %34 {offsets = [0, 0], sizes = [2, 20], strides = [1, 1]} : vector<2x60xf32> to vector<2x20xf32>
    %40 = arith.mulf %39, %36 : vector<2x20xf32>
    %41 = arith.addf %38, %40 : vector<2x20xf32>
    %42 = vector.extract_strided_slice %34 {offsets = [0, 40], sizes = [2, 20], strides = [1, 1]} : vector<2x60xf32> to vector<2x20xf32>
    %43 = math.tanh %41 : vector<2x20xf32>
    %44 = arith.mulf %42, %43 : vector<2x20xf32>
    %c0_19 = arith.constant 0 : index
    %c0_20 = arith.constant 0 : index
    %c0_21 = arith.constant 0 : index
    %45 = vector.load %arg5[%c0_19, %c0_20, %c0_21] : memref<8x2x20xf32, #tpu.memory_space<vmem>>, vector<1x2x20xf32>
    %46 = vector.shape_cast %45 : vector<1x2x20xf32> to vector<2x20xf32>
    %47 = vector.shape_cast %44 : vector<2x20xf32> to vector<1x2x20xf32>
    tpu.vector_store %arg5[%c0_19, %c0_20, %c0_21], %47 {strides = array<i32>} : memref<8x2x20xf32, #tpu.memory_space<vmem>>, vector<1x2x20xf32>,
    %48 = vector.extract_strided_slice %21 {offsets = [1, 0, 0], sizes = [1, 2, 80], strides = [1, 1, 1]} : vector<8x2x80xf32> to vector<1x2x80xf32>
    %49 = vector.shape_cast %48 : vector<1x2x80xf32> to vector<2x80xf32>
    %cst_22 = arith.constant dense<0.000000e+00> : vector<2x80xf32>
    %50 = tpu.matmul %44, %22, %cst_22 {dimension_numbers = #tpu.dot_dimension_numbers<[1], [0], [0], [1], [0, 0, 1, 1], [], []>} : vector<2x20xf32>, vector<20x80xf32>, vector<2x80xf32> -> vector<2x80xf32>
    %51 = arith.addf %49, %50 : vector<2x80xf32>
    %52 = vector.extract_strided_slice %51 {offsets = [0, 0], sizes = [2, 60], strides = [1, 1]} : vector<2x80xf32> to vector<2x60xf32>
    %53 = arith.negf %52 : vector<2x60xf32>
    %54 = math.exp %53 : vector<2x60xf32>
    %cst_23 = arith.constant 1.000000e+00 : f32
    %55 = vector.broadcast %cst_23 : f32 to vector<2x60xf32>
    %56 = arith.addf %55, %54 : vector<2x60xf32>
    %57 = arith.divf %55, %56 : vector<2x60xf32>
    %58 = vector.extract_strided_slice %51 {offsets = [0, 60], sizes = [2, 20], strides = [1, 1]} : vector<2x80xf32> to vector<2x20xf32>
    %59 = math.tanh %58 : vector<2x20xf32>
    %60 = vector.extract_strided_slice %57 {offsets = [0, 20], sizes = [2, 20], strides = [1, 1]} : vector<2x60xf32> to vector<2x20xf32>
    %61 = arith.mulf %60, %41 : vector<2x20xf32>
    %62 = vector.extract_strided_slice %57 {offsets = [0, 0], sizes = [2, 20], strides = [1, 1]} : vector<2x60xf32> to vector<2x20xf32>
    %63 = arith.mulf %62, %59 : vector<2x20xf32>
    %64 = arith.addf %61, %63 : vector<2x20xf32>
    %65 = vector.extract_strided_slice %57 {offsets = [0, 40], sizes = [2, 20], strides = [1, 1]} : vector<2x60xf32> to vector<2x20xf32>
    %66 = math.tanh %64 : vector<2x20xf32>
    %67 = arith.mulf %65, %66 : vector<2x20xf32>
    %c1 = arith.constant 1 : index
    %c0_24 = arith.constant 0 : index
    %c0_25 = arith.constant 0 : index
    %68 = vector.load %arg5[%c1, %c0_24, %c0_25] : memref<8x2x20xf32, #tpu.memory_space<vmem>>, vector<1x2x20xf32>
    %69 = vector.shape_cast %68 : vector<1x2x20xf32> to vector<2x20xf32>
    %70 = vector.shape_cast %67 : vector<2x20xf32> to vector<1x2x20xf32>
    tpu.vector_store %arg5[%c1, %c0_24, %c0_25], %70 {strides = array<i32>} : memref<8x2x20xf32, #tpu.memory_space<vmem>>, vector<1x2x20xf32>,
    %71 = vector.extract_strided_slice %21 {offsets = [2, 0, 0], sizes = [1, 2, 80], strides = [1, 1, 1]} : vector<8x2x80xf32> to vector<1x2x80xf32>
    %72 = vector.shape_cast %71 : vector<1x2x80xf32> to vector<2x80xf32>
    %cst_26 = arith.constant dense<0.000000e+00> : vector<2x80xf32>
    %73 = tpu.matmul %67, %22, %cst_26 {dimension_numbers = #tpu.dot_dimension_numbers<[1], [0], [0], [1], [0, 0, 1, 1], [], []>} : vector<2x20xf32>, vector<20x80xf32>, vector<2x80xf32> -> vector<2x80xf32>
    %74 = arith.addf %72, %73 : vector<2x80xf32>
    %75 = vector.extract_strided_slice %74 {offsets = [0, 0], sizes = [2, 60], strides = [1, 1]} : vector<2x80xf32> to vector<2x60xf32>
    %76 = arith.negf %75 : vector<2x60xf32>
    %77 = math.exp %76 : vector<2x60xf32>
    %cst_27 = arith.constant 1.000000e+00 : f32
    %78 = vector.broadcast %cst_27 : f32 to vector<2x60xf32>
    %79 = arith.addf %78, %77 : vector<2x60xf32>
    %80 = arith.divf %78, %79 : vector<2x60xf32>
    %81 = vector.extract_strided_slice %74 {offsets = [0, 60], sizes = [2, 20], strides = [1, 1]} : vector<2x80xf32> to vector<2x20xf32>
    %82 = math.tanh %81 : vector<2x20xf32>
    %83 = vector.extract_strided_slice %80 {offsets = [0, 20], sizes = [2, 20], strides = [1, 1]} : vector<2x60xf32> to vector<2x20xf32>
    %84 = arith.mulf %83, %64 : vector<2x20xf32>
    %85 = vector.extract_strided_slice %80 {offsets = [0, 0], sizes = [2, 20], strides = [1, 1]} : vector<2x60xf32> to vector<2x20xf32>
    %86 = arith.mulf %85, %82 : vector<2x20xf32>
    %87 = arith.addf %84, %86 : vector<2x20xf32>
    %88 = vector.extract_strided_slice %80 {offsets = [0, 40], sizes = [2, 20], strides = [1, 1]} : vector<2x60xf32> to vector<2x20xf32>
    %89 = math.tanh %87 : vector<2x20xf32>
    %90 = arith.mulf %88, %89 : vector<2x20xf32>
    %c2 = arith.constant 2 : index
    %c0_28 = arith.constant 0 : index
    %c0_29 = arith.constant 0 : index
    %91 = vector.load %arg5[%c2, %c0_28, %c0_29] : memref<8x2x20xf32, #tpu.memory_space<vmem>>, vector<1x2x20xf32>
    %92 = vector.shape_cast %91 : vector<1x2x20xf32> to vector<2x20xf32>
    %93 = vector.shape_cast %90 : vector<2x20xf32> to vector<1x2x20xf32>
    tpu.vector_store %arg5[%c2, %c0_28, %c0_29], %93 {strides = array<i32>} : memref<8x2x20xf32, #tpu.memory_space<vmem>>, vector<1x2x20xf32>,
    %94 = vector.extract_strided_slice %21 {offsets = [3, 0, 0], sizes = [1, 2, 80], strides = [1, 1, 1]} : vector<8x2x80xf32> to vector<1x2x80xf32>
    %95 = vector.shape_cast %94 : vector<1x2x80xf32> to vector<2x80xf32>
    %cst_30 = arith.constant dense<0.000000e+00> : vector<2x80xf32>
    %96 = tpu.matmul %90, %22, %cst_30 {dimension_numbers = #tpu.dot_dimension_numbers<[1], [0], [0], [1], [0, 0, 1, 1], [], []>} : vector<2x20xf32>, vector<20x80xf32>, vector<2x80xf32> -> vector<2x80xf32>
    %97 = arith.addf %95, %96 : vector<2x80xf32>
    %98 = vector.extract_strided_slice %97 {offsets = [0, 0], sizes = [2, 60], strides = [1, 1]} : vector<2x80xf32> to vector<2x60xf32>
    %99 = arith.negf %98 : vector<2x60xf32>
    %100 = math.exp %99 : vector<2x60xf32>
    %cst_31 = arith.constant 1.000000e+00 : f32
    %101 = vector.broadcast %cst_31 : f32 to vector<2x60xf32>
    %102 = arith.addf %101, %100 : vector<2x60xf32>
    %103 = arith.divf %101, %102 : vector<2x60xf32>
    %104 = vector.extract_strided_slice %97 {offsets = [0, 60], sizes = [2, 20], strides = [1, 1]} : vector<2x80xf32> to vector<2x20xf32>
    %105 = math.tanh %104 : vector<2x20xf32>
    %106 = vector.extract_strided_slice %103 {offsets = [0, 20], sizes = [2, 20], strides = [1, 1]} : vector<2x60xf32> to vector<2x20xf32>
    %107 = arith.mulf %106, %87 : vector<2x20xf32>
    %108 = vector.extract_strided_slice %103 {offsets = [0, 0], sizes = [2, 20], strides = [1, 1]} : vector<2x60xf32> to vector<2x20xf32>
    %109 = arith.mulf %108, %105 : vector<2x20xf32>
    %110 = arith.addf %107, %109 : vector<2x20xf32>
    %111 = vector.extract_strided_slice %103 {offsets = [0, 40], sizes = [2, 20], strides = [1, 1]} : vector<2x60xf32> to vector<2x20xf32>
    %112 = math.tanh %110 : vector<2x20xf32>
    %113 = arith.mulf %111, %112 : vector<2x20xf32>
    %c3 = arith.constant 3 : index
    %c0_32 = arith.constant 0 : index
    %c0_33 = arith.constant 0 : index
    %114 = vector.load %arg5[%c3, %c0_32, %c0_33] : memref<8x2x20xf32, #tpu.memory_space<vmem>>, vector<1x2x20xf32>
    %115 = vector.shape_cast %114 : vector<1x2x20xf32> to vector<2x20xf32>
    %116 = vector.shape_cast %113 : vector<2x20xf32> to vector<1x2x20xf32>
    tpu.vector_store %arg5[%c3, %c0_32, %c0_33], %116 {strides = array<i32>} : memref<8x2x20xf32, #tpu.memory_space<vmem>>, vector<1x2x20xf32>,
    %117 = vector.extract_strided_slice %21 {offsets = [4, 0, 0], sizes = [1, 2, 80], strides = [1, 1, 1]} : vector<8x2x80xf32> to vector<1x2x80xf32>
    %118 = vector.shape_cast %117 : vector<1x2x80xf32> to vector<2x80xf32>
    %cst_34 = arith.constant dense<0.000000e+00> : vector<2x80xf32>
    %119 = tpu.matmul %113, %22, %cst_34 {dimension_numbers = #tpu.dot_dimension_numbers<[1], [0], [0], [1], [0, 0, 1, 1], [], []>} : vector<2x20xf32>, vector<20x80xf32>, vector<2x80xf32> -> vector<2x80xf32>
    %120 = arith.addf %118, %119 : vector<2x80xf32>
    %121 = vector.extract_strided_slice %120 {offsets = [0, 0], sizes = [2, 60], strides = [1, 1]} : vector<2x80xf32> to vector<2x60xf32>
    %122 = arith.negf %121 : vector<2x60xf32>
    %123 = math.exp %122 : vector<2x60xf32>
    %cst_35 = arith.constant 1.000000e+00 : f32
    %124 = vector.broadcast %cst_35 : f32 to vector<2x60xf32>
    %125 = arith.addf %124, %123 : vector<2x60xf32>
    %126 = arith.divf %124, %125 : vector<2x60xf32>
    %127 = vector.extract_strided_slice %120 {offsets = [0, 60], sizes = [2, 20], strides = [1, 1]} : vector<2x80xf32> to vector<2x20xf32>
    %128 = math.tanh %127 : vector<2x20xf32>
    %129 = vector.extract_strided_slice %126 {offsets = [0, 20], sizes = [2, 20], strides = [1, 1]} : vector<2x60xf32> to vector<2x20xf32>
    %130 = arith.mulf %129, %110 : vector<2x20xf32>
    %131 = vector.extract_strided_slice %126 {offsets = [0, 0], sizes = [2, 20], strides = [1, 1]} : vector<2x60xf32> to vector<2x20xf32>
    %132 = arith.mulf %131, %128 : vector<2x20xf32>
    %133 = arith.addf %130, %132 : vector<2x20xf32>
    %134 = vector.extract_strided_slice %126 {offsets = [0, 40], sizes = [2, 20], strides = [1, 1]} : vector<2x60xf32> to vector<2x20xf32>
    %135 = math.tanh %133 : vector<2x20xf32>
    %136 = arith.mulf %134, %135 : vector<2x20xf32>
    %c4 = arith.constant 4 : index
    %c0_36 = arith.constant 0 : index
    %c0_37 = arith.constant 0 : index
    %137 = vector.load %arg5[%c4, %c0_36, %c0_37] : memref<8x2x20xf32, #tpu.memory_space<vmem>>, vector<1x2x20xf32>
    %138 = vector.shape_cast %137 : vector<1x2x20xf32> to vector<2x20xf32>
    %139 = vector.shape_cast %136 : vector<2x20xf32> to vector<1x2x20xf32>
    tpu.vector_store %arg5[%c4, %c0_36, %c0_37], %139 {strides = array<i32>} : memref<8x2x20xf32, #tpu.memory_space<vmem>>, vector<1x2x20xf32>,
    %140 = vector.extract_strided_slice %21 {offsets = [5, 0, 0], sizes = [1, 2, 80], strides = [1, 1, 1]} : vector<8x2x80xf32> to vector<1x2x80xf32>
    %141 = vector.shape_cast %140 : vector<1x2x80xf32> to vector<2x80xf32>
    %cst_38 = arith.constant dense<0.000000e+00> : vector<2x80xf32>
    %142 = tpu.matmul %136, %22, %cst_38 {dimension_numbers = #tpu.dot_dimension_numbers<[1], [0], [0], [1], [0, 0, 1, 1], [], []>} : vector<2x20xf32>, vector<20x80xf32>, vector<2x80xf32> -> vector<2x80xf32>
    %143 = arith.addf %141, %142 : vector<2x80xf32>
    %144 = vector.extract_strided_slice %143 {offsets = [0, 0], sizes = [2, 60], strides = [1, 1]} : vector<2x80xf32> to vector<2x60xf32>
    %145 = arith.negf %144 : vector<2x60xf32>
    %146 = math.exp %145 : vector<2x60xf32>
    %cst_39 = arith.constant 1.000000e+00 : f32
    %147 = vector.broadcast %cst_39 : f32 to vector<2x60xf32>
    %148 = arith.addf %147, %146 : vector<2x60xf32>
    %149 = arith.divf %147, %148 : vector<2x60xf32>
    %150 = vector.extract_strided_slice %143 {offsets = [0, 60], sizes = [2, 20], strides = [1, 1]} : vector<2x80xf32> to vector<2x20xf32>
    %151 = math.tanh %150 : vector<2x20xf32>
    %152 = vector.extract_strided_slice %149 {offsets = [0, 20], sizes = [2, 20], strides = [1, 1]} : vector<2x60xf32> to vector<2x20xf32>
    %153 = arith.mulf %152, %133 : vector<2x20xf32>
    %154 = vector.extract_strided_slice %149 {offsets = [0, 0], sizes = [2, 20], strides = [1, 1]} : vector<2x60xf32> to vector<2x20xf32>
    %155 = arith.mulf %154, %151 : vector<2x20xf32>
    %156 = arith.addf %153, %155 : vector<2x20xf32>
    %157 = vector.extract_strided_slice %149 {offsets = [0, 40], sizes = [2, 20], strides = [1, 1]} : vector<2x60xf32> to vector<2x20xf32>
    %158 = math.tanh %156 : vector<2x20xf32>
    %159 = arith.mulf %157, %158 : vector<2x20xf32>
    %c5 = arith.constant 5 : index
    %c0_40 = arith.constant 0 : index
    %c0_41 = arith.constant 0 : index
    %160 = vector.load %arg5[%c5, %c0_40, %c0_41] : memref<8x2x20xf32, #tpu.memory_space<vmem>>, vector<1x2x20xf32>
    %161 = vector.shape_cast %160 : vector<1x2x20xf32> to vector<2x20xf32>
    %162 = vector.shape_cast %159 : vector<2x20xf32> to vector<1x2x20xf32>
    tpu.vector_store %arg5[%c5, %c0_40, %c0_41], %162 {strides = array<i32>} : memref<8x2x20xf32, #tpu.memory_space<vmem>>, vector<1x2x20xf32>,
    %163 = vector.extract_strided_slice %21 {offsets = [6, 0, 0], sizes = [1, 2, 80], strides = [1, 1, 1]} : vector<8x2x80xf32> to vector<1x2x80xf32>
    %164 = vector.shape_cast %163 : vector<1x2x80xf32> to vector<2x80xf32>
    %cst_42 = arith.constant dense<0.000000e+00> : vector<2x80xf32>
    %165 = tpu.matmul %159, %22, %cst_42 {dimension_numbers = #tpu.dot_dimension_numbers<[1], [0], [0], [1], [0, 0, 1, 1], [], []>} : vector<2x20xf32>, vector<20x80xf32>, vector<2x80xf32> -> vector<2x80xf32>
    %166 = arith.addf %164, %165 : vector<2x80xf32>
    %167 = vector.extract_strided_slice %166 {offsets = [0, 0], sizes = [2, 60], strides = [1, 1]} : vector<2x80xf32> to vector<2x60xf32>
    %168 = arith.negf %167 : vector<2x60xf32>
    %169 = math.exp %168 : vector<2x60xf32>
    %cst_43 = arith.constant 1.000000e+00 : f32
    %170 = vector.broadcast %cst_43 : f32 to vector<2x60xf32>
    %171 = arith.addf %170, %169 : vector<2x60xf32>
    %172 = arith.divf %170, %171 : vector<2x60xf32>
    %173 = vector.extract_strided_slice %166 {offsets = [0, 60], sizes = [2, 20], strides = [1, 1]} : vector<2x80xf32> to vector<2x20xf32>
    %174 = math.tanh %173 : vector<2x20xf32>
    %175 = vector.extract_strided_slice %172 {offsets = [0, 20], sizes = [2, 20], strides = [1, 1]} : vector<2x60xf32> to vector<2x20xf32>
    %176 = arith.mulf %175, %156 : vector<2x20xf32>
    %177 = vector.extract_strided_slice %172 {offsets = [0, 0], sizes = [2, 20], strides = [1, 1]} : vector<2x60xf32> to vector<2x20xf32>
    %178 = arith.mulf %177, %174 : vector<2x20xf32>
    %179 = arith.addf %176, %178 : vector<2x20xf32>
    %180 = vector.extract_strided_slice %172 {offsets = [0, 40], sizes = [2, 20], strides = [1, 1]} : vector<2x60xf32> to vector<2x20xf32>
    %181 = math.tanh %179 : vector<2x20xf32>
    %182 = arith.mulf %180, %181 : vector<2x20xf32>
    %c6 = arith.constant 6 : index
    %c0_44 = arith.constant 0 : index
    %c0_45 = arith.constant 0 : index
    %183 = vector.load %arg5[%c6, %c0_44, %c0_45] : memref<8x2x20xf32, #tpu.memory_space<vmem>>, vector<1x2x20xf32>
    %184 = vector.shape_cast %183 : vector<1x2x20xf32> to vector<2x20xf32>
    %185 = vector.shape_cast %182 : vector<2x20xf32> to vector<1x2x20xf32>
    tpu.vector_store %arg5[%c6, %c0_44, %c0_45], %185 {strides = array<i32>} : memref<8x2x20xf32, #tpu.memory_space<vmem>>, vector<1x2x20xf32>,
    %186 = vector.extract_strided_slice %21 {offsets = [7, 0, 0], sizes = [1, 2, 80], strides = [1, 1, 1]} : vector<8x2x80xf32> to vector<1x2x80xf32>
    %187 = vector.shape_cast %186 : vector<1x2x80xf32> to vector<2x80xf32>
    %cst_46 = arith.constant dense<0.000000e+00> : vector<2x80xf32>
    %188 = tpu.matmul %182, %22, %cst_46 {dimension_numbers = #tpu.dot_dimension_numbers<[1], [0], [0], [1], [0, 0, 1, 1], [], []>} : vector<2x20xf32>, vector<20x80xf32>, vector<2x80xf32> -> vector<2x80xf32>
    %189 = arith.addf %187, %188 : vector<2x80xf32>
    %190 = vector.extract_strided_slice %189 {offsets = [0, 0], sizes = [2, 60], strides = [1, 1]} : vector<2x80xf32> to vector<2x60xf32>
    %191 = arith.negf %190 : vector<2x60xf32>
    %192 = math.exp %191 : vector<2x60xf32>
    %cst_47 = arith.constant 1.000000e+00 : f32
    %193 = vector.broadcast %cst_47 : f32 to vector<2x60xf32>
    %194 = arith.addf %193, %192 : vector<2x60xf32>
    %195 = arith.divf %193, %194 : vector<2x60xf32>
    %196 = vector.extract_strided_slice %189 {offsets = [0, 60], sizes = [2, 20], strides = [1, 1]} : vector<2x80xf32> to vector<2x20xf32>
    %197 = math.tanh %196 : vector<2x20xf32>
    %198 = vector.extract_strided_slice %195 {offsets = [0, 20], sizes = [2, 20], strides = [1, 1]} : vector<2x60xf32> to vector<2x20xf32>
    %199 = arith.mulf %198, %179 : vector<2x20xf32>
    %200 = vector.extract_strided_slice %195 {offsets = [0, 0], sizes = [2, 20], strides = [1, 1]} : vector<2x60xf32> to vector<2x20xf32>
    %201 = arith.mulf %200, %197 : vector<2x20xf32>
    %202 = arith.addf %199, %201 : vector<2x20xf32>
    %203 = vector.extract_strided_slice %195 {offsets = [0, 40], sizes = [2, 20], strides = [1, 1]} : vector<2x60xf32> to vector<2x20xf32>
    %204 = math.tanh %202 : vector<2x20xf32>
    %205 = arith.mulf %203, %204 : vector<2x20xf32>
    %c7 = arith.constant 7 : index
    %c0_48 = arith.constant 0 : index
    %c0_49 = arith.constant 0 : index
    %206 = vector.load %arg5[%c7, %c0_48, %c0_49] : memref<8x2x20xf32, #tpu.memory_space<vmem>>, vector<1x2x20xf32>
    %207 = vector.shape_cast %206 : vector<1x2x20xf32> to vector<2x20xf32>
    %208 = vector.shape_cast %205 : vector<2x20xf32> to vector<1x2x20xf32>
    tpu.vector_store %arg5[%c7, %c0_48, %c0_49], %208 {strides = array<i32>} : memref<8x2x20xf32, #tpu.memory_space<vmem>>, vector<1x2x20xf32>,
    %c0_50 = arith.constant 0 : index
    %c0_51 = arith.constant 0 : index
    %c0_52 = arith.constant 0 : index
    %209 = vector.load %arg5[%c0_50, %c0_51, %c0_52] : memref<8x2x20xf32, #tpu.memory_space<vmem>>, vector<8x2x20xf32>
    %210 = vector.shape_cast %209 : vector<8x2x20xf32> to vector<16x20xf32>
    %c184 = arith.constant 184 : index
    %c0_53 = arith.constant 0 : index
    %211 = vector.load %arg3[%c184, %c0_53] : memref<224x128xf32, #tpu.memory_space<vmem>>, vector<20x8xf32>
    %cst_54 = arith.constant dense<0.000000e+00> : vector<16x8xf32>
    %212 = tpu.matmul %210, %211, %cst_54 {dimension_numbers = #tpu.dot_dimension_numbers<[1], [0], [0], [1], [0, 0, 1, 1], [], []>} : vector<16x20xf32>, vector<20x8xf32>, vector<16x8xf32> -> vector<16x8xf32>
    %c208 = arith.constant 208 : index
    %c0_55 = arith.constant 0 : index
    %213 = vector.load %arg3[%c208, %c0_55] : memref<224x128xf32, #tpu.memory_space<vmem>>, vector<1x8xf32>
    %214 = vector.broadcast %213 : vector<1x8xf32> to vector<16x8xf32>
    %215 = arith.addf %212, %214 : vector<16x8xf32>
    %216 = vector.shape_cast %215 : vector<16x8xf32> to vector<8x2x8xf32>
    %217 = vector.extract_strided_slice %216 {offsets = [1, 0, 0], sizes = [7, 2, 8], strides = [1, 1, 1]} : vector<8x2x8xf32> to vector<7x2x8xf32>
    %218 = vector.extract_strided_slice %216 {offsets = [0, 0, 0], sizes = [7, 2, 8], strides = [1, 1, 1]} : vector<8x2x8xf32> to vector<7x2x8xf32>
    %219 = arith.subf %217, %218 : vector<7x2x8xf32>
    %220 = vector.shape_cast %219 : vector<7x2x8xf32> to vector<14x8xf32>
    %c216 = arith.constant 216 : index
    %c0_56 = arith.constant 0 : index
    %221 = vector.load %arg3[%c216, %c0_56] : memref<224x128xf32, #tpu.memory_space<vmem>>, vector<8x15xf32>
    %cst_57 = arith.constant dense<0.000000e+00> : vector<14x15xf32>
    %222 = tpu.matmul %220, %221, %cst_57 {dimension_numbers = #tpu.dot_dimension_numbers<[1], [0], [0], [1], [0, 0, 1, 1], [], []>} : vector<14x8xf32>, vector<8x15xf32>, vector<14x15xf32> -> vector<14x15xf32>
    %223 = vector.shape_cast %222 : vector<14x15xf32> to vector<7x2x15xf32>
    %224 = vector.extract_strided_slice %223 {offsets = [0, 0, 0], sizes = [7, 2, 5], strides = [1, 1, 1]} : vector<7x2x15xf32> to vector<7x2x5xf32>
    %225 = vector.extract_strided_slice %223 {offsets = [0, 0, 5], sizes = [7, 2, 5], strides = [1, 1, 1]} : vector<7x2x15xf32> to vector<7x2x5xf32>
    %226 = vector.extract_strided_slice %223 {offsets = [0, 0, 10], sizes = [7, 2, 5], strides = [1, 1, 1]} : vector<7x2x15xf32> to vector<7x2x5xf32>
    %227 = math.cos %224 : vector<7x2x5xf32>
    %228 = math.sin %224 : vector<7x2x5xf32>
    %cst_58 = arith.constant 5.000000e-01 : f32
    %229 = vector.broadcast %cst_58 : f32 to vector<7x2x5xf32>
    %230 = arith.mulf %229, %224 : vector<7x2x5xf32>
    %231 = math.sin %230 : vector<7x2x5xf32>
    %232 = math.absf %224 : vector<7x2x5xf32>
    %cst_59 = arith.constant 9.99999974E-5 : f32
    %233 = vector.broadcast %cst_59 : f32 to vector<7x2x5xf32>
    %234 = arith.cmpf olt, %232, %233 : vector<7x2x5xf32>
    %cst_60 = arith.constant 1.000000e+00 : f32
    %235 = vector.broadcast %cst_60 : f32 to vector<7x2x5xf32>
    %236 = arith.select %234, %235, %224 : vector<7x2x5xi1>, vector<7x2x5xf32>
    %237 = arith.mulf %224, %224 : vector<7x2x5xf32>
    %cst_61 = arith.constant 6.000000e+00 : f32
    %238 = vector.broadcast %cst_61 : f32 to vector<7x2x5xf32>
    %239 = arith.divf %237, %238 : vector<7x2x5xf32>
    %cst_62 = arith.constant 1.000000e+00 : f32
    %240 = vector.broadcast %cst_62 : f32 to vector<7x2x5xf32>
    %241 = arith.subf %240, %239 : vector<7x2x5xf32>
    %242 = arith.divf %228, %236 : vector<7x2x5xf32>
    %243 = arith.select %234, %241, %242 : vector<7x2x5xi1>, vector<7x2x5xf32>
    %cst_63 = arith.constant 5.000000e-01 : f32
    %244 = vector.broadcast %cst_63 : f32 to vector<7x2x5xf32>
    %245 = arith.mulf %244, %224 : vector<7x2x5xf32>
    %cst_64 = arith.constant 2.000000e+00 : f32
    %246 = vector.broadcast %cst_64 : f32 to vector<7x2x5xf32>
    %247 = arith.mulf %246, %231 : vector<7x2x5xf32>
    %248 = arith.mulf %247, %231 : vector<7x2x5xf32>
    %249 = arith.divf %248, %236 : vector<7x2x5xf32>
    %250 = arith.select %234, %245, %249 : vector<7x2x5xi1>, vector<7x2x5xf32>
    %cst_65 = arith.constant 0.000000e+00 : f32
    %251 = vector.broadcast %cst_65 : f32 to vector<7x2x5xf32>
    %252 = arith.subf %251, %228 : vector<7x2x5xf32>
    %253 = arith.mulf %243, %225 : vector<7x2x5xf32>
    %254 = arith.mulf %250, %226 : vector<7x2x5xf32>
    %255 = arith.subf %253, %254 : vector<7x2x5xf32>
    %256 = arith.mulf %250, %225 : vector<7x2x5xf32>
    %257 = arith.mulf %243, %226 : vector<7x2x5xf32>
    %258 = arith.addf %256, %257 : vector<7x2x5xf32>
    %cst_66 = arith.constant 1.000000e+00 : f32
    %259 = vector.broadcast %cst_66 : f32 to vector<2x5xf32>
    %cst_67 = arith.constant 0.000000e+00 : f32
    %260 = vector.broadcast %cst_67 : f32 to vector<2x5xf32>
    %cst_68 = arith.constant 0.000000e+00 : f32
    %261 = vector.broadcast %cst_68 : f32 to vector<2x5xf32>
    %cst_69 = arith.constant 0.000000e+00 : f32
    %262 = vector.broadcast %cst_69 : f32 to vector<2x5xf32>
    %cst_70 = arith.constant 1.000000e+00 : f32
    %263 = vector.broadcast %cst_70 : f32 to vector<2x5xf32>
    %cst_71 = arith.constant 0.000000e+00 : f32
    %264 = vector.broadcast %cst_71 : f32 to vector<2x5xf32>
    %265 = vector.extract_strided_slice %227 {offsets = [0, 0, 0], sizes = [1, 2, 5], strides = [1, 1, 1]} : vector<7x2x5xf32> to vector<1x2x5xf32>
    %266 = vector.shape_cast %265 : vector<1x2x5xf32> to vector<2x5xf32>
    %267 = vector.extract_strided_slice %252 {offsets = [0, 0, 0], sizes = [1, 2, 5], strides = [1, 1, 1]} : vector<7x2x5xf32> to vector<1x2x5xf32>
    %268 = vector.shape_cast %267 : vector<1x2x5xf32> to vector<2x5xf32>
    %269 = vector.extract_strided_slice %255 {offsets = [0, 0, 0], sizes = [1, 2, 5], strides = [1, 1, 1]} : vector<7x2x5xf32> to vector<1x2x5xf32>
    %270 = vector.shape_cast %269 : vector<1x2x5xf32> to vector<2x5xf32>
    %271 = vector.extract_strided_slice %228 {offsets = [0, 0, 0], sizes = [1, 2, 5], strides = [1, 1, 1]} : vector<7x2x5xf32> to vector<1x2x5xf32>
    %272 = vector.shape_cast %271 : vector<1x2x5xf32> to vector<2x5xf32>
    %273 = vector.extract_strided_slice %227 {offsets = [0, 0, 0], sizes = [1, 2, 5], strides = [1, 1, 1]} : vector<7x2x5xf32> to vector<1x2x5xf32>
    %274 = vector.shape_cast %273 : vector<1x2x5xf32> to vector<2x5xf32>
    %275 = vector.extract_strided_slice %258 {offsets = [0, 0, 0], sizes = [1, 2, 5], strides = [1, 1, 1]} : vector<7x2x5xf32> to vector<1x2x5xf32>
    %276 = vector.shape_cast %275 : vector<1x2x5xf32> to vector<2x5xf32>
    %277 = arith.mulf %259, %266 : vector<2x5xf32>
    %278 = arith.mulf %260, %272 : vector<2x5xf32>
    %279 = arith.addf %277, %278 : vector<2x5xf32>
    %280 = arith.mulf %259, %268 : vector<2x5xf32>
    %281 = arith.mulf %260, %274 : vector<2x5xf32>
    %282 = arith.addf %280, %281 : vector<2x5xf32>
    %283 = arith.mulf %259, %270 : vector<2x5xf32>
    %284 = arith.mulf %260, %276 : vector<2x5xf32>
    %285 = arith.addf %283, %284 : vector<2x5xf32>
    %286 = arith.addf %285, %261 : vector<2x5xf32>
    %287 = arith.mulf %262, %266 : vector<2x5xf32>
    %288 = arith.mulf %263, %272 : vector<2x5xf32>
    %289 = arith.addf %287, %288 : vector<2x5xf32>
    %290 = arith.mulf %262, %268 : vector<2x5xf32>
    %291 = arith.mulf %263, %274 : vector<2x5xf32>
    %292 = arith.addf %290, %291 : vector<2x5xf32>
    %293 = arith.mulf %262, %270 : vector<2x5xf32>
    %294 = arith.mulf %263, %276 : vector<2x5xf32>
    %295 = arith.addf %293, %294 : vector<2x5xf32>
    %296 = arith.addf %295, %264 : vector<2x5xf32>
    %297 = vector.extract_strided_slice %227 {offsets = [1, 0, 0], sizes = [1, 2, 5], strides = [1, 1, 1]} : vector<7x2x5xf32> to vector<1x2x5xf32>
    %298 = vector.shape_cast %297 : vector<1x2x5xf32> to vector<2x5xf32>
    %299 = vector.extract_strided_slice %252 {offsets = [1, 0, 0], sizes = [1, 2, 5], strides = [1, 1, 1]} : vector<7x2x5xf32> to vector<1x2x5xf32>
    %300 = vector.shape_cast %299 : vector<1x2x5xf32> to vector<2x5xf32>
    %301 = vector.extract_strided_slice %255 {offsets = [1, 0, 0], sizes = [1, 2, 5], strides = [1, 1, 1]} : vector<7x2x5xf32> to vector<1x2x5xf32>
    %302 = vector.shape_cast %301 : vector<1x2x5xf32> to vector<2x5xf32>
    %303 = vector.extract_strided_slice %228 {offsets = [1, 0, 0], sizes = [1, 2, 5], strides = [1, 1, 1]} : vector<7x2x5xf32> to vector<1x2x5xf32>
    %304 = vector.shape_cast %303 : vector<1x2x5xf32> to vector<2x5xf32>
    %305 = vector.extract_strided_slice %227 {offsets = [1, 0, 0], sizes = [1, 2, 5], strides = [1, 1, 1]} : vector<7x2x5xf32> to vector<1x2x5xf32>
    %306 = vector.shape_cast %305 : vector<1x2x5xf32> to vector<2x5xf32>
    %307 = vector.extract_strided_slice %258 {offsets = [1, 0, 0], sizes = [1, 2, 5], strides = [1, 1, 1]} : vector<7x2x5xf32> to vector<1x2x5xf32>
    %308 = vector.shape_cast %307 : vector<1x2x5xf32> to vector<2x5xf32>
    %309 = arith.mulf %279, %298 : vector<2x5xf32>
    %310 = arith.mulf %282, %304 : vector<2x5xf32>
    %311 = arith.addf %309, %310 : vector<2x5xf32>
    %312 = arith.mulf %279, %300 : vector<2x5xf32>
    %313 = arith.mulf %282, %306 : vector<2x5xf32>
    %314 = arith.addf %312, %313 : vector<2x5xf32>
    %315 = arith.mulf %279, %302 : vector<2x5xf32>
    %316 = arith.mulf %282, %308 : vector<2x5xf32>
    %317 = arith.addf %315, %316 : vector<2x5xf32>
    %318 = arith.addf %317, %286 : vector<2x5xf32>
    %319 = arith.mulf %289, %298 : vector<2x5xf32>
    %320 = arith.mulf %292, %304 : vector<2x5xf32>
    %321 = arith.addf %319, %320 : vector<2x5xf32>
    %322 = arith.mulf %289, %300 : vector<2x5xf32>
    %323 = arith.mulf %292, %306 : vector<2x5xf32>
    %324 = arith.addf %322, %323 : vector<2x5xf32>
    %325 = arith.mulf %289, %302 : vector<2x5xf32>
    %326 = arith.mulf %292, %308 : vector<2x5xf32>
    %327 = arith.addf %325, %326 : vector<2x5xf32>
    %328 = arith.addf %327, %296 : vector<2x5xf32>
    %329 = vector.extract_strided_slice %227 {offsets = [2, 0, 0], sizes = [1, 2, 5], strides = [1, 1, 1]} : vector<7x2x5xf32> to vector<1x2x5xf32>
    %330 = vector.shape_cast %329 : vector<1x2x5xf32> to vector<2x5xf32>
    %331 = vector.extract_strided_slice %252 {offsets = [2, 0, 0], sizes = [1, 2, 5], strides = [1, 1, 1]} : vector<7x2x5xf32> to vector<1x2x5xf32>
    %332 = vector.shape_cast %331 : vector<1x2x5xf32> to vector<2x5xf32>
    %333 = vector.extract_strided_slice %255 {offsets = [2, 0, 0], sizes = [1, 2, 5], strides = [1, 1, 1]} : vector<7x2x5xf32> to vector<1x2x5xf32>
    %334 = vector.shape_cast %333 : vector<1x2x5xf32> to vector<2x5xf32>
    %335 = vector.extract_strided_slice %228 {offsets = [2, 0, 0], sizes = [1, 2, 5], strides = [1, 1, 1]} : vector<7x2x5xf32> to vector<1x2x5xf32>
    %336 = vector.shape_cast %335 : vector<1x2x5xf32> to vector<2x5xf32>
    %337 = vector.extract_strided_slice %227 {offsets = [2, 0, 0], sizes = [1, 2, 5], strides = [1, 1, 1]} : vector<7x2x5xf32> to vector<1x2x5xf32>
    %338 = vector.shape_cast %337 : vector<1x2x5xf32> to vector<2x5xf32>
    %339 = vector.extract_strided_slice %258 {offsets = [2, 0, 0], sizes = [1, 2, 5], strides = [1, 1, 1]} : vector<7x2x5xf32> to vector<1x2x5xf32>
    %340 = vector.shape_cast %339 : vector<1x2x5xf32> to vector<2x5xf32>
    %341 = arith.mulf %311, %330 : vector<2x5xf32>
    %342 = arith.mulf %314, %336 : vector<2x5xf32>
    %343 = arith.addf %341, %342 : vector<2x5xf32>
    %344 = arith.mulf %311, %332 : vector<2x5xf32>
    %345 = arith.mulf %314, %338 : vector<2x5xf32>
    %346 = arith.addf %344, %345 : vector<2x5xf32>
    %347 = arith.mulf %311, %334 : vector<2x5xf32>
    %348 = arith.mulf %314, %340 : vector<2x5xf32>
    %349 = arith.addf %347, %348 : vector<2x5xf32>
    %350 = arith.addf %349, %318 : vector<2x5xf32>
    %351 = arith.mulf %321, %330 : vector<2x5xf32>
    %352 = arith.mulf %324, %336 : vector<2x5xf32>
    %353 = arith.addf %351, %352 : vector<2x5xf32>
    %354 = arith.mulf %321, %332 : vector<2x5xf32>
    %355 = arith.mulf %324, %338 : vector<2x5xf32>
    %356 = arith.addf %354, %355 : vector<2x5xf32>
    %357 = arith.mulf %321, %334 : vector<2x5xf32>
    %358 = arith.mulf %324, %340 : vector<2x5xf32>
    %359 = arith.addf %357, %358 : vector<2x5xf32>
    %360 = arith.addf %359, %328 : vector<2x5xf32>
    %361 = vector.extract_strided_slice %227 {offsets = [3, 0, 0], sizes = [1, 2, 5], strides = [1, 1, 1]} : vector<7x2x5xf32> to vector<1x2x5xf32>
    %362 = vector.shape_cast %361 : vector<1x2x5xf32> to vector<2x5xf32>
    %363 = vector.extract_strided_slice %252 {offsets = [3, 0, 0], sizes = [1, 2, 5], strides = [1, 1, 1]} : vector<7x2x5xf32> to vector<1x2x5xf32>
    %364 = vector.shape_cast %363 : vector<1x2x5xf32> to vector<2x5xf32>
    %365 = vector.extract_strided_slice %255 {offsets = [3, 0, 0], sizes = [1, 2, 5], strides = [1, 1, 1]} : vector<7x2x5xf32> to vector<1x2x5xf32>
    %366 = vector.shape_cast %365 : vector<1x2x5xf32> to vector<2x5xf32>
    %367 = vector.extract_strided_slice %228 {offsets = [3, 0, 0], sizes = [1, 2, 5], strides = [1, 1, 1]} : vector<7x2x5xf32> to vector<1x2x5xf32>
    %368 = vector.shape_cast %367 : vector<1x2x5xf32> to vector<2x5xf32>
    %369 = vector.extract_strided_slice %227 {offsets = [3, 0, 0], sizes = [1, 2, 5], strides = [1, 1, 1]} : vector<7x2x5xf32> to vector<1x2x5xf32>
    %370 = vector.shape_cast %369 : vector<1x2x5xf32> to vector<2x5xf32>
    %371 = vector.extract_strided_slice %258 {offsets = [3, 0, 0], sizes = [1, 2, 5], strides = [1, 1, 1]} : vector<7x2x5xf32> to vector<1x2x5xf32>
    %372 = vector.shape_cast %371 : vector<1x2x5xf32> to vector<2x5xf32>
    %373 = arith.mulf %343, %362 : vector<2x5xf32>
    %374 = arith.mulf %346, %368 : vector<2x5xf32>
    %375 = arith.addf %373, %374 : vector<2x5xf32>
    %376 = arith.mulf %343, %364 : vector<2x5xf32>
    %377 = arith.mulf %346, %370 : vector<2x5xf32>
    %378 = arith.addf %376, %377 : vector<2x5xf32>
    %379 = arith.mulf %343, %366 : vector<2x5xf32>
    %380 = arith.mulf %346, %372 : vector<2x5xf32>
    %381 = arith.addf %379, %380 : vector<2x5xf32>
    %382 = arith.addf %381, %350 : vector<2x5xf32>
    %383 = arith.mulf %353, %362 : vector<2x5xf32>
    %384 = arith.mulf %356, %368 : vector<2x5xf32>
    %385 = arith.addf %383, %384 : vector<2x5xf32>
    %386 = arith.mulf %353, %364 : vector<2x5xf32>
    %387 = arith.mulf %356, %370 : vector<2x5xf32>
    %388 = arith.addf %386, %387 : vector<2x5xf32>
    %389 = arith.mulf %353, %366 : vector<2x5xf32>
    %390 = arith.mulf %356, %372 : vector<2x5xf32>
    %391 = arith.addf %389, %390 : vector<2x5xf32>
    %392 = arith.addf %391, %360 : vector<2x5xf32>
    %393 = vector.extract_strided_slice %227 {offsets = [4, 0, 0], sizes = [1, 2, 5], strides = [1, 1, 1]} : vector<7x2x5xf32> to vector<1x2x5xf32>
    %394 = vector.shape_cast %393 : vector<1x2x5xf32> to vector<2x5xf32>
    %395 = vector.extract_strided_slice %252 {offsets = [4, 0, 0], sizes = [1, 2, 5], strides = [1, 1, 1]} : vector<7x2x5xf32> to vector<1x2x5xf32>
    %396 = vector.shape_cast %395 : vector<1x2x5xf32> to vector<2x5xf32>
    %397 = vector.extract_strided_slice %255 {offsets = [4, 0, 0], sizes = [1, 2, 5], strides = [1, 1, 1]} : vector<7x2x5xf32> to vector<1x2x5xf32>
    %398 = vector.shape_cast %397 : vector<1x2x5xf32> to vector<2x5xf32>
    %399 = vector.extract_strided_slice %228 {offsets = [4, 0, 0], sizes = [1, 2, 5], strides = [1, 1, 1]} : vector<7x2x5xf32> to vector<1x2x5xf32>
    %400 = vector.shape_cast %399 : vector<1x2x5xf32> to vector<2x5xf32>
    %401 = vector.extract_strided_slice %227 {offsets = [4, 0, 0], sizes = [1, 2, 5], strides = [1, 1, 1]} : vector<7x2x5xf32> to vector<1x2x5xf32>
    %402 = vector.shape_cast %401 : vector<1x2x5xf32> to vector<2x5xf32>
    %403 = vector.extract_strided_slice %258 {offsets = [4, 0, 0], sizes = [1, 2, 5], strides = [1, 1, 1]} : vector<7x2x5xf32> to vector<1x2x5xf32>
    %404 = vector.shape_cast %403 : vector<1x2x5xf32> to vector<2x5xf32>
    %405 = arith.mulf %375, %394 : vector<2x5xf32>
    %406 = arith.mulf %378, %400 : vector<2x5xf32>
    %407 = arith.addf %405, %406 : vector<2x5xf32>
    %408 = arith.mulf %375, %396 : vector<2x5xf32>
    %409 = arith.mulf %378, %402 : vector<2x5xf32>
    %410 = arith.addf %408, %409 : vector<2x5xf32>
    %411 = arith.mulf %375, %398 : vector<2x5xf32>
    %412 = arith.mulf %378, %404 : vector<2x5xf32>
    %413 = arith.addf %411, %412 : vector<2x5xf32>
    %414 = arith.addf %413, %382 : vector<2x5xf32>
    %415 = arith.mulf %385, %394 : vector<2x5xf32>
    %416 = arith.mulf %388, %400 : vector<2x5xf32>
    %417 = arith.addf %415, %416 : vector<2x5xf32>
    %418 = arith.mulf %385, %396 : vector<2x5xf32>
    %419 = arith.mulf %388, %402 : vector<2x5xf32>
    %420 = arith.addf %418, %419 : vector<2x5xf32>
    %421 = arith.mulf %385, %398 : vector<2x5xf32>
    %422 = arith.mulf %388, %404 : vector<2x5xf32>
    %423 = arith.addf %421, %422 : vector<2x5xf32>
    %424 = arith.addf %423, %392 : vector<2x5xf32>
    %425 = vector.extract_strided_slice %227 {offsets = [5, 0, 0], sizes = [1, 2, 5], strides = [1, 1, 1]} : vector<7x2x5xf32> to vector<1x2x5xf32>
    %426 = vector.shape_cast %425 : vector<1x2x5xf32> to vector<2x5xf32>
    %427 = vector.extract_strided_slice %252 {offsets = [5, 0, 0], sizes = [1, 2, 5], strides = [1, 1, 1]} : vector<7x2x5xf32> to vector<1x2x5xf32>
    %428 = vector.shape_cast %427 : vector<1x2x5xf32> to vector<2x5xf32>
    %429 = vector.extract_strided_slice %255 {offsets = [5, 0, 0], sizes = [1, 2, 5], strides = [1, 1, 1]} : vector<7x2x5xf32> to vector<1x2x5xf32>
    %430 = vector.shape_cast %429 : vector<1x2x5xf32> to vector<2x5xf32>
    %431 = vector.extract_strided_slice %228 {offsets = [5, 0, 0], sizes = [1, 2, 5], strides = [1, 1, 1]} : vector<7x2x5xf32> to vector<1x2x5xf32>
    %432 = vector.shape_cast %431 : vector<1x2x5xf32> to vector<2x5xf32>
    %433 = vector.extract_strided_slice %227 {offsets = [5, 0, 0], sizes = [1, 2, 5], strides = [1, 1, 1]} : vector<7x2x5xf32> to vector<1x2x5xf32>
    %434 = vector.shape_cast %433 : vector<1x2x5xf32> to vector<2x5xf32>
    %435 = vector.extract_strided_slice %258 {offsets = [5, 0, 0], sizes = [1, 2, 5], strides = [1, 1, 1]} : vector<7x2x5xf32> to vector<1x2x5xf32>
    %436 = vector.shape_cast %435 : vector<1x2x5xf32> to vector<2x5xf32>
    %437 = arith.mulf %407, %426 : vector<2x5xf32>
    %438 = arith.mulf %410, %432 : vector<2x5xf32>
    %439 = arith.addf %437, %438 : vector<2x5xf32>
    %440 = arith.mulf %407, %428 : vector<2x5xf32>
    %441 = arith.mulf %410, %434 : vector<2x5xf32>
    %442 = arith.addf %440, %441 : vector<2x5xf32>
    %443 = arith.mulf %407, %430 : vector<2x5xf32>
    %444 = arith.mulf %410, %436 : vector<2x5xf32>
    %445 = arith.addf %443, %444 : vector<2x5xf32>
    %446 = arith.addf %445, %414 : vector<2x5xf32>
    %447 = arith.mulf %417, %426 : vector<2x5xf32>
    %448 = arith.mulf %420, %432 : vector<2x5xf32>
    %449 = arith.addf %447, %448 : vector<2x5xf32>
    %450 = arith.mulf %417, %428 : vector<2x5xf32>
    %451 = arith.mulf %420, %434 : vector<2x5xf32>
    %452 = arith.addf %450, %451 : vector<2x5xf32>
    %453 = arith.mulf %417, %430 : vector<2x5xf32>
    %454 = arith.mulf %420, %436 : vector<2x5xf32>
    %455 = arith.addf %453, %454 : vector<2x5xf32>
    %456 = arith.addf %455, %424 : vector<2x5xf32>
    %457 = vector.extract_strided_slice %227 {offsets = [6, 0, 0], sizes = [1, 2, 5], strides = [1, 1, 1]} : vector<7x2x5xf32> to vector<1x2x5xf32>
    %458 = vector.shape_cast %457 : vector<1x2x5xf32> to vector<2x5xf32>
    %459 = vector.extract_strided_slice %252 {offsets = [6, 0, 0], sizes = [1, 2, 5], strides = [1, 1, 1]} : vector<7x2x5xf32> to vector<1x2x5xf32>
    %460 = vector.shape_cast %459 : vector<1x2x5xf32> to vector<2x5xf32>
    %461 = vector.extract_strided_slice %255 {offsets = [6, 0, 0], sizes = [1, 2, 5], strides = [1, 1, 1]} : vector<7x2x5xf32> to vector<1x2x5xf32>
    %462 = vector.shape_cast %461 : vector<1x2x5xf32> to vector<2x5xf32>
    %463 = vector.extract_strided_slice %228 {offsets = [6, 0, 0], sizes = [1, 2, 5], strides = [1, 1, 1]} : vector<7x2x5xf32> to vector<1x2x5xf32>
    %464 = vector.shape_cast %463 : vector<1x2x5xf32> to vector<2x5xf32>
    %465 = vector.extract_strided_slice %227 {offsets = [6, 0, 0], sizes = [1, 2, 5], strides = [1, 1, 1]} : vector<7x2x5xf32> to vector<1x2x5xf32>
    %466 = vector.shape_cast %465 : vector<1x2x5xf32> to vector<2x5xf32>
    %467 = vector.extract_strided_slice %258 {offsets = [6, 0, 0], sizes = [1, 2, 5], strides = [1, 1, 1]} : vector<7x2x5xf32> to vector<1x2x5xf32>
    %468 = vector.shape_cast %467 : vector<1x2x5xf32> to vector<2x5xf32>
    %469 = arith.mulf %439, %458 : vector<2x5xf32>
    %470 = arith.mulf %442, %464 : vector<2x5xf32>
    %471 = arith.addf %469, %470 : vector<2x5xf32>
    %472 = arith.mulf %439, %460 : vector<2x5xf32>
    %473 = arith.mulf %442, %466 : vector<2x5xf32>
    %474 = arith.addf %472, %473 : vector<2x5xf32>
    %475 = arith.mulf %439, %462 : vector<2x5xf32>
    %476 = arith.mulf %442, %468 : vector<2x5xf32>
    %477 = arith.addf %475, %476 : vector<2x5xf32>
    %478 = arith.addf %477, %446 : vector<2x5xf32>
    %479 = arith.mulf %449, %458 : vector<2x5xf32>
    %480 = arith.mulf %452, %464 : vector<2x5xf32>
    %481 = arith.addf %479, %480 : vector<2x5xf32>
    %482 = arith.mulf %449, %460 : vector<2x5xf32>
    %483 = arith.mulf %452, %466 : vector<2x5xf32>
    %484 = arith.addf %482, %483 : vector<2x5xf32>
    %485 = arith.mulf %449, %462 : vector<2x5xf32>
    %486 = arith.mulf %452, %468 : vector<2x5xf32>
    %487 = arith.addf %485, %486 : vector<2x5xf32>
    %488 = arith.addf %487, %456 : vector<2x5xf32>
    %c0_72 = arith.constant 0 : index
    %c0_73 = arith.constant 0 : index
    %c0_74 = arith.constant 0 : index
    %c0_75 = arith.constant 0 : index
    %489 = vector.load %arg2[%c0_72, %c0_73, %c0_74, %c0_75] : memref<2x1x2x5xf32, #tpu.memory_space<vmem>>, vector<2x1x2x5xf32>
    %490 = vector.extract_strided_slice %489 {offsets = [0, 0, 0, 0], sizes = [1, 1, 2, 5], strides = [1, 1, 1, 1]} : vector<2x1x2x5xf32> to vector<1x1x2x5xf32>
    %491 = vector.shape_cast %490 : vector<1x1x2x5xf32> to vector<2x5xf32>
    %492 = vector.extract_strided_slice %489 {offsets = [1, 0, 0, 0], sizes = [1, 1, 2, 5], strides = [1, 1, 1, 1]} : vector<2x1x2x5xf32> to vector<1x1x2x5xf32>
    %493 = vector.shape_cast %492 : vector<1x1x2x5xf32> to vector<2x5xf32>
    %494 = arith.mulf %471, %491 : vector<2x5xf32>
    %495 = arith.mulf %474, %493 : vector<2x5xf32>
    %496 = arith.addf %494, %495 : vector<2x5xf32>
    %497 = arith.addf %496, %478 : vector<2x5xf32>
    %498 = arith.mulf %481, %491 : vector<2x5xf32>
    %499 = arith.mulf %484, %493 : vector<2x5xf32>
    %500 = arith.addf %498, %499 : vector<2x5xf32>
    %501 = arith.addf %500, %488 : vector<2x5xf32>
    %502 = tpu.concatenate %497, %501 in 1 : vector<2x5xf32>, vector<2x5xf32> -> vector<2x10xf32>
    %c0_76 = arith.constant 0 : index
    %c0_77 = arith.constant 0 : index
    %c0_78 = arith.constant 0 : index
    %503 = vector.load %arg4[%c0_76, %c0_77, %c0_78] : memref<1x2x10xf32, #tpu.memory_space<vmem>>, vector<1x2x10xf32>
    %504 = vector.shape_cast %503 : vector<1x2x10xf32> to vector<2x10xf32>
    %505 = vector.shape_cast %502 : vector<2x10xf32> to vector<1x2x10xf32>
    tpu.vector_store %arg4[%c0_76, %c0_77, %c0_78], %505 {strides = array<i32>} : memref<1x2x10xf32, #tpu.memory_space<vmem>>, vector<1x2x10xf32>,
    return
  }
  func.func @transform_0(%arg0: i32) -> (i32, i32, i32, i32) {
    %c0_i32 = arith.constant 0 : i32
    %c0_i32_0 = arith.constant 0 : i32
    %c0_i32_1 = arith.constant 0 : i32
    %c0_i32_2 = arith.constant 0 : i32
    return %c0_i32, %arg0, %c0_i32_0, %c0_i32_1 : i32, i32, i32, i32
  }
  func.func @transform_1(%arg0: i32) -> (i32, i32, i32, i32) {
    %c0_i32 = arith.constant 0 : i32
    %c0_i32_0 = arith.constant 0 : i32
    %c0_i32_1 = arith.constant 0 : i32
    %c0_i32_2 = arith.constant 0 : i32
    return %c0_i32, %arg0, %c0_i32_0, %c0_i32_1 : i32, i32, i32, i32
  }
  func.func @transform_2(%arg0: i32) -> (i32, i32) {
    %c0_i32 = arith.constant 0 : i32
    %c0_i32_0 = arith.constant 0 : i32
    %c0_i32_1 = arith.constant 0 : i32
    return %c0_i32, %c0_i32_0 : i32, i32
  }
  func.func @transform_3(%arg0: i32) -> (i32, i32, i32) {
    %c0_i32 = arith.constant 0 : i32
    %c0_i32_0 = arith.constant 0 : i32
    %c0_i32_1 = arith.constant 0 : i32
    return %arg0, %c0_i32, %c0_i32_0 : i32, i32, i32
  }
}

</mosaic_0001>

<bundles_post_ra>
// kernel: lstm_development_forward.1
= control target key start
LH: loop header
LB: loop body
LE: loop exit
PB: predicated region body
PF: predicated region fallthrough
CT: control target
= control target key end

     0   :  { %8 = vsyncpa [#allocation4], 0  ;;  %s4789_s12 = smov [#allocation3]   ;;  %s6801_s0 = inlined_call_operand.vmem [shape: f32[8,1,2,20], index: 0, kind: input, shape index: {}]   ;;  %s6802_s1 = inlined_call_operand.vmem [shape: f32[2,1,2,5], index: 1, kind: input, shape index: {}]   ;;  %s6803_s2 = inlined_call_operand.hbm [shape: f32[224,128], index: 2, kind: input, shape index: {}]   ;;  %s6804_s3 = inlined_call_operand.vmem [shape: f32[1,2,10], index: 3, kind: output, shape index: {}]  }
   0x1   :  { %s18_s13 = sshll.u32 %s4789_s12, 4  ;;  %s4765_s16 = scalar_lea.hbm %s6803_s2, 3584  ;;  %s19_s13 = int_to_ptr.vmem [resolvable:$true] %s18_s13 }
   0x2   :  { %p4766_p0 = scmp.ne.s32.totalorder %s6803_s2, %s4765_s16  ;;  %p4769_p1 = scmp.lt.u32.totalorder %s4765_s16, %s6803_s2 }
   0x4   :  { %p4771_p2 = pnand %p4769_p1, %p4766_p0 }
   0x6   :  { %4774 = shalt.err (!%p4771_p2)
}
   0x7   :  { %s4775_s21 = scalar_lea.vmem %s19_s13, 3584  ;;  %p4780_p4 = scmp.lt.s32.totalorder %s19_s13, %s19_s13 }
   0x8   :  { %p4776_p3 = scmp.ne.s32.totalorder %s19_s13, %s4775_s21  ;;  %p4781_p5 = scmp.lt.s32.totalorder %s4775_s21, %s4775_s21 }
   0xa   :  { %p4782_p6 = por %p4781_p5, %p4780_p4 }
   0xc   :  { %p4783_p7 = pnand %p4782_p6, %p4776_p3 }
   0xe   :  { %4786 = shalt.err (!%p4783_p7)
}
   0xf   :  { %s4790_s22 = smov 128   ;;  %s4791_s23 = smov 8  }
  0x10   :  { %24 = dma.hbm_to_vmem [thread:$0]  %s6803_s2, 3584, %s19_s13, [#allocation4], %s4790_s22, %s4790_s22, %s4791_s23  }
  0x11   :  { %4787 = dma.done.wait [#allocation4], 3584  }
  0x12   :  { %4788 = vsyncadd [#allocation4], 4294963712  ;;  %v57_v0 = vlaneseq  ;;  %v4792_v1 = vmov 1983009808   ;;  %v36_v5 = vld [vmem:[#allocation3] sm:$0xff]  ;;  %v37_v6 = vld [vmem:[#allocation3 + $0x8] sm:$0xff] }
  0x13   :  { %v55_v2 = vunpack.c.l.s4 %v4792_v1  ;;  %v38_v7 = vld [vmem:[#allocation3 + $0x10] sm:$0xf]  ;;  %vm91_vm0 = vcmask 1043456   ;;  %v4500_v9 = vpack.c.bf16 %v37_v6, %v36_v5  ;;  %v30_v12 = vld [vmem:[%s6801_s0 + $0x4] sm:$0x3]  ;;  %v172_v21 = vld [vmem:[#allocation3 + $0x20] sm:$0xff] }
  0x14   :  { %v58_v4 = vshrl.u32 %v57_v0, 7  ;;  %v28_v10 = vld [vmem:[%s6801_s0] sm:$0x3]  ;;  %v29_v11 = vld [vmem:[%s6801_s0 + $0x2] sm:$0x3]  ;;  %v173_v24 = vld [vmem:[#allocation3 + $0x28] sm:$0xff] }
  0x15   :  { %v56_v3 = vunpack.c.0.s8 %v55_v2  ;;  %v31_v13 = vld [vmem:[%s6801_s0 + $0x6] sm:$0x3]  ;;  %v52_v14 = vcombine.low %v28_v10, %v29_v11  ;;  %v32_v15 = vld [vmem:[%s6801_s0 + $0x8] sm:$0x3]  ;;  %v33_v16 = vld [vmem:[%s6801_s0 + $0xa] sm:$0x3]  ;;  %4501 = vmatprep.subr.bf16.mxu0 %v4500_v9  ;;  %v4504_v29 = vpack.c.bf16 %v173_v24, %v172_v21 }
  0x16   :  { %v53_v17 = vcombine.low %v30_v12, %v31_v13  ;;  %v34_v18 = vld [vmem:[%s6801_s0 + $0xc] sm:$0x3]  ;;  %v35_v19 = vld [vmem:[%s6801_s0 + $0xe] sm:$0x3]  ;;  %v69_v20 = vcombine.low %v32_v15, %v33_v16  ;;  %4503 = vmatpush3.bf16.msra.mxu0 %v4500_v9  ;;  %v174_v25 = vld [vmem:[#allocation3 + $0x30] sm:$0xff]  ;;  %vm86_vm1 = vcmask 162816  }
  0x17   :  { %v4840_v8 = vsub.s32 %v56_v3, %v58_v4  ;;  %v70_v23 = vcombine.low %v34_v18, %v35_v19  ;;  %v175_v26 = vld [vmem:[#allocation3 + $0x38] sm:$0xff]  ;;  %4375 = vmatprep.subr.msk.mxu0 %vm91_vm0, %v38_v7  ;;  %4505 = vmatprep.subr.bf16.mxu1 %v4504_v29  ;;  %v176_v34 = vld [vmem:[#allocation3 + $0x40] sm:$0xff]  ;;  %v177_v35 = vld [vmem:[#allocation3 + $0x48] sm:$0xff]  ;;  %vm191_vm2 = vcmask 1041408   ;;  %vm184_vm3 = vcmask 408576   ;;  %s4796_s0 = smov 68  }
  0x18   :  { %v4508_v30 = vpack.c.bf16 %v175_v26, %v174_v25  ;;  %4507 = vmatpush3.bf16.msra.mxu1 %v4504_v29  ;;  %v4512_v36 = vpack.c.bf16 %v177_v35, %v176_v34  ;;  %v178_v37 = vld [vmem:[#allocation3 + $0x50] sm:$0x3]  ;;  %v272_v38 = vld [vmem:[#allocation3 + $0x60] sm:$0xff]  ;;  %v273_v39 = vld [vmem:[#allocation3 + $0x68] sm:$0xff]  ;;  %v4793_v58 = vmov 0.0|0.0   ;;  %v4794_v60 = vmov 0.0  }
  0x19   :  { %6852 = vst [vmem:[#allocation6_spill] sm:$0xff] %v4840_v8  ;;  %v60_v22 = vrot.slane %v52_v14, %v4840_v8  ;;  %v67_v27 = vrot.slane %v53_v17, %v4840_v8  ;;  %v77_v28 = vrot.slane %v69_v20, %v4840_v8  ;;  %v84_v31 = vrot.slane %v70_v23, %v4840_v8  ;;  %v274_v40 = vld [vmem:[#allocation3 + $0x70] sm:$0xff]  ;;  %v275_v42 = vld [vmem:[#allocation3 + $0x78] sm:$0xff]  ;;  %v276_v51 = vld [vmem:[#allocation3 + $0x80] sm:$0xff]  ;;  %s4797_s14 = smov 20   ;;  %s4798_s15 = smov 88  }
  0x1a   :  { %4376 = vmatpush3.msk.msra.mxu0 %vm91_vm0, %v38_v7  ;;  %4509 = vmatprep.subr.bf16.mxu1 %v4508_v30  ;;  %v4516_v41 = vpack.c.bf16 %v273_v39, %v272_v38  ;;  %v4520_v43 = vpack.c.bf16 %v275_v42, %v274_v40  ;;  %v4183_v44 = vld [vmem:[#allocation3 + $0x18] ss:$0 sm:$0xff]  ;;  %v277_v52 = vld [vmem:[#allocation3 + $0x88] sm:$0xff]  ;;  %v413_v55 = vld [vmem:[#allocation3 + $0xa0] sm:$0xff]  ;;  %vm4795_vm4 = vmmov 0   ;;  %vm527_vm5 = vcmask 156672  }
  0x1b   :  { %v68_v32 = vcombine.low %v60_v22, %v67_v27  ;;  %v85_v33 = vcombine.low %v77_v28, %v84_v31  ;;  %v4524_v53 = vpack.c.bf16 %v277_v52, %v276_v51  ;;  %v412_v54 = vld [vmem:[#allocation3 + $0x98] sm:$0xff]  ;;  %v278_v56 = vld [vmem:[#allocation3 + $0x90] sm:$0x3]  ;;  %v4884_v59 = vld [vmem:[#allocation3 + $0xa8] sm:$0xf]  ;;  %vm1531_vm6 = vcmask 64512  }
  0x1c   :  { %4511 = vmatpush3.bf16.msra.mxu1 %v4508_v30  ;;  %4517 = vmatprep.subr.bf16.mxu0 %v4516_v41  ;;  %v4878_v57 = vpack.c.bf16 %v413_v55, %v412_v54  ;;  %v4187_v61 = vld [vmem:[#allocation3 + $0x58] ss:$0 sm:$0xff]  ;;  %v4191_v6 = vld [vmem:[#allocation3 + $0xb0] ss:$0 sm:$0xff]  ;;  %s4799_s16 = smov 118   ;;  %s4800_s17 = smov 123  }
  0x1d   :  { %4377 = vmatprep.mubr.msk.f32.mxu0 %vm86_vm1, %v68_v32  ;;  %4513 = vmatprep.subr.bf16.mxu1 %v4512_v36 }
  0x1e   :  { %4378 = vmatmul.mubr.msk.f32.vlgmr.msra.gmra.mrb[0].mxu0 %vm86_vm1, %v85_v33 }
  0x1f   :  { %4519 = vmatpush3.bf16.msra.mxu0 %v4516_v41 }
  0x20   :  { %4515 = vmatpush3.bf16.msra.mxu1 %v4512_v36  ;;  %4521 = vmatprep.subr.bf16.mxu0 %v4520_v43 }
  0x21   :  { %4392 = vmatprep.subr.msk.mxu1 %vm191_vm2, %v178_v37 }
  0x23   :  { %4523 = vmatpush3.bf16.msra.mxu0 %v4520_v43 }
  0x24   :  { %4393 = vmatpush3.msk.msra.mxu1 %vm191_vm2, %v178_v37  ;;  %4525 = vmatprep.subr.bf16.mxu0 %v4524_v53 }
  0x25   :  { %4528 = vmatprep.subr.bf16.mxu1 %v4793_v58 }
  0x27   :  { %4527 = vmatpush3.bf16.msra.mxu0 %v4524_v53 }
  0x28   :  { %4409 = vmatprep.subr.msk.mxu0 %vm191_vm2, %v278_v56 }
  0x2b   :  { %4410 = vmatpush3.msk.msra.mxu0 %vm191_vm2, %v278_v56 }
  0x2c   :  { %4531 = vmatprep.subr.bf16.mxu0 %v4793_v58 }
  0xf1   :  { %v4379_v45 = vpop.f32.mrb[0].mxu0 }
  0xf2   :  { %v167_v46 = vadd.f32 %v4379_v45, %v4183_v44  ;;  %v161_v47 = vpop.f32.mrb[1].mxu0 }
  0xf3   :  { %v162_v48 = vadd.f32 %v4183_v44, %v161_v47 }
  0xf4   :  { %v171_v50 = vmax.f32 %v167_v46, 0.0 }
  0xf5   :  { %v170_v49 = vmax.f32 %v162_v48, 0.0 }
  0xf7   :  { %4394 = vmatprep.mubr.msk.f32.mxu1 %vm184_vm3, %v170_v49 }
  0xf8   :  { %4395 = vmatmul.mubr.msk.f32.vlgmr.msra.gmra.mrb[0].mxu1 %vm184_vm3, %v171_v50 }
  0xf9   :  { %4530 = vmatpush3.bf16.msra.mxu1 %v4878_v57  ;;  %4420 = vmatprep.mubr.msk.f32.mxu1 %vm4795_vm4, %v4794_v60 }
  0xfa   :  { %4418 = vmatprep.subr.mxu1 %v4794_v60 }
  0xfd   :  { %4419 = vmatpush3.msk.msra.mxu1 %vm91_vm0, %v4884_v59 }
  0xfe   :  { %4421 = vmatmul.mubr.f32.vlgmr.msra.gmra.mrb[2].mxu1 %v4794_v60  ;;  %4534 = vmatprep.subr.bf16.mxu1 %v4793_v58 }
  0xff   :  { %4536 = vmatpush3.bf16.msra.mxu1 %v4878_v57  ;;  %4438 = vmatprep.mubr.msk.f32.mxu1 %vm4795_vm4, %v4794_v60 }
 0x100   :  { %4436 = vmatprep.subr.mxu1 %v4794_v60 }
 0x103   :  { %4437 = vmatpush3.msk.msra.mxu1 %vm91_vm0, %v4884_v59 }
 0x104   :  { %4540 = vmatprep.subr.bf16.mxu1 %v4793_v58 }
 0x1cb   :  { %v4396_v62 = vpop.f32.mrb[0].mxu1 }
 0x1cc   :  { %v267_v63 = vadd.f32 %v4396_v62, %v4187_v61  ;;  %v261_v0 = vpop.f32.mrb[1].mxu1 }
 0x1cd   :  { %v262_v1 = vadd.f32 %v4187_v61, %v261_v0 }
 0x1ce   :  { %v271_v3 = vmax.f32 %v267_v63, 0.0 }
 0x1cf   :  { %v270_v2 = vmax.f32 %v262_v1, 0.0 }
 0x1d1   :  { %4411 = vmatprep.mubr.msk.f32.mxu0 %vm184_vm3, %v270_v2  ;;  %v487_v4 = vpop.f32.mrb[2].mxu1 }
 0x1d2   :  { %4412 = vmatmul.mubr.msk.f32.vlgmr.msra.gmra.mrb[2].mxu0 %vm184_vm3, %v271_v3  ;;  %v4422_v5 = vpop.f32.mrb[3].mxu1 }
 0x1d3   :  { %4533 = vmatpush3.bf16.msra.mxu0 %v4878_v57  ;;  %4429 = vmatprep.mubr.msk.f32.mxu0 %vm4795_vm4, %v4794_v60 }
 0x1d4   :  { %4427 = vmatprep.subr.mxu0 %v4794_v60 }
 0x1d7   :  { %4428 = vmatpush3.msk.msra.mxu0 %vm91_vm0, %v4884_v59 }
 0x1d8   :  { %4537 = vmatprep.subr.bf16.mxu0 %v4793_v58 }
 0x2a5   :  { %v4413_v7 = vpop.f32.mrb[2].mxu0 }
 0x2a6   :  { %v4910_v9 = vadd.f32 %v4413_v7, %v4191_v6  ;;  %v359_v10 = vpop.f32.mrb[3].mxu0 }
 0x2a7   :  { %v4912_v11 = vadd.f32 %v4191_v6, %v359_v10 }
 0x2a9   :  { %v377_v12 = vrot.slane %v4912_v11, %v4840_v8  ;;  %v370_v48 = vcombine.high %v4912_v11, %v4912_v11 }
 0x2ab   :  { %v491_v13 = vadd.f32 %v487_v4, %v377_v12  ;;  %v385_v29 = vcombine.high %v377_v12, %v377_v12  ;;  %v384_v49 = vrot.slane %v370_v48, %v4840_v8 }
 0x2ad   :  { %4631 = vtanh.f32 %v491_v13  ;;  %v4196_v15 = vmul.f32 -1.442695, %v491_v13  ;;  %v386_v10 = vcombine.high %v384_v49, %v384_v49 }
 0x2af   :  { %4633 = vpow2.f32 %v4196_v15 }
 0x2b7   :  { %v4632_v14 = vpop.eup %4631 }
 0x2b8   :  { %501 = vrot.lane.b32.xlu0 %v4632_v14, %s4796_s0 }
 0x2b9   :  { %v4634_v16 = vpop.eup %4633 }
 0x2ba   :  { %v495_v17 = vadd.f32 1.0, %v4634_v16 }
 0x2bc   :  { %4635 = vrcp.f32 %v495_v17 }
 0x2c6   :  { %v4636_v18 = vpop.eup %4635 }
 0x2c7   :  { %v499_v21 = vmul.f32 0.0, %v4636_v18 }
 0x32a   :  { %v502_v19 = vpop.permute.xlu0 %501 }
 0x32b   :  { %v504_v20 = vmul.f32 %v4636_v18, %v502_v19 }
 0x32d   :  { %506 = vrot.lane.b32.xlu0 %v504_v20, %s4797_s14 }
 0x39f   :  { %v507_v22 = vpop.permute.xlu0 %506 }
 0x3a0   :  { %v509_v23 = vadd.f32 %v507_v22, %v499_v21 }
 0x3a2   :  { %4637 = vtanh.f32 %v509_v23 }
 0x3ac   :  { %v4638_v24 = vpop.eup %4637 }
 0x3ad   :  { %512 = vrot.lane.b32.xlu1 %v4638_v24, %s4797_s14 }
 0x41f   :  { %v513_v25 = vpop.permute.xlu1 %512 }
 0x420   :  { %v515_v26 = vmul.f32 %v4636_v18, %v513_v25 }
 0x422   :  { %v523_v27 = vrot.slane %v515_v26, %v4840_v8 }
 0x424   :  { %524 = vrot.lane.b32.xlu1 %v523_v27, %s4798_s15 }
 0x496   :  { %v525_v28 = vpop.permute.xlu1 %524 }
 0x497   :  { %528 = vst.msk [vmem:[#allocation2] sm:$0x3] %vm527_vm5, %v525_v28  ;;  %4430 = vmatmul.mubr.msk.f32.vlgmr.msra.gmra.mrb[4].mxu0 %vm86_vm1, %v525_v28  ;;  %v394_v28 = vrot.slane %v4910_v9, %v4840_v8 }
 0x498   :  { %4539 = vmatpush3.bf16.msra.mxu0 %v4878_v57  ;;  %4447 = vmatprep.mubr.msk.f32.mxu0 %vm4795_vm4, %v4794_v60 }
 0x499   :  { %4445 = vmatprep.subr.mxu0 %v4794_v60 }
 0x49c   :  { %4446 = vmatpush3.msk.msra.mxu0 %vm91_vm0, %v4884_v59 }
 0x49d   :  { %4543 = vmatprep.subr.bf16.mxu0 %v4793_v58 }
 0x56a   :  { %v597_v30 = vpop.f32.mrb[4].mxu0 }
 0x56b   :  { %v601_v31 = vadd.f32 %v597_v30, %v385_v29  ;;  %v4431_v32 = vpop.f32.mrb[5].mxu0 }
 0x56d   :  { %4639 = vtanh.f32 %v601_v31  ;;  %v4199_v34 = vmul.f32 -1.442695, %v601_v31 }
 0x56f   :  { %4641 = vpow2.f32 %v4199_v34 }
 0x577   :  { %v4640_v33 = vpop.eup %4639 }
 0x578   :  { %611 = vrot.lane.b32.xlu0 %v4640_v33, %s4796_s0 }
 0x579   :  { %v4642_v35 = vpop.eup %4641 }
 0x57a   :  { %v605_v36 = vadd.f32 1.0, %v4642_v35 }
 0x57c   :  { %4643 = vrcp.f32 %v605_v36 }
 0x586   :  { %v4644_v37 = vpop.eup %4643 }
 0x587   :  { %v609_v40 = vmul.f32 %v4644_v37, %v509_v23 }
 0x5ea   :  { %v612_v38 = vpop.permute.xlu0 %611 }
 0x5eb   :  { %v614_v39 = vmul.f32 %v4644_v37, %v612_v38 }
 0x5ed   :  { %616 = vrot.lane.b32.xlu1 %v614_v39, %s4797_s14 }
 0x65f   :  { %v617_v41 = vpop.permute.xlu1 %616 }
 0x660   :  { %v619_v42 = vadd.f32 %v617_v41, %v609_v40 }
 0x662   :  { %4645 = vtanh.f32 %v619_v42 }
 0x66c   :  { %v4646_v43 = vpop.eup %4645 }
 0x66d   :  { %622 = vrot.lane.b32.xlu0 %v4646_v43, %s4797_s14 }
 0x6df   :  { %v623_v44 = vpop.permute.xlu0 %622 }
 0x6e0   :  { %v625_v45 = vmul.f32 %v4644_v37, %v623_v44 }
 0x6e2   :  { %v633_v46 = vrot.slane %v625_v45, %v4840_v8 }
 0x6e4   :  { %634 = vrot.lane.b32.xlu1 %v633_v46, %s4798_s15 }
 0x756   :  { %v635_v47 = vpop.permute.xlu1 %634 }
 0x757   :  { %638 = vst.msk [vmem:[#allocation2 + $0x2] sm:$0x3] %vm527_vm5, %v635_v47  ;;  %4439 = vmatmul.mubr.msk.f32.vlgmr.msra.gmra.mrb[4].mxu1 %vm86_vm1, %v635_v47  ;;  %v402_v47 = vcombine.high %v394_v28, %v394_v28 }
 0x758   :  { %4542 = vmatpush3.bf16.msra.mxu1 %v4878_v57  ;;  %4456 = vmatprep.mubr.msk.f32.mxu1 %vm4795_vm4, %v4794_v60 }
 0x759   :  { %4454 = vmatprep.subr.mxu1 %v4794_v60 }
 0x75c   :  { %4455 = vmatpush3.msk.msra.mxu1 %vm91_vm0, %v4884_v59 }
 0x75d   :  { %4546 = vmatprep.subr.bf16.mxu1 %v4793_v58 }
 0x82a   :  { %v707_v50 = vpop.f32.mrb[4].mxu1 }
 0x82b   :  { %v711_v51 = vadd.f32 %v707_v50, %v384_v49  ;;  %v4440_v52 = vpop.f32.mrb[5].mxu1 }
 0x82d   :  { %4647 = vtanh.f32 %v711_v51  ;;  %v4202_v54 = vmul.f32 -1.442695, %v711_v51 }
 0x82f   :  { %4649 = vpow2.f32 %v4202_v54 }
 0x837   :  { %v4648_v53 = vpop.eup %4647 }
 0x838   :  { %721 = vrot.lane.b32.xlu0 %v4648_v53, %s4796_s0 }
 0x839   :  { %v4650_v55 = vpop.eup %4649 }
 0x83a   :  { %v715_v56 = vadd.f32 1.0, %v4650_v55 }
 0x83c   :  { %4651 = vrcp.f32 %v715_v56 }
 0x846   :  { %v4652_v61 = vpop.eup %4651 }
 0x847   :  { %v719_v0 = vmul.f32 %v4652_v61, %v619_v42 }
 0x8aa   :  { %v722_v62 = vpop.permute.xlu0 %721 }
 0x8ab   :  { %v724_v63 = vmul.f32 %v4652_v61, %v722_v62 }
 0x8ad   :  { %726 = vrot.lane.b32.xlu1 %v724_v63, %s4797_s14 }
 0x91f   :  { %v727_v1 = vpop.permute.xlu1 %726 }
 0x920   :  { %v729_v2 = vadd.f32 %v727_v1, %v719_v0 }
 0x922   :  { %4653 = vtanh.f32 %v729_v2 }
 0x92c   :  { %v4654_v3 = vpop.eup %4653 }
 0x92d   :  { %732 = vrot.lane.b32.xlu0 %v4654_v3, %s4797_s14  ;;  %v1300_v3 = vld [vmem:[#allocation2 + $0x2] sm:$0x3] }
 0x99f   :  { %v733_v4 = vpop.permute.xlu0 %732 }
 0x9a0   :  { %v735_v5 = vmul.f32 %v4652_v61, %v733_v4 }
 0x9a2   :  { %v743_v6 = vrot.slane %v735_v5, %v4840_v8 }
 0x9a4   :  { %744 = vrot.lane.b32.xlu1 %v743_v6, %s4798_s15  ;;  %v1299_v6 = vld [vmem:[#allocation2] sm:$0x3] }
 0xa16   :  { %v745_v7 = vpop.permute.xlu1 %744 }
 0xa17   :  { %748 = vst.msk [vmem:[#allocation2 + $0x4] sm:$0x3] %vm527_vm5, %v745_v7  ;;  %4448 = vmatmul.mubr.msk.f32.vlgmr.msra.gmra.mrb[6].mxu0 %vm86_vm1, %v745_v7  ;;  %v1323_v7 = vcombine.low %v1299_v6, %v1300_v3 }
 0xa18   :  { %4545 = vmatpush3.bf16.msra.mxu0 %v4878_v57  ;;  %4465 = vmatprep.mubr.msk.f32.mxu0 %vm4795_vm4, %v4794_v60 }
 0xa19   :  { %4463 = vmatprep.subr.mxu0 %v4794_v60 }
 0xa1c   :  { %4464 = vmatpush3.msk.msra.mxu0 %vm91_vm0, %v4884_v59 }
 0xa1d   :  { %4549 = vmatprep.subr.bf16.mxu0 %v4793_v58 }
 0xa1e   :  { %v1301_v4 = vld [vmem:[#allocation2 + $0x4] sm:$0x3] }
 0xaea   :  { %v817_v11 = vpop.f32.mrb[6].mxu0 }
 0xaeb   :  { %v821_v12 = vadd.f32 %v817_v11, %v386_v10  ;;  %v4449_v13 = vpop.f32.mrb[7].mxu0  ;;  %v1331_v11 = vrot.slane %v1323_v7, %v4840_v8 }
 0xaed   :  { %4655 = vtanh.f32 %v821_v12  ;;  %v4205_v15 = vmul.f32 -1.442695, %v821_v12 }
 0xaef   :  { %4657 = vpow2.f32 %v4205_v15 }
 0xaf7   :  { %v4656_v14 = vpop.eup %4655 }
 0xaf8   :  { %831 = vrot.lane.b32.xlu0 %v4656_v14, %s4796_s0  ;;  %v387_v14 = vcombine.high %v4910_v9, %v4910_v9 }
 0xaf9   :  { %v4658_v16 = vpop.eup %4657 }
 0xafa   :  { %v825_v17 = vadd.f32 1.0, %v4658_v16  ;;  %v401_v15 = vrot.slane %v387_v14, %v4840_v8 }
 0xafc   :  { %4659 = vrcp.f32 %v825_v17 }
 0xb06   :  { %v4660_v18 = vpop.eup %4659 }
 0xb07   :  { %v829_v21 = vmul.f32 %v4660_v18, %v729_v2 }
 0xb6a   :  { %v832_v19 = vpop.permute.xlu0 %831 }
 0xb6b   :  { %v834_v20 = vmul.f32 %v4660_v18, %v832_v19 }
 0xb6d   :  { %836 = vrot.lane.b32.xlu1 %v834_v20, %s4797_s14 }
 0xbdf   :  { %v837_v58 = vpop.permute.xlu1 %836 }
 0xbe0   :  { %v839_v22 = vadd.f32 %v837_v58, %v829_v21 }
 0xbe2   :  { %4661 = vtanh.f32 %v839_v22 }
 0xbec   :  { %v4662_v23 = vpop.eup %4661 }
 0xbed   :  { %842 = vrot.lane.b32.xlu0 %v4662_v23, %s4797_s14 }
 0xc5f   :  { %v843_v24 = vpop.permute.xlu0 %842 }
 0xc60   :  { %v845_v25 = vmul.f32 %v4660_v18, %v843_v24 }
 0xc62   :  { %v853_v26 = vrot.slane %v845_v25, %v4840_v8 }
 0xc64   :  { %854 = vrot.lane.b32.xlu1 %v853_v26, %s4798_s15 }
 0xcd6   :  { %v855_v27 = vpop.permute.xlu1 %854 }
 0xcd7   :  { %858 = vst.msk [vmem:[#allocation2 + $0x6] sm:$0x3] %vm527_vm5, %v855_v27  ;;  %4457 = vmatmul.mubr.msk.f32.vlgmr.msra.gmra.mrb[6].mxu1 %vm86_vm1, %v855_v27 }
 0xcd8   :  { %4548 = vmatpush3.bf16.msra.mxu1 %v4878_v57  ;;  %4474 = vmatprep.mubr.msk.f32.mxu1 %vm4795_vm4, %v4794_v60 }
 0xcd9   :  { %4472 = vmatprep.subr.mxu1 %v4794_v60 }
 0xcdc   :  { %4473 = vmatpush3.msk.msra.mxu1 %vm91_vm0, %v4884_v59 }
 0xcde   :  { %v1302_v2 = vld [vmem:[#allocation2 + $0x6] sm:$0x3] }
 0xcdf   :  { %v1324_v5 = vcombine.low %v1301_v4, %v1302_v2  ;;  %v4218_v2 = vld [vmem:[#allocation3 + $0xd0] ss:$0 sm:$0xff] }
 0xce1   :  { %v1338_v10 = vrot.slane %v1324_v5, %v4840_v8 }
 0xce3   :  { %v1339_v13 = vcombine.low %v1331_v11, %v1338_v10 }
 0xdaa   :  { %v927_v29 = vpop.f32.mrb[6].mxu1 }
 0xdab   :  { %v931_v30 = vadd.f32 %v927_v29, %v394_v28  ;;  %v4458_v31 = vpop.f32.mrb[7].mxu1 }
 0xdad   :  { %4663 = vtanh.f32 %v931_v30  ;;  %v4208_v33 = vmul.f32 -1.442695, %v931_v30 }
 0xdaf   :  { %4665 = vpow2.f32 %v4208_v33 }
 0xdb7   :  { %v4664_v32 = vpop.eup %4663 }
 0xdb8   :  { %941 = vrot.lane.b32.xlu0 %v4664_v32, %s4796_s0  ;;  %v403_v32 = vcombine.high %v401_v15, %v401_v15 }
 0xdb9   :  { %v4666_v34 = vpop.eup %4665 }
 0xdba   :  { %v935_v35 = vadd.f32 1.0, %v4666_v34 }
 0xdbc   :  { %4667 = vrcp.f32 %v935_v35 }
 0xdc6   :  { %v4668_v36 = vpop.eup %4667 }
 0xdc7   :  { %v939_v39 = vmul.f32 %v4668_v36, %v839_v22 }
 0xe2a   :  { %v942_v37 = vpop.permute.xlu0 %941 }
 0xe2b   :  { %v944_v38 = vmul.f32 %v4668_v36, %v942_v37 }
 0xe2d   :  { %946 = vrot.lane.b32.xlu1 %v944_v38, %s4797_s14 }
 0xe9f   :  { %v947_v40 = vpop.permute.xlu1 %946 }
 0xea0   :  { %v949_v41 = vadd.f32 %v947_v40, %v939_v39 }
 0xea2   :  { %4669 = vtanh.f32 %v949_v41 }
 0xeac   :  { %v4670_v42 = vpop.eup %4669 }
 0xead   :  { %952 = vrot.lane.b32.xlu0 %v4670_v42, %s4797_s14 }
 0xf1f   :  { %v953_v43 = vpop.permute.xlu0 %952 }
 0xf20   :  { %v955_v44 = vmul.f32 %v4668_v36, %v953_v43 }
 0xf22   :  { %v963_v45 = vrot.slane %v955_v44, %v4840_v8 }
 0xf24   :  { %964 = vrot.lane.b32.xlu1 %v963_v45, %s4798_s15 }
 0xf96   :  { %v965_v46 = vpop.permute.xlu1 %964 }
 0xf97   :  { %968 = vst.msk [vmem:[#allocation2 + $0x8] sm:$0x3] %vm527_vm5, %v965_v46  ;;  %4466 = vmatmul.mubr.msk.f32.vlgmr.msra.gmra.mrb[8].mxu0 %vm86_vm1, %v965_v46 }
 0xf98   :  { %4551 = vmatpush3.bf16.msra.mxu0 %v4878_v57  ;;  %4483 = vmatprep.mubr.msk.f32.mxu0 %vm4795_vm4, %v4794_v60 }
 0xf99   :  { %4481 = vmatprep.subr.mxu0 %v4794_v60 }
 0xf9c   :  { %4482 = vmatpush3.msk.msra.mxu0 %vm91_vm0, %v4884_v59 }
0x106a   :  { %v1037_v48 = vpop.f32.mrb[8].mxu0 }
0x106b   :  { %v1041_v49 = vadd.f32 %v1037_v48, %v402_v47  ;;  %v4467_v50 = vpop.f32.mrb[9].mxu0  ;;  %v1307_v47 = vld [vmem:[#allocation3 + $0xb8] sm:$0xff]  ;;  %v1308_v48 = vld [vmem:[#allocation3 + $0xc0] sm:$0xff] }
0x106c   :  { %v1309_v50 = vld [vmem:[#allocation3 + $0xc8] sm:$0xf] }
0x106d   :  { %4671 = vtanh.f32 %v1041_v49  ;;  %v4211_v52 = vmul.f32 -1.442695, %v1041_v49  ;;  %v4552_v49 = vpack.c.bf16 %v1308_v48, %v1307_v47 }
0x106f   :  { %4673 = vpow2.f32 %v4211_v52  ;;  %4553 = vmatprep.subr.bf16.mxu1 %v4552_v49 }
0x1077   :  { %v4672_v51 = vpop.eup %4671 }
0x1078   :  { %1051 = vrot.lane.b32.xlu0 %v4672_v51, %s4796_s0 }
0x1079   :  { %v4674_v53 = vpop.eup %4673 }
0x107a   :  { %v1045_v57 = vadd.f32 1.0, %v4674_v53 }
0x107c   :  { %4675 = vrcp.f32 %v1045_v57 }
0x1086   :  { %v4676_v54 = vpop.eup %4675 }
0x1087   :  { %v1049_v60 = vmul.f32 %v4676_v54, %v949_v41 }
0x10ea   :  { %v1052_v55 = vpop.permute.xlu0 %1051 }
0x10eb   :  { %v1054_v56 = vmul.f32 %v4676_v54, %v1052_v55  ;;  %v1303_v55 = vld [vmem:[#allocation2 + $0x8] sm:$0x3] }
0x10ed   :  { %1056 = vrot.lane.b32.xlu1 %v1054_v56, %s4797_s14 }
0x115f   :  { %v1057_v59 = vpop.permute.xlu1 %1056 }
0x1160   :  { %v1059_v61 = vadd.f32 %v1057_v59, %v1049_v60 }
0x1162   :  { %4677 = vtanh.f32 %v1059_v61 }
0x116c   :  { %v4678_v62 = vpop.eup %4677 }
0x116d   :  { %1062 = vrot.lane.b32.xlu0 %v4678_v62, %s4797_s14 }
0x11df   :  { %v1063_v63 = vpop.permute.xlu0 %1062 }
0x11e0   :  { %v1065_v0 = vmul.f32 %v4676_v54, %v1063_v63 }
0x11e2   :  { %v1073_v1 = vrot.slane %v1065_v0, %v4840_v8 }
0x11e4   :  { %1074 = vrot.lane.b32.xlu1 %v1073_v1, %s4798_s15  ;;  %v1490_v1 = vld [vmem:[#allocation3 + $0xd8] sm:$0xff] }
0x11e5   :  { %4495 = vmatprep.subr.mxu0 %v1490_v1 }
0x1256   :  { %v1075_v12 = vpop.permute.xlu1 %1074 }
0x1257   :  { %1078 = vst.msk [vmem:[#allocation2 + $0xa] sm:$0x3] %vm527_vm5, %v1075_v12  ;;  %4475 = vmatmul.mubr.msk.f32.vlgmr.msra.gmra.mrb[8].mxu1 %vm86_vm1, %v1075_v12 }
0x1258   :  { %4492 = vmatprep.mubr.msk.f32.mxu1 %vm86_vm1, %v1339_v13  ;;  %4555 = vmatpush3.bf16.msra.mxu1 %v4552_v49 }
0x1259   :  { %4490 = vmatprep.subr.msk.mxu1 %vm91_vm0, %v1309_v50 }
0x125c   :  { %4491 = vmatpush3.msk.msra.mxu1 %vm91_vm0, %v1309_v50 }
0x125e   :  { %v1304_v54 = vld [vmem:[#allocation2 + $0xa] sm:$0x3] }
0x125f   :  { %v1340_v56 = vcombine.low %v1303_v55, %v1304_v54 }
0x1261   :  { %v1348_v62 = vrot.slane %v1340_v56, %v4840_v8 }
0x132a   :  { %v1147_v16 = vpop.f32.mrb[8].mxu1 }
0x132b   :  { %v1151_v17 = vadd.f32 %v1147_v16, %v401_v15  ;;  %v4476_v18 = vpop.f32.mrb[9].mxu1 }
0x132d   :  { %4679 = vtanh.f32 %v1151_v17  ;;  %v4214_v20 = vmul.f32 -1.442695, %v1151_v17 }
0x132f   :  { %4681 = vpow2.f32 %v4214_v20 }
0x1337   :  { %v4680_v19 = vpop.eup %4679 }
0x1338   :  { %1161 = vrot.lane.b32.xlu0 %v4680_v19, %s4796_s0 }
0x1339   :  { %v4682_v21 = vpop.eup %4681 }
0x133a   :  { %v1155_v58 = vadd.f32 1.0, %v4682_v21 }
0x133c   :  { %4683 = vrcp.f32 %v1155_v58 }
0x1346   :  { %v4684_v22 = vpop.eup %4683 }
0x1347   :  { %v1159_v9 = vmul.f32 %v4684_v22, %v1059_v61 }
0x13aa   :  { %v1162_v23 = vpop.permute.xlu0 %1161 }
0x13ab   :  { %v1164_v24 = vmul.f32 %v4684_v22, %v1162_v23 }
0x13ad   :  { %1166 = vrot.lane.b32.xlu1 %v1164_v24, %s4797_s14 }
0x141f   :  { %v1167_v25 = vpop.permute.xlu1 %1166 }
0x1420   :  { %v1169_v26 = vadd.f32 %v1167_v25, %v1159_v9 }
0x1422   :  { %4685 = vtanh.f32 %v1169_v26 }
0x142c   :  { %v4686_v27 = vpop.eup %4685 }
0x142d   :  { %1172 = vrot.lane.b32.xlu0 %v4686_v27, %s4797_s14 }
0x149f   :  { %v1173_v28 = vpop.permute.xlu0 %1172 }
0x14a0   :  { %v1175_v29 = vmul.f32 %v4684_v22, %v1173_v28 }
0x14a2   :  { %v1183_v30 = vrot.slane %v1175_v29, %v4840_v8 }
0x14a4   :  { %1184 = vrot.lane.b32.xlu1 %v1183_v30, %s4798_s15 }
0x1516   :  { %v1185_v31 = vpop.permute.xlu1 %1184 }
0x1517   :  { %1188 = vst.msk [vmem:[#allocation2 + $0xc] sm:$0x3] %vm527_vm5, %v1185_v31  ;;  %4484 = vmatmul.mubr.msk.f32.vlgmr.msra.gmra.mrb[10].mxu0 %vm86_vm1, %v1185_v31 }
0x1518   :  { %4496 = vmatpush3.msra.mxu0 %v1490_v1 }
0x151e   :  { %v1305_v60 = vld [vmem:[#allocation2 + $0xc] sm:$0x3] }
0x15ea   :  { %v1257_v33 = vpop.f32.mrb[10].mxu0 }
0x15eb   :  { %v1261_v34 = vadd.f32 %v1257_v33, %v403_v32  ;;  %v4485_v35 = vpop.f32.mrb[11].mxu0 }
0x15ed   :  { %4687 = vtanh.f32 %v1261_v34  ;;  %v4217_v37 = vmul.f32 -1.442695, %v1261_v34 }
0x15ef   :  { %4689 = vpow2.f32 %v4217_v37 }
0x15f7   :  { %v4688_v36 = vpop.eup %4687 }
0x15f8   :  { %1271 = vrot.lane.b32.xlu0 %v4688_v36, %s4796_s0 }
0x15f9   :  { %v4690_v38 = vpop.eup %4689 }
0x15fa   :  { %v1265_v39 = vadd.f32 1.0, %v4690_v38 }
0x15fc   :  { %4691 = vrcp.f32 %v1265_v39 }
0x1606   :  { %v4692_v40 = vpop.eup %4691 }
0x1607   :  { %v1269_v43 = vmul.f32 %v4692_v40, %v1169_v26 }
0x166a   :  { %v1272_v41 = vpop.permute.xlu0 %1271 }
0x166b   :  { %v1274_v42 = vmul.f32 %v4692_v40, %v1272_v41 }
0x166d   :  { %1276 = vrot.lane.b32.xlu1 %v1274_v42, %s4797_s14 }
0x16df   :  { %v1277_v44 = vpop.permute.xlu1 %1276 }
0x16e0   :  { %v1279_v45 = vadd.f32 %v1277_v44, %v1269_v43 }
0x16e2   :  { %4693 = vtanh.f32 %v1279_v45 }
0x16ec   :  { %v4694_v46 = vpop.eup %4693 }
0x16ed   :  { %1282 = vrot.lane.b32.xlu0 %v4694_v46, %s4797_s14 }
0x175f   :  { %v1283_v51 = vpop.permute.xlu0 %1282 }
0x1760   :  { %v1285_v52 = vmul.f32 %v4692_v40, %v1283_v51 }
0x1762   :  { %v1293_v53 = vrot.slane %v1285_v52, %v4840_v8 }
0x1764   :  { %1294 = vrot.lane.b32.xlu1 %v1293_v53, %s4798_s15 }
0x17d6   :  { %v1295_v57 = vpop.permute.xlu1 %1294 }
0x17d7   :  { %1298 = vst.msk [vmem:[#allocation2 + $0xe] sm:$0x3] %vm527_vm5, %v1295_v57 }
0x17de   :  { %v1306_v59 = vld [vmem:[#allocation2 + $0xe] sm:$0x3] }
0x17df   :  { %v1341_v61 = vcombine.low %v1305_v60, %v1306_v59 }
0x17e1   :  { %v1355_v63 = vrot.slane %v1341_v61, %v4840_v8 }
0x17e3   :  { %v1356_v0 = vcombine.low %v1348_v62, %v1355_v63 }
0x17e5   :  { %4493 = vmatmul.mubr.msk.f32.vlgmr.msra.gmra.mrb[10].mxu1 %vm86_vm1, %v1356_v0 }
0x18b8   :  { %v4494_v3 = vpop.f32.mrb[10].mxu1 }
0x18b9   :  { %v1436_v4 = vadd.f32 %v4494_v3, %v4218_v2  ;;  %v1430_v5 = vpop.f32.mrb[11].mxu1 }
0x18ba   :  { %v1431_v6 = vadd.f32 %v4218_v2, %v1430_v5  ;;  %v6822_v5 = vmov 683565275  }
0x18bb   :  { %v1458_v7 = vcombine.high %v1436_v4, %v1436_v4  ;;  %v1465_v10 = vrot.slane %v1436_v4, %v4840_v8 }
0x18bc   :  { %v1441_v11 = vcombine.high %v1431_v6, %v1431_v6  ;;  %v1448_v12 = vrot.slane %v1431_v6, %v4840_v8 }
0x18bd   :  { %v1472_v13 = vrot.slane %v1458_v7, %v4840_v8  ;;  %v1473_v14 = vcombine.high %v1465_v10, %v1465_v10 }
0x18be   :  { %v1455_v15 = vrot.slane %v1441_v11, %v4840_v8  ;;  %v1456_v16 = vcombine.high %v1448_v12, %v1448_v12 }
0x18bf   :  { %v1474_v17 = vcombine.high %v1472_v13, %v1472_v13  ;;  %v1487_v18 = vsub.f32 %v1473_v14, %v1465_v10  ;;  %v1488_v19 = vsub.f32 %v1472_v13, %v1473_v14  ;;  %v6811_v14 = vmov 2102212464  }
0x18c0   :  { %v1457_v20 = vcombine.high %v1455_v15, %v1455_v15  ;;  %v1483_v21 = vsub.f32 %v1456_v16, %v1448_v12  ;;  %v1484_v58 = vsub.f32 %v1455_v15, %v1456_v16  ;;  %v6817_v12 = vmov 2131351028  }
0x18c1   :  { %v1489_v22 = vsub.f32 %v1474_v17, %v1472_v13  ;;  %v1515_v23 = vcombine.low %v1487_v18, %v1488_v19  ;;  %v6813_v16 = vmov 920167782  }
0x18c2   :  { %v1485_v24 = vsub.f32 %v1457_v20, %v1455_v15  ;;  %v1486_v9 = vsub.f32 %v1465_v10, %v1457_v20  ;;  %v1498_v25 = vcombine.low %v1483_v21, %v1484_v58  ;;  %v6819_v10 = vmov 2475754826  }
0x18c3   :  { %v1522_v27 = vrot.slane %v1515_v23, %v4840_v8  ;;  %v1529_v28 = vrot.slane %v1489_v22, %v4840_v8  ;;  %v6815_v22 = vmov 1326507024  }
0x18c4   :  { %v1499_v26 = vcombine.low %v1485_v24, %v1486_v9  ;;  %v1506_v29 = vrot.slane %v1498_v25, %v4840_v8 }
0x18c5   :  { %v1530_v32 = vcombine.low %v1522_v27, %v1529_v28 }
0x18c6   :  { %v1513_v30 = vrot.slane %v1499_v26, %v4840_v8 }
0x18c8   :  { %v1514_v31 = vcombine.low %v1506_v29, %v1513_v30 }
0x18ca   :  { %4497 = vmatprep.mubr.msk.f32.mxu0 %vm1531_vm6, %v1514_v31 }
0x18cb   :  { %4498 = vmatmul.mubr.msk.f32.vlgmr.msra.gmra.mrb[12].mxu0 %vm1531_vm6, %v1530_v32 }
0x199e   :  { %v4499_v33 = vpop.f32.mrb[12].mxu0 }
0x199f   :  { %v5029_v34 = vrot.slane %v4499_v33, %v4840_v8  ;;  %v1602_v35 = vpop.f32.mrb[13].mxu0  ;;  %v1630_v52 = vcombine.high %v4499_v33, %v4499_v33 }
0x19a0   :  { %v5032_v36 = vrot.slane %v1602_v35, %v4840_v8  ;;  %v1613_v44 = vcombine.high %v1602_v35, %v1602_v35 }
0x19a1   :  { %3972 = vrot.lane.b32.xlu1 %v5029_v34, %s4799_s16  ;;  %3944 = vrot.lane.b32.xlu0 %v5029_v34, %s4800_s17  ;;  %v5039_v37 = vand.u32 2147483647, %v5029_v34  ;;  %v2068_v40 = vand.u32 2139095040, %v5029_v34  ;;  %v5048_v41 = vmul.f32 0.5, %v5029_v34  ;;  %v5069_v62 = vrot.slane %v1630_v52, %v4840_v8 }
0x19a2   :  { %v1656_v38 = vand.u32 2139095040, %v5032_v36  ;;  %v5044_v39 = vcombine.high %v5032_v36, %v5032_v36  ;;  %v5060_v57 = vrot.slane %v1613_v44, %v4840_v8  ;;  %v5081_v2 = vcombine.high %v5029_v34, %v5029_v34 }
0x19a3   :  { %v2069_v43 = vshrl.u32 %v2068_v40, 23  ;;  %v2072_v45 = vand.u32 8388607, %v5039_v37  ;;  %v3525_v46 = vand.u32 2147483647, %v5048_v41  ;;  %v3528_v47 = vand.u32 2139095040, %v5048_v41 }
0x19a4   :  { %v1657_v42 = vshrl.u32 %v1656_v38, 23  ;;  %6853 = vst [vmem:[#allocation7_spill] sm:$0xff] %v5069_v62  ;;  %v5077_v1 = vcombine.high %v5060_v57, %v5060_v57 }
0x19a5   :  { %3936 = vrot.lane.b32.xlu0 %v5032_v36, %s4800_s17  ;;  %3938 = vrot.lane.b32.xlu1 %v5044_v39, %s4800_s17  ;;  %v4240_v49 = vadd.s32 4294967169, %v2069_v43  ;;  %v3529_v50 = vshrl.u32 %v3528_v47, 23  ;;  %v3532_v51 = vand.u32 8388607, %v3525_v46  ;;  %v2073_v55 = vor.u32 8388608, %v2072_v45 }
0x19a6   :  { %v4224_v48 = vadd.s32 4294967169, %v1657_v42 }
0x19a7   :  { %v2075_v53 = vadd.s32 1, %v4240_v49  ;;  %v4296_v56 = vadd.s32 4294967169, %v3529_v50  ;;  %v3533_v60 = vor.u32 8388608, %v3532_v51  ;;  %v5083_v3 = vshll.u32 %v2073_v55, 8 }
0x19a8   :  { %v5062_v54 = vadd.s32 1, %v4224_v48 }
0x19a9   :  { %3964 = vrot.lane.b32.xlu0 %v5032_v36, %s4799_s16  ;;  %3966 = vrot.lane.b32.xlu1 %v5044_v39, %s4799_s16  ;;  %vm2076_vm7 = vcmp.gt.s32.totalorder %v2075_v53, 0  ;;  %v3535_v61 = vadd.s32 1, %v4296_v56  ;;  %v5087_v7 = vshll.u32 %v3533_v60, 8 }
0x19aa   :  { %v2077_v59 = vsel %vm2076_vm7, %v2075_v53, 0  ;;  %vm1664_vm8 = vcmp.gt.s32.totalorder %v5062_v54, 0 }
0x19ab   :  { %v2078_v63 = vshrl.u32 %v2077_v59, 5  ;;  %v2079_v0 = vand.u32 31, %v2077_v59  ;;  %vm3536_vm9 = vcmp.gt.s32.totalorder %v3535_v61, 0  ;;  %v5117_v45 = vsel %vm1664_vm8, %v5062_v54, 0 }
0x19ac   :  { %v3537_v26 = vsel %vm3536_vm9, %v3535_v61, 0 }
0x19ad   :  { %3968 = vrot.lane.b32.xlu1 %v5060_v57, %s4799_s16  ;;  %3940 = vrot.lane.b32.xlu0 %v5060_v57, %s4800_s17  ;;  %v2080_v4 = vsub.s32 32, %v2079_v0  ;;  %v2082_v6 = vshll.u32 %v6822_v5, %v2079_v0  ;;  %v2085_v11 = vshll.u32 %v6819_v10, %v2079_v0  ;;  %v2088_v13 = vshll.u32 %v6817_v12, %v2079_v0 }
0x19ae   :  { %v2091_v15 = vshll.u32 %v6811_v14, %v2079_v0  ;;  %v2094_v17 = vshll.u32 %v6813_v16, %v2079_v0  ;;  %vm2097_vm10 = vcmp.lt.s32.totalorder %v2078_v63, 1  ;;  %vm2099_vm11 = vcmp.lt.s32.totalorder %v2078_v63, 3 }
0x19af   :  { %v2083_v18 = vshrl.u32 %v6819_v10, %v2080_v4  ;;  %v2086_v19 = vshrl.u32 %v6817_v12, %v2080_v4  ;;  %v2089_v20 = vshrl.u32 %v6811_v14, %v2080_v4  ;;  %v2081_v21 = vshrl.u32 %v6822_v5, %v2080_v4 }
0x19b0   :  { %v2092_v58 = vshrl.u32 %v6813_v16, %v2080_v4  ;;  %v2095_v23 = vshrl.u32 %v6815_v22, %v2080_v4  ;;  %vm2100_vm12 = vcmp.lt.s32.totalorder %v2078_v63, 4  ;;  %v3539_v29 = vand.u32 31, %v3537_v26 }
0x19b1   :  { %3970 = vrot.lane.b32.xlu1 %v5077_v1, %s4799_s16  ;;  %3942 = vrot.lane.b32.xlu0 %v5077_v1, %s4800_s17  ;;  %v2084_v24 = vor.u32 %v2083_v18, %v2082_v6  ;;  %v2087_v9 = vor.u32 %v2086_v19, %v2085_v11  ;;  %v2090_v25 = vor.u32 %v2089_v20, %v2088_v13  ;;  %vm2098_vm13 = vcmp.lt.s32.totalorder %v2078_v63, 2 }
0x19b2   :  { %v2093_v27 = vor.u32 %v2092_v58, %v2091_v15  ;;  %v2096_v28 = vor.u32 %v2095_v23, %v2094_v17  ;;  %v3540_v42 = vsub.s32 32, %v3539_v29  ;;  %v3542_v50 = vshll.u32 %v6822_v5, %v3539_v29 }
0x19b3   :  { %v2101_v30 = vsel %vm2097_vm10, %v2081_v21, %v2084_v24  ;;  %v2102_v31 = vsel %vm2100_vm12, %v2090_v25, 2102212464  ;;  %v2105_v32 = vsel %vm2097_vm10, %v2084_v24, %v2087_v9  ;;  %v2109_v33 = vsel %vm2097_vm10, %v2087_v9, %v2090_v25 }
0x19b4   :  { %v2103_v35 = vsel %vm2099_vm11, %v2087_v9, %v2102_v31  ;;  %v2106_v38 = vsel %vm2100_vm12, %v2093_v27, 920167782  ;;  %v2110_v40 = vsel %vm2100_vm12, %v2096_v28, 1326507024  ;;  %v3538_v54 = vshrl.u32 %v3537_v26, 5 }
0x19b5   :  { %3974 = vrot.lane.b32.xlu1 %v5081_v2, %s4799_s16  ;;  %3946 = vrot.lane.b32.xlu0 %v5081_v2, %s4800_s17  ;;  %v2107_v43 = vsel %vm2099_vm11, %v2090_v25, %v2106_v38  ;;  %v2111_v44 = vsel %vm2099_vm11, %v2093_v27, %v2110_v40  ;;  %v2104_v47 = vsel %vm2098_vm13, %v2101_v30, %v2103_v35  ;;  %vm2067_vm12 = vcmp.lt.s32.totalorder %v5029_v34, 0 }
0x19b6   :  { %v2108_v48 = vsel %vm2098_vm13, %v2105_v32, %v2107_v43  ;;  %v2112_v49 = vsel %vm2098_vm13, %v2109_v33, %v2111_v44  ;;  %v3543_v56 = vshrl.u32 %v6819_v10, %v3540_v42  ;;  %v3545_v60 = vshll.u32 %v6819_v10, %v3539_v29 }
0x19b7   :  { %v5121_v51 = vmul.u32.u64.low %v5083_v3, %v2112_v49  ;;  %v5122_v52 = vmul.u32.u64.high %v5083_v3, %v2112_v49, %v5121_v51  ;;  %v5125_v53 = vmul.u32.u64.low %v5083_v3, %v2108_v48  ;;  %v5126_v55 = vmul.u32.u64.high %v5083_v3, %v2108_v48, %v5125_v53 }
0x19b8   :  { %v3546_v59 = vshrl.u32 %v6817_v12, %v3540_v42  ;;  %v3548_v61 = vshll.u32 %v6817_v12, %v3539_v29  ;;  %v3549_v63 = vshrl.u32 %v6811_v14, %v3540_v42  ;;  %v3551_v0 = vshll.u32 %v6811_v14, %v3539_v29 }
0x19b9   :  { %3976 = vrot.lane.b32.xlu1 %v5069_v62, %s4799_s16  ;;  %3948 = vrot.lane.b32.xlu0 %v5069_v62, %s4800_s17  ;;  %v3552_v4 = vshrl.u32 %v6813_v16, %v3540_v42  ;;  %v3544_v6 = vor.u32 %v3543_v56, %v3542_v50  ;;  %v3554_v13 = vshll.u32 %v6813_v16, %v3539_v29  ;;  %v2123_v18 = vadd.s32 1, %v5126_v55 }
0x19ba   :  { %v3547_v11 = vor.u32 %v3546_v59, %v3545_v60  ;;  %v3555_v15 = vshrl.u32 %v6815_v22, %v3540_v42  ;;  %v2120_v17 = vmul.u32 %v5083_v3, %v2104_v47  ;;  %vm2122_vm14 = vc.u32 %v5122_v52, %v5125_v53 }
0x19bb   :  { %v3550_v19 = vor.u32 %v3549_v63, %v3548_v61  ;;  %v3541_v20 = vshrl.u32 %v6822_v5, %v3540_v42  ;;  %v3553_v21 = vor.u32 %v3552_v4, %v3551_v0  ;;  %vm3557_vm15 = vcmp.lt.s32.totalorder %v3538_v54, 1 }
0x19bc   :  { %v3556_v58 = vor.u32 %v3555_v15, %v3554_v13  ;;  %v2124_v23 = vsel %vm2122_vm14, %v2123_v18, %v5126_v55  ;;  %vm3559_vm0 = vcmp.lt.s32.totalorder %v3538_v54, 3  ;;  %vm3560_vm1 = vcmp.lt.s32.totalorder %v3538_v54, 4 }
0x19bd   :  { %v3565_v24 = vsel %vm3557_vm15, %v3544_v6, %v3547_v11  ;;  %v2125_v9 = vadd.s32 %v2124_v23, %v2120_v17  ;;  %v3562_v25 = vsel %vm3560_vm1, %v3550_v19, 2102212464  ;;  %v3566_v26 = vsel %vm3560_vm1, %v3553_v21, 920167782 }
0x19be   :  { %v3569_v3 = vsel %vm3557_vm15, %v3547_v11, %v3550_v19  ;;  %vm3558_vm2 = vcmp.lt.s32.totalorder %v3538_v54, 2  ;;  %v3561_v27 = vsel %vm3557_vm15, %v3541_v20, %v3544_v6  ;;  %v3567_v28 = vsel %vm3559_vm0, %v3550_v19, %v3566_v26 }
0x19bf   :  { %v3570_v29 = vsel %vm3560_vm1, %v3556_v58, 1326507024  ;;  %v2126_v30 = vadd.s32 536870912, %v2125_v9  ;;  %v3563_v31 = vsel %vm3559_vm0, %v3547_v11, %v3562_v25  ;;  %v3568_v32 = vsel %vm3558_vm2, %v3565_v24, %v3567_v28 }
0x19c0   :  { %v3571_v33 = vsel %vm3559_vm0, %v3553_v21, %v3570_v29  ;;  %v5149_v38 = vmul.u32.u64.low %v5087_v7, %v3568_v32  ;;  %v5150_v40 = vmul.u32.u64.high %v5087_v7, %v3568_v32, %v5149_v38  ;;  %v3564_v47 = vsel %vm3558_vm2, %v3561_v27, %v3563_v31 }
0x19c1   :  { %v3572_v35 = vsel %vm3558_vm2, %v3569_v3, %v3571_v33  ;;  %v5153_v42 = vshrl.u32 %v2126_v30, 30  ;;  %v1667_v48 = vand.u32 31, %v5117_v45  ;;  %v3580_v55 = vmul.u32 %v5087_v7, %v3564_v47 }
0x19c2   :  { %v5156_v43 = vmul.u32.u64.low %v5087_v7, %v3572_v35  ;;  %v5157_v44 = vmul.u32.u64.high %v5087_v7, %v3572_v35, %v5156_v43  ;;  %v3583_v50 = vadd.s32 1, %v5150_v40  ;;  %v5169_v56 = vand.u32 2147483647, %v5032_v36 }
0x19c3   :  { %v2128_v49 = vshll.u32 %v5153_v42, 30  ;;  %v1668_v60 = vsub.s32 32, %v1667_v48  ;;  %v1666_v18 = vshrl.u32 %v5117_v45, 5  ;;  %v1670_v19 = vshll.u32 %v6822_v5, %v1667_v48 }
0x19c4   :  { %vm3582_vm3 = vc.u32 %v5157_v44, %v5149_v38  ;;  %v1660_v4 = vand.u32 8388607, %v5169_v56  ;;  %v1679_v20 = vshll.u32 %v6811_v14, %v1667_v48  ;;  %v1673_v58 = vshll.u32 %v6819_v10, %v1667_v48 }
0x19c5   :  { %v5162_v51 = vsub.s32 %v2125_v9, %v2128_v49  ;;  %v3584_v54 = vsel %vm3582_vm3, %v3583_v50, %v5150_v40  ;;  %v1671_v6 = vshrl.u32 %v6819_v10, %v1668_v60  ;;  %v1674_v11 = vshrl.u32 %v6817_v12, %v1668_v60 }
0x19c6   :  { %v3585_v61 = vadd.s32 %v3584_v54, %v3580_v55  ;;  %v1677_v13 = vshrl.u32 %v6811_v14, %v1668_v60  ;;  %v1680_v15 = vshrl.u32 %v6813_v16, %v1668_v60  ;;  %v1676_v23 = vshll.u32 %v6817_v12, %v1667_v48 }
0x19c7   :  { %v2131_v59 = vsub.s32 0, %v5162_v51  ;;  %v1683_v24 = vshrl.u32 %v6815_v22, %v1668_v60  ;;  %v1682_v26 = vshll.u32 %v6813_v16, %v1667_v48  ;;  %v1672_v3 = vor.u32 %v1671_v6, %v1670_v19 }
0x19c8   :  { %v3586_v0 = vadd.s32 536870912, %v3585_v61  ;;  %v1681_v25 = vor.u32 %v1680_v15, %v1679_v20  ;;  %v1675_v27 = vor.u32 %v1674_v11, %v1673_v58  ;;  %v1678_v45 = vor.u32 %v1677_v13, %v1676_v23 }
0x19c9   :  { %v4241_v63 = vmin.u32 %v2131_v59, %v5162_v51  ;;  %v1684_v30 = vor.u32 %v1683_v24, %v1682_v26  ;;  %v1661_v31 = vor.u32 8388608, %v1660_v4  ;;  %vm1685_vm5 = vcmp.lt.s32.totalorder %v1666_v18, 1 }
0x19ca   :  { %v5178_v17 = vshrl.u32 %v3586_v0, 30  ;;  %vm1688_vm6 = vcmp.lt.s32.totalorder %v1666_v18, 4  ;;  %vm1687_vm7 = vcmp.lt.s32.totalorder %v1666_v18, 3  ;;  %v1693_v40 = vsel %vm1685_vm5, %v1672_v3, %v1675_v27 }
0x19cb   :  { %v2133_v7 = vclz %v4241_v63  ;;  %v1694_v35 = vsel %vm1688_vm6, %v1681_v25, 920167782  ;;  %v1759_v47 = vand.u32 2139095040, %v5044_v39  ;;  %v1690_v49 = vsel %vm1688_vm6, %v1678_v45, 2102212464 }
0x19cc   :  { %v3588_v9 = vshll.u32 %v5178_v17, 30  ;;  %v1695_v43 = vsel %vm1687_vm7, %v1678_v45, %v1694_v35  ;;  %v1697_v50 = vsel %vm1685_vm5, %v1675_v27, %v1678_v45  ;;  %v1698_v55 = vsel %vm1688_vm6, %v1684_v30, 1326507024 }
0x19cd   :  { %v4242_v21 = vadd.s32 4294967294, %v2133_v7  ;;  %v1669_v54 = vshrl.u32 %v6822_v5, %v1668_v60  ;;  %vm1686_vm8 = vcmp.lt.s32.totalorder %v1666_v18, 2  ;;  %v1699_v59 = vsel %vm1687_vm7, %v1681_v25, %v1698_v55 }
0x19ce   :  { %v3589_v29 = vsub.s32 %v3585_v61, %v3588_v9  ;;  %v1696_v0 = vsel %vm1686_vm8, %v1693_v40, %v1695_v43  ;;  %v1701_v4 = vshll.u32 %v1661_v31, 8  ;;  %v1691_v7 = vsel %vm1687_vm7, %v1675_v27, %v1690_v49 }
0x19cf   :  { %vm4243_vm4 = vcmp.lt.s32.totalorder %v4242_v21, 0  ;;  %v1689_v6 = vsel %vm1685_vm5, %v1669_v54, %v1672_v3  ;;  %v1700_v11 = vsel %vm1686_vm8, %v1697_v50, %v1699_v59  ;;  %v1760_v13 = vshrl.u32 %v1759_v47, 23 }
0x19d0   :  { %v2136_v28 = vsel %vm4243_vm4, 0, %v4242_v21  ;;  %v3591_v33 = vsub.s32 0, %v3589_v29  ;;  %v5198_v20 = vmul.u32.u64.low %v1701_v4, %v1700_v11  ;;  %v5199_v21 = vmul.u32.u64.high %v1701_v4, %v1700_v11, %v5198_v20 }
0x19d1   :  { %v2141_v32 = vsub.s32 4294967266, %v2136_v28  ;;  %v2137_v15 = vsub.s32 32, %v2136_v28  ;;  %v5201_v60 = vmul.u32.u64.low %v1701_v4, %v1696_v0  ;;  %v5202_v58 = vmul.u32.u64.high %v1701_v4, %v1696_v0, %v5201_v60 }
0x19d2   :  { %v4297_v48 = vmin.u32 %v3591_v33, %v3589_v29  ;;  %v4228_v23 = vadd.s32 4294967169, %v1760_v13  ;;  %v2121_v24 = vadd.s32 %v5125_v53, %v5122_v52  ;;  %v1692_v25 = vsel %vm1686_vm8, %v1689_v6, %v1691_v7 }
0x19d3   :  { %v2142_v61 = vadd.s32 127, %v2141_v32  ;;  %v3581_v26 = vadd.s32 %v5149_v38, %v5157_v44  ;;  %v2138_v45 = vshll.u32 %v5162_v51, %v2136_v28  ;;  %v1708_v33 = vmul.u32 %v1701_v4, %v1692_v25 }
0x19d4   :  { %v3593_v63 = vclz %v4297_v48  ;;  %v1766_v27 = vadd.s32 1, %v4228_v23  ;;  %v2139_v30 = vshrl.u32 %v2121_v24, %v2137_v15  ;;  %vm1710_vm10 = vc.u32 %v5199_v21, %v5201_v60 }
0x19d5   :  { %v2143_v9 = vshll.u32 %v2142_v61, 23  ;;  %v1711_v52 = vadd.s32 1, %v5202_v58  ;;  %v5219_v0 = vand.u32 2147483647, %v5044_v39  ;;  %vm2066_vm13 = vcmp.le.f32.partialorder %v5039_v37, 0.7853982 }
0x19d6   :  { %v4298_v19 = vadd.s32 4294967294, %v3593_v63  ;;  %vm1767_vm11 = vcmp.gt.s32.totalorder %v1766_v27, 0  ;;  %v2140_v47 = vor.u32 %v2139_v30, %v2138_v45  ;;  %vm3527_vm14 = vcmp.lt.s32.totalorder %v5048_v41, 0 }
0x19d7   :  { %v2144_v53 = vor.u32 4788187, %v2143_v9  ;;  %v1768_v40 = vsel %vm1767_vm11, %v1766_v27, 0  ;;  %v1712_v38 = vsel %vm1710_vm10, %v1711_v52, %v5202_v58  ;;  %v2151_v9 = vsub.s32 4, %v5153_v42 }
0x19d8   :  { %vm4299_vm9 = vcmp.lt.s32.totalorder %v4298_v19, 0  ;;  %v1770_v44 = vand.u32 31, %v1768_v40  ;;  %v1713_v28 = vadd.s32 %v1712_v38, %v1708_v33  ;;  %v2147_v59 = vcvt.s32.f32 %v2140_v47 }
0x19d9   :  { %v3596_v3 = vsel %vm4299_vm9, 0, %v4298_v19  ;;  %v2145_v50 = vand.u32 2147483647, %v2144_v53  ;;  %v5225_v15 = vshrl.u32 %v1768_v40, 5  ;;  %vm5244_vm0 = vcmp.le.f32.partialorder %v3525_v46, 0.7853982 }
0x19da   :  { %v3597_v31 = vsub.s32 32, %v3596_v3  ;;  %v3601_v32 = vsub.s32 4294967266, %v3596_v3  ;;  %v3598_v43 = vshll.u32 %v3589_v29, %v3596_v3  ;;  %v1771_v49 = vsub.s32 32, %v1770_v44 }
0x19db   :  { %v1714_v54 = vadd.s32 536870912, %v1713_v28  ;;  %v2148_v11 = vmul.f32 %v2147_v59, %v2145_v50  ;;  %v1782_v19 = vshll.u32 %v6811_v14, %v1770_v44  ;;  %v1773_v58 = vshll.u32 %v6822_v5, %v1770_v44 }
0x19dc   :  { %v3599_v18 = vshrl.u32 %v3581_v26, %v3597_v31  ;;  %v3602_v35 = vadd.s32 127, %v3601_v32  ;;  %v1774_v4 = vshrl.u32 %v6819_v10, %v1771_v49  ;;  %v1777_v6 = vshrl.u32 %v6817_v12, %v1771_v49 }
0x19dd   :  { %v5216_v63 = vshrl.u32 %v1714_v54, 30  ;;  %v1783_v7 = vshrl.u32 %v6813_v16, %v1771_v49  ;;  %v1776_v23 = vshll.u32 %v6819_v10, %v1770_v44  ;;  %v1780_v24 = vshrl.u32 %v6811_v14, %v1771_v49 }
0x19de   :  { %v3603_v51 = vshll.u32 %v3602_v35, 23  ;;  %v3600_v48 = vor.u32 %v3599_v18, %v3598_v43  ;;  %v1763_v26 = vand.u32 8388607, %v5219_v0  ;;  %v1775_v27 = vor.u32 %v1774_v4, %v1773_v58 }
0x19df   :  { %v1716_v13 = vshll.u32 %v5216_v63, 30  ;;  %v1784_v3 = vor.u32 %v1783_v7, %v1782_v19  ;;  %v1778_v45 = vor.u32 %v1777_v6, %v1776_v23  ;;  %v1779_v30 = vshll.u32 %v6817_v12, %v1770_v44 }
0x19e0   :  { %v3604_v55 = vor.u32 4788187, %v3603_v51  ;;  %v3607_v29 = vcvt.s32.f32 %v3600_v48  ;;  %v1786_v31 = vshrl.u32 %v6815_v22, %v1771_v49  ;;  %v2149_v32 = vxor.u32 2147483648, %v2148_v11 }
0x19e1   :  { %v5232_v25 = vsub.s32 %v1713_v28, %v1716_v13  ;;  %v1781_v53 = vor.u32 %v1780_v24, %v1779_v30  ;;  %v1785_v18 = vshll.u32 %v6813_v16, %v1770_v44  ;;  %vm1791_vm15 = vcmp.lt.s32.totalorder %v5225_v15, 4 }
0x19e2   :  { %v3605_v61 = vand.u32 2147483647, %v3604_v55  ;;  %vm1788_vm1 = vcmp.lt.s32.totalorder %v5225_v15, 1  ;;  %v1797_v43 = vsel %vm1791_vm15, %v1784_v3, 920167782  ;;  %v2152_v38 = vsel %vm2067_vm12, %v2151_v9, %v5153_v42 }
0x19e3   :  { %v1719_v33 = vsub.s32 0, %v5232_v25  ;;  %v1764_v44 = vor.u32 8388608, %v1763_v26  ;;  %v1787_v47 = vor.u32 %v1786_v31, %v1785_v18  ;;  %v1796_v51 = vsel %vm1788_vm1, %v1775_v27, %v1778_v45 }
0x19e4   :  { %v3608_v20 = vmul.f32 %v3607_v29, %v3605_v61  ;;  %v2150_v46 = vsel %vm2067_vm12, %v2149_v32, %v2148_v11  ;;  %v1772_v48 = vshrl.u32 %v6822_v5, %v1771_v49  ;;  %vm1790_vm2 = vcmp.lt.s32.totalorder %v5225_v15, 3 }
0x19e5   :  { %v4225_v40 = vmin.u32 %v1719_v33, %v5232_v25  ;;  %vm1789_vm3 = vcmp.lt.s32.totalorder %v5225_v15, 2  ;;  %v1793_v42 = vsel %vm1791_vm15, %v1781_v53, 2102212464  ;;  %v1798_v55 = vsel %vm1790_vm2, %v1781_v53, %v1797_v43 }
0x19e6   :  { %v3609_v52 = vxor.u32 2147483648, %v3608_v20  ;;  %v3611_v54 = vsub.s32 4, %v5178_v17  ;;  %v1799_v61 = vsel %vm1789_vm3, %v1796_v51, %v1798_v55  ;;  %v1800_v49 = vsel %vm1788_vm1, %v1778_v45, %v1781_v53 }
0x19e7   :  { %v1721_v28 = vclz %v4225_v40  ;;  %v5276_v29 = vsel %vm2066_vm13, %v5029_v34, %v2150_v46  ;;  %v1792_v4 = vsel %vm1788_vm1, %v1772_v48, %v1775_v27  ;;  %v1801_v6 = vsel %vm1791_vm15, %v1787_v47, 1326507024 }
0x19e8   :  { %v3610_v50 = vsel %vm3527_vm14, %v3609_v52, %v3608_v20  ;;  %v1804_v7 = vshll.u32 %v1764_v44, 8  ;;  %v1794_v13 = vsel %vm1790_vm2, %v1778_v45, %v1793_v42  ;;  %v1802_v19 = vsel %vm1790_vm2, %v1784_v3, %v1801_v6 }
0x19e9   :  { %v4226_v59 = vadd.s32 4294967294, %v1721_v28  ;;  %v3613_v11 = vsel %vm5244_vm0, %v5048_v41, %v3610_v50  ;;  %v1803_v58 = vsel %vm1789_vm3, %v1800_v49, %v1802_v19  ;;  %4695 = vcosq.f32 %v5276_v29 }
0x19ea   :  { %v5291_v23 = vmul.u32.u64.low %v1804_v7, %v1799_v61  ;;  %v5292_v24 = vmul.u32.u64.high %v1804_v7, %v1799_v61, %v5291_v23  ;;  %v1709_v9 = vadd.s32 %v5201_v60, %v5199_v21  ;;  %4697 = vcosq.f32 %v3613_v11 }
0x19eb   :  { %vm4227_vm4 = vcmp.lt.s32.totalorder %v4226_v59, 0  ;;  %v5298_v45 = vmul.u32.u64.low %v1804_v7, %v1803_v58  ;;  %v5299_v30 = vmul.u32.u64.high %v1804_v7, %v1803_v58, %v5298_v45  ;;  %v1862_v3 = vand.u32 2139095040, %v5060_v57 }
0x19ec   :  { %v1724_v20 = vsel %vm4227_vm4, 0, %v4226_v59  ;;  %4699 = vsinq.f32 %v3613_v11  ;;  %v1795_v33 = vsel %vm1789_vm3, %v1792_v4, %v1794_v13  ;;  %v3612_v52 = vsel %vm3527_vm14, %v3611_v54, %v5178_v17 }
0x19ed   :  { %v1725_v26 = vsub.s32 32, %v1724_v20  ;;  %v1729_v27 = vsub.s32 4294967266, %v1724_v20  ;;  %v1739_v21 = vsub.s32 4, %v5216_v63  ;;  %v1814_v60 = vadd.s32 1, %v5292_v24 }
0x19ee   :  { %v1863_v53 = vshrl.u32 %v1862_v3, 23  ;;  %vm3848_vm5 = vcmp.lt.f32.partialorder %v5039_v37, 0.0001  ;;  %vm1655_vm6 = vcmp.lt.s32.totalorder %v5032_v36, 0  ;;  %v1726_v18 = vshll.u32 %v5232_v25, %v1724_v20 }
0x19ef   :  { %v1727_v31 = vshrl.u32 %v1709_v9, %v1725_v26  ;;  %v1730_v32 = vadd.s32 127, %v1729_v27  ;;  %v5314_v15 = vsel %vm2066_vm13, 0, %v2152_v38  ;;  %v1811_v43 = vmul.u32 %v1804_v7, %v1795_v33 }
0x19f0   :  { %vm1813_vm7 = vc.u32 %v5299_v30, %v5291_v23  ;;  %v4232_v17 = vadd.s32 4294967169, %v1863_v53  ;;  %v3614_v44 = vsel %vm5244_vm0, 0, %v3612_v52  ;;  %v1740_v25 = vsel %vm1655_vm6, %v1739_v21, %v5216_v63 }
0x19f1   :  { %v1731_v40 = vshll.u32 %v1730_v32, 23  ;;  %v1728_v47 = vor.u32 %v1727_v31, %v1726_v18  ;;  %v1815_v46 = vsel %vm1813_vm7, %v1814_v60, %v5292_v24  ;;  %v5325_v38 = vand.u32 2147483647, %v5060_v57 }
0x19f2   :  { %v1816_v28 = vadd.s32 %v1815_v46, %v1811_v43  ;;  %v1869_v48 = vadd.s32 1, %v4232_v17  ;;  %v2883_v50 = vadd.s32 3, %v5314_v15  ;;  %v3855_v35 = vsel %vm3848_vm5, 1.0, %v5029_v34 }
0x19f3   :  { %v1732_v51 = vor.u32 4788187, %v1731_v40  ;;  %v3618_v55 = vadd.s32 3, %v3614_v44  ;;  %vm1654_vm8 = vcmp.le.f32.partialorder %v5169_v56, 0.7853982  ;;  %v5332_v59 = vpop.eup %4695  ;;  %v1735_v63 = vcvt.s32.f32 %v1728_v47 }
0x19f4   :  { %v1817_v54 = vadd.s32 536870912, %v1816_v28  ;;  %vm1870_vm9 = vcmp.gt.s32.totalorder %v1869_v48, 0  ;;  %v5336_v61 = vsel %vm1654_vm8, 0, %v1740_v25  ;;  %v5338_v4 = vpop.eup %4697  ;;  %v1866_v7 = vand.u32 8388607, %v5325_v38 }
0x19f5   :  { %v1733_v42 = vand.u32 2147483647, %v1732_v51  ;;  %v1871_v49 = vsel %vm1870_vm9, %v1869_v48, 0  ;;  %v1965_v13 = vand.u32 2139095040, %v5077_v1  ;;  %v5346_v20 = vand.u32 3, %v2883_v50 }
0x19f6   :  { %v5340_v6 = vshrl.u32 %v1817_v54, 30  ;;  %v1873_v11 = vand.u32 31, %v1871_v49  ;;  %v5344_v19 = vpop.eup %4699  ;;  %v5350_v58 = vmul.f32 %v5029_v34, %v5029_v34  ;;  %4701 = vrcp.f32 %v3855_v35 }
0x19f7   :  { %v1736_v24 = vmul.f32 %v1735_v63, %v1733_v42  ;;  %4703 = vsinq.f32 %v5276_v29  ;;  %v5353_v9 = vand.u32 3, %v3618_v55  ;;  %v6809_v45 = vxor.u32 2147483648, %v5332_v59 }
0x19f8   :  { %v1819_v26 = vshll.u32 %v5340_v6, 30  ;;  %v1874_v27 = vsub.s32 32, %v1873_v11  ;;  %v3625_v3 = vxor.u32 2147483648, %v5338_v4  ;;  %v5359_v31 = vand.u32 3, %v5336_v61 }
0x19f9   :  { %v5362_v32 = vand.u32 2147483647, %v5077_v1  ;;  %v3622_v33 = vxor.u32 2147483648, %v5344_v19  ;;  %v1867_v29 = vor.u32 8388608, %v1866_v7  ;;  %v1966_v21 = vshrl.u32 %v1965_v13, 23 }
0x19fa   :  { %v5365_v52 = vsub.s32 %v1816_v28, %v1819_v26  ;;  %v1737_v60 = vxor.u32 2147483648, %v1736_v24  ;;  %v5367_v53 = vshrl.u32 %v1871_v49, 5  ;;  %v1876_v18 = vshll.u32 %v6822_v5, %v1873_v11 }
0x19fb   :  { %v1877_v40 = vshrl.u32 %v6819_v10, %v1874_v27  ;;  %v1879_v17 = vshll.u32 %v6819_v10, %v1873_v11  ;;  %v1880_v44 = vshrl.u32 %v6817_v12, %v1874_v27  ;;  %v1882_v47 = vshll.u32 %v6817_v12, %v1873_v11 }
0x19fc   :  { %v1822_v43 = vsub.s32 0, %v5365_v52  ;;  %v1883_v46 = vshrl.u32 %v6811_v14, %v1874_v27  ;;  %v1885_v25 = vshll.u32 %v6811_v14, %v1873_v11  ;;  %v1886_v28 = vshrl.u32 %v6813_v16, %v1874_v27 }
0x19fd   :  { %v1878_v51 = vor.u32 %v1877_v40, %v1876_v18  ;;  %v5379_v50 = vshll.u32 %v1867_v29, 8  ;;  %v4236_v35 = vadd.s32 4294967169, %v1966_v21  ;;  %v1969_v42 = vand.u32 8388607, %v5362_v32 }
0x19fe   :  { %v4229_v48 = vmin.u32 %v1822_v43, %v5365_v52  ;;  %v1842_v55 = vsub.s32 4, %v5340_v6  ;;  %v1881_v54 = vor.u32 %v1880_v44, %v1879_v17  ;;  %v1884_v63 = vor.u32 %v1883_v46, %v1882_v47 }
0x19ff   :  { %v1887_v49 = vor.u32 %v1886_v28, %v1885_v25  ;;  %vm3621_vm10 = vcmp.eq.s32.totalorder %v5353_v9, 0  ;;  %vm3624_vm11 = vcmp.eq.s32.totalorder %v5353_v9, 2  ;;  %vm1758_vm12 = vcmp.lt.s32.totalorder %v5044_v39, 0 }
0x1a00   :  { %v1824_v7 = vclz %v4229_v48  ;;  %v1888_v13 = vshll.u32 %v6813_v16, %v1873_v11  ;;  %v1889_v26 = vshrl.u32 %v6815_v22, %v1874_v27  ;;  %vm1891_vm13 = vcmp.lt.s32.totalorder %v5367_v53, 1  ;;  %v5389_v29 = vpop.eup %4701 }
0x1a01   :  { %v1738_v21 = vsel %vm1655_vm6, %v1737_v60, %v1736_v24  ;;  %v1875_v18 = vshrl.u32 %v6822_v5, %v1874_v27  ;;  %vm1894_vm14 = vcmp.lt.s32.totalorder %v5367_v53, 4  ;;  %v1899_v40 = vsel %vm1891_vm13, %v1878_v51, %v1881_v54  ;;  %v5397_v43 = vpop.eup %4703 }
0x1a02   :  { %v4230_v17 = vadd.s32 4294967294, %v1824_v7  ;;  %v1890_v11 = vor.u32 %v1889_v26, %v1888_v13  ;;  %vm1893_vm15 = vcmp.lt.s32.totalorder %v5367_v53, 3  ;;  %v1900_v44 = vsel %vm1894_vm14, %v1887_v49, 920167782 }
0x1a03   :  { %vm1757_vm0 = vcmp.le.f32.partialorder %v5219_v0, 0.7853982  ;;  %vm1892_vm1 = vcmp.lt.s32.totalorder %v5367_v53, 2  ;;  %v1896_v47 = vsel %vm1894_vm14, %v1884_v63, 2102212464  ;;  %v1901_v24 = vsel %vm1893_vm15, %v1884_v63, %v1900_v44 }
0x1a04   :  { %v1972_v27 = vadd.s32 1, %v4236_v35  ;;  %vm4231_vm2 = vcmp.lt.s32.totalorder %v4230_v17, 0  ;;  %v1902_v60 = vsel %vm1892_vm1, %v1899_v40, %v1901_v24  ;;  %v1903_v46 = vsel %vm1891_vm13, %v1881_v54, %v1884_v63 }
0x1a05   :  { %v1904_v25 = vsel %vm1894_vm14, %v1890_v11, 1326507024  ;;  %v1827_v28 = vsel %vm4231_vm2, 0, %v4230_v17  ;;  %v5411_v7 = vmul.u32.u64.low %v5379_v50, %v1902_v60  ;;  %v5412_v13 = vmul.u32.u64.high %v5379_v50, %v1902_v60, %v5411_v7 }
0x1a06   :  { %v1905_v48 = vsel %vm1893_vm15, %v1887_v49, %v1904_v25  ;;  %v1741_v35 = vsel %vm1654_vm8, %v5032_v36, %v1738_v21  ;;  %v1812_v26 = vadd.s32 %v5291_v23, %v5299_v30  ;;  %v1828_v40 = vsub.s32 32, %v1827_v28 }
0x1a07   :  { %v1832_v44 = vsub.s32 4294967266, %v1827_v28  ;;  %v1829_v63 = vshll.u32 %v5365_v52, %v1827_v28  ;;  %v1895_v17 = vsel %vm1891_vm13, %v1875_v18, %v1878_v51  ;;  %v1897_v49 = vsel %vm1893_vm15, %v1881_v54, %v1896_v47 }
0x1a08   :  { %vm1973_vm3 = vcmp.gt.s32.totalorder %v1972_v27, 0  ;;  %v1830_v11 = vshrl.u32 %v1812_v26, %v1828_v40  ;;  %v1906_v60 = vsel %vm1892_vm1, %v1903_v46, %v1905_v48  ;;  %v5432_v23 = vsel %vm3621_vm10, %v5338_v4, %v3622_v33 }
0x1a09   :  { %v1833_v24 = vadd.s32 127, %v1832_v44  ;;  %v1974_v21 = vsel %vm1973_vm3, %v1972_v27, 0  ;;  %v5439_v30 = vsel %vm3624_vm11, %v3625_v3, %v5344_v19  ;;  %v1843_v52 = vsel %vm1758_vm12, %v1842_v55, %v5340_v6 }
0x1a0a   :  { %v5444_v51 = vor.u32 8388608, %v1969_v42  ;;  %v1831_v54 = vor.u32 %v1830_v11, %v1829_v63  ;;  %v1898_v47 = vsel %vm1892_vm1, %v1895_v17, %v1897_v49  ;;  %v5449_v33 = vadd.s32 3, %v5336_v61 }
0x1a0b   :  { %v1834_v18 = vshll.u32 %v1833_v24, 23  ;;  %4705 = vcosq.f32 %v1741_v35  ;;  %v5452_v4 = vmul.u32.u64.low %v5379_v50, %v1906_v60  ;;  %v5453_v27 = vmul.u32.u64.high %v5379_v50, %v1906_v60, %v5452_v4 }
0x1a0c   :  { %v1976_v19 = vand.u32 31, %v1974_v21  ;;  %4707 = vsinq.f32 %v1741_v35  ;;  %v1845_v6 = vsel %vm1757_vm0, 0, %v1843_v52  ;;  %v1917_v42 = vadd.s32 1, %v5412_v13 }
0x1a0d   :  { %v1835_v3 = vor.u32 4788187, %v1834_v18  ;;  %v1838_v55 = vcvt.s32.f32 %v1831_v54  ;;  %v1914_v53 = vmul.u32 %v5379_v50, %v1898_v47  ;;  %v5459_v46 = vshrl.u32 %v1974_v21, 5 }
0x1a0e   :  { %v1977_v61 = vsub.s32 32, %v1976_v19  ;;  %v1979_v28 = vshll.u32 %v6822_v5, %v1976_v19  ;;  %v1982_v48 = vshll.u32 %v6819_v10, %v1976_v19  ;;  %v1985_v26 = vshll.u32 %v6817_v12, %v1976_v19 }
0x1a0f   :  { %v1836_v25 = vand.u32 2147483647, %v1835_v3  ;;  %vm1916_vm4 = vc.u32 %v5453_v27, %v5411_v7  ;;  %v1988_v40 = vshll.u32 %v6811_v14, %v1976_v19  ;;  %v1991_v44 = vshll.u32 %v6813_v16, %v1976_v19 }
0x1a10   :  { %v1980_v35 = vshrl.u32 %v6819_v10, %v1977_v61  ;;  %v1918_v63 = vsel %vm1916_vm4, %v1917_v42, %v5412_v13  ;;  %v1983_v17 = vshrl.u32 %v6817_v12, %v1977_v61  ;;  %v1986_v49 = vshrl.u32 %v6811_v14, %v1977_v61 }
0x1a11   :  { %v1839_v50 = vmul.f32 %v1838_v55, %v1836_v25  ;;  %v1919_v11 = vadd.s32 %v1918_v63, %v1914_v53  ;;  %v1989_v60 = vshrl.u32 %v6813_v16, %v1977_v61  ;;  %v1992_v21 = vshrl.u32 %v6815_v22, %v1977_v61 }
0x1a12   :  { %v1981_v24 = vor.u32 %v1980_v35, %v1979_v28  ;;  %v5474_v54 = vand.u32 3, %v1845_v6  ;;  %v1984_v18 = vor.u32 %v1983_v17, %v1982_v48  ;;  %v1987_v47 = vor.u32 %v1986_v49, %v1985_v26 }
0x1a13   :  { %v1840_v52 = vxor.u32 2147483648, %v1839_v50  ;;  %v1920_v4 = vadd.s32 536870912, %v1919_v11  ;;  %v1990_v19 = vor.u32 %v1989_v60, %v1988_v40  ;;  %v1993_v3 = vor.u32 %v1992_v21, %v1991_v44 }
0x1a14   :  { %vm1997_vm6 = vcmp.lt.s32.totalorder %v5459_v46, 4  ;;  %vm3620_vm7 = vcmp.lt.s32.totalorder %v5353_v9, 2  ;;  %vm1994_vm8 = vcmp.lt.s32.totalorder %v5459_v46, 1  ;;  %vm1996_vm9 = vcmp.lt.s32.totalorder %v5459_v46, 3 }
0x1a15   :  { %v1841_v13 = vsel %vm1758_vm12, %v1840_v52, %v1839_v50  ;;  %v1999_v42 = vsel %vm1997_vm6, %v1987_v47, 2102212464  ;;  %v4706_v55 = vpop.eup %4705  ;;  %v5485_v25 = vshrl.u32 %v1920_v4, 30  ;;  %v2002_v28 = vsel %vm1994_vm8, %v1981_v24, %v1984_v18 }
0x1a16   :  { %v1844_v53 = vsel %vm1757_vm0, %v5044_v39, %v1841_v13  ;;  %v2003_v48 = vsel %vm1997_vm6, %v1990_v19, 920167782  ;;  %v4708_v26 = vpop.eup %4707  ;;  %v2006_v40 = vsel %vm1994_vm8, %v1984_v18, %v1987_v47  ;;  %v2007_v44 = vsel %vm1997_vm6, %v1993_v3, 1326507024 }
0x1a17   :  { %4709 = vcosq.f32 %v1844_v53  ;;  %v2004_v35 = vsel %vm1996_vm9, %v1987_v47, %v2003_v48  ;;  %v1922_v50 = vshll.u32 %v5485_v25, 30  ;;  %v1978_v63 = vshrl.u32 %v6822_v5, %v1977_v61 }
0x1a18   :  { %4711 = vsinq.f32 %v1844_v53  ;;  %vm1995_vm10 = vcmp.lt.s32.totalorder %v5459_v46, 2  ;;  %v1752_v17 = vxor.u32 2147483648, %v4706_v55  ;;  %v2008_v60 = vsel %vm1996_vm9, %v1990_v19, %v2007_v44 }
0x1a19   :  { %v2005_v49 = vsel %vm1995_vm10, %v2002_v28, %v2004_v35  ;;  %v2010_v21 = vshll.u32 %v5444_v51, 8  ;;  %v5501_v52 = vsub.s32 %v1919_v11, %v1922_v50  ;;  %v1998_v47 = vsel %vm1994_vm8, %v1978_v63, %v1981_v24 }
0x1a1a   :  { %v2000_v4 = vsel %vm1996_vm9, %v1984_v18, %v1999_v42  ;;  %v2009_v61 = vsel %vm1995_vm10, %v2006_v40, %v2008_v60  ;;  %v2468_v53 = vand.u32 3, %v5449_v33  ;;  %v2571_v28 = vadd.s32 3, %v1845_v6 }
0x1a1b   :  { %v5509_v3 = vmul.u32.u64.low %v2010_v21, %v2009_v61  ;;  %v5510_v13 = vmul.u32.u64.high %v2010_v21, %v2009_v61, %v5509_v3  ;;  %v1749_v19 = vxor.u32 2147483648, %v4708_v26  ;;  %v1925_v51 = vsub.s32 0, %v5501_v52 }
0x1a1c   :  { %v5514_v11 = vmul.u32.u64.low %v2010_v21, %v2005_v49  ;;  %v5515_v48 = vmul.u32.u64.high %v2010_v21, %v2005_v49, %v5514_v11  ;;  %v6808_v24 = vxor.u32 2147483648, %v5397_v43  ;;  %vm1745_vm11 = vweird.f32 %v5032_v36 }
0x1a1d   :  { %vm1747_vm12 = vcmp.lt.s32.totalorder %v5359_v31, 2  ;;  %vm1748_vm13 = vcmp.eq.s32.totalorder %v5359_v31, 0  ;;  %vm1751_vm14 = vcmp.eq.s32.totalorder %v5359_v31, 2  ;;  %v5527_v33 = vsel %vm3620_vm7, %v5432_v23, %v5439_v30 }
0x1a1e   :  { %vm1851_vm15 = vcmp.eq.s32.totalorder %v5474_v54, 0  ;;  %v4233_v6 = vmin.u32 %v1925_v51, %v5501_v52  ;;  %v2001_v18 = vsel %vm1995_vm10, %v1998_v47, %v2000_v4  ;;  %vm2019_vm0 = vc.u32 %v5510_v13, %v5514_v11 }
0x1a1f   :  { %vm2470_vm1 = vcmp.eq.s32.totalorder %v2468_v53, 0  ;;  %vm2473_vm2 = vcmp.eq.s32.totalorder %v2468_v53, 2  ;;  %v2572_v42 = vand.u32 3, %v2571_v28  ;;  %vm1848_vm3 = vweird.f32 %v5044_v39 }
0x1a20   :  { %v1927_v35 = vclz %v4233_v6  ;;  %v2020_v9 = vadd.s32 1, %v5515_v48  ;;  %v2472_v23 = vsel %vm2470_vm1, %v4706_v55, %v1749_v19  ;;  %v2475_v30 = vsel %vm2473_vm2, %v1752_v17, %v4708_v26 }
0x1a21   :  { %v4710_v40 = vpop.eup %4709  ;;  %v1750_v44 = vsel %vm1748_vm13, %v4706_v55, %v1749_v19  ;;  %v1753_v46 = vsel %vm1751_vm14, %v1752_v17, %v4708_v26  ;;  %vm1854_vm4 = vcmp.eq.s32.totalorder %v5474_v54, 2  ;;  %v2017_v50 = vmul.u32 %v2010_v21, %v2001_v18 }
0x1a22   :  { %v4712_v63 = vpop.eup %4711  ;;  %vm2889_vm6 = vcmp.eq.s32.totalorder %v5346_v20, 2  ;;  %v1855_v49 = vxor.u32 2147483648, %v4710_v40  ;;  %v4234_v60 = vadd.s32 4294967294, %v1927_v35  ;;  %v2021_v47 = vsel %vm2019_vm0, %v2020_v9, %v5515_v48 }
0x1a23   :  { %vm2469_vm7 = vcmp.lt.s32.totalorder %v2468_v53, 2  ;;  %v1852_v4 = vxor.u32 2147483648, %v4712_v63  ;;  %v2022_v61 = vadd.s32 %v2021_v47, %v2017_v50  ;;  %vm2577_vm8 = vcmp.eq.s32.totalorder %v2572_v42, 2 }
0x1a24   :  { %v2476_v55 = vsel %vm2469_vm7, %v2472_v23, %v2475_v30  ;;  %vm3617_vm9 = vweird.f32 %v5048_v41  ;;  %v1754_v26 = vsel %vm1747_vm12, %v1750_v44, %v1753_v46  ;;  %vm4235_vm10 = vcmp.lt.s32.totalorder %v4234_v60, 0 }
0x1a25   :  { %vm2574_vm13 = vcmp.eq.s32.totalorder %v2572_v42, 0  ;;  %v2579_v17 = vsel %vm2577_vm8, %v1855_v49, %v4712_v63  ;;  %v1915_v21 = vadd.s32 %v5411_v7, %v5453_v27  ;;  %v1930_v3 = vsel %vm4235_vm10, 0, %v4234_v60 }
0x1a26   :  { %v2023_v28 = vadd.s32 536870912, %v2022_v61  ;;  %v2576_v19 = vsel %vm2574_vm13, %v4710_v40, %v1852_v4  ;;  %vm2885_vm14 = vcmp.lt.s32.totalorder %v5346_v20, 2  ;;  %v1931_v53 = vsub.s32 32, %v1930_v3 }
0x1a27   :  { %v1935_v51 = vsub.s32 4294967266, %v1930_v3  ;;  %v5555_v48 = vsel %vm1745_vm11, nan, %v2476_v55  ;;  %vm2573_vm0 = vcmp.lt.s32.totalorder %v2572_v42, 2  ;;  %v1853_v31 = vsel %vm1851_vm15, %v4710_v40, %v1852_v4 }
0x1a28   :  { %6856 = vst [vmem:[#allocation8_spill] sm:$0xff] %v5555_v48  ;;  %v1856_v6 = vsel %vm1854_vm4, %v1855_v49, %v4712_v63  ;;  %v5561_v18 = vshrl.u32 %v2023_v28, 30  ;;  %v2580_v7 = vsel %vm2573_vm0, %v2576_v19, %v2579_v17  ;;  %v5565_v27 = vsel %vm1745_vm11, nan, %v1754_v26 }
0x1a29   :  { %6857 = vst [vmem:[#allocation9_spill] sm:$0xff] %v5565_v27  ;;  %v1932_v35 = vshll.u32 %v5501_v52, %v1930_v3  ;;  %v1933_v9 = vshrl.u32 %v1915_v21, %v1931_v53  ;;  %v1936_v23 = vadd.s32 127, %v1935_v51  ;;  %vm1850_vm12 = vcmp.lt.s32.totalorder %v5474_v54, 2 }
0x1a2a   :  { %v2025_v42 = vshll.u32 %v5561_v18, 30  ;;  %v5572_v30 = vsel %vm1848_vm3, nan, %v2580_v7  ;;  %v6806_v40 = vsub.f32 0.0, %v5555_v48  ;;  %v1857_v44 = vsel %vm1850_vm12, %v1853_v31, %v1856_v6 }
0x1a2b   :  { %6858 = vst [vmem:[#allocation10_spill] sm:$0xff] %v5572_v30  ;;  %v1934_v46 = vor.u32 %v1933_v9, %v1932_v35  ;;  %v1937_v50 = vshll.u32 %v1936_v23, 23  ;;  %v4020_v63 = vmul.f32 0.0, %v5555_v48  ;;  %vm2886_vm11 = vcmp.eq.s32.totalorder %v5346_v20, 0 }
0x1a2c   :  { %v2891_v54 = vsel %vm2889_vm6, %v6809_v45, %v5397_v43  ;;  %v2026_v52 = vsub.s32 %v2022_v61, %v2025_v42  ;;  %v5583_v49 = vmul.f32 0.0, %v5565_v27  ;;  %v2888_v60 = vsel %vm2886_vm11, %v5332_v59, %v6808_v24 }
0x1a2d   :  { %v1938_v47 = vor.u32 4788187, %v1937_v50  ;;  %v6805_v4 = vsub.f32 0.0, %v5572_v30  ;;  %v5590_v55 = vadd.f32 %v4020_v63, %v5565_v27  ;;  %v3628_v26 = vsel %vm3617_vm9, nan, %v5527_v33 }
0x1a2e   :  { %6859 = vst [vmem:[#allocation11_spill] sm:$0xff] %v5583_v49  ;;  %v5597_v61 = vsel %vm1848_vm3, nan, %v1857_v44  ;;  %v2028_v17 = vsub.s32 0, %v2026_v52  ;;  %v5602_v21 = vadd.f32 %v5583_v49, %v6806_v40  ;;  %v1941_v28 = vcvt.s32.f32 %v1934_v46 }
0x1a2f   :  { %6860 = vst [vmem:[#allocation12_spill] sm:$0xff] %v5597_v61  ;;  %v1939_v3 = vand.u32 2147483647, %v1938_v47  ;;  %v1945_v19 = vsub.s32 4, %v5485_v25  ;;  %v4033_v53 = vmul.f32 %v5590_v55, %v5597_v61  ;;  %v2892_v33 = vsel %vm2885_vm14, %v2888_v60, %v2891_v54 }
0x1a30   :  { %v4237_v51 = vmin.u32 %v2028_v17, %v2026_v52  ;;  %v3905_v31 = vmul.f32 2.0, %v3628_v26  ;;  %v4034_v7 = vmul.f32 %v5602_v21, %v5572_v30  ;;  %v4036_v35 = vmul.f32 %v5590_v55, %v6805_v4 }
0x1a31   :  { %v1942_v6 = vmul.f32 %v1941_v28, %v1939_v3  ;;  %vm1861_vm15 = vcmp.lt.s32.totalorder %v5060_v57, 0  ;;  %v4037_v23 = vmul.f32 %v5602_v21, %v5597_v61  ;;  %vm2157_vm1 = vweird.f32 %v5029_v34 }
0x1a32   :  { %v2030_v9 = vclz %v4237_v51  ;;  %v3870_v20 = vmul.f32 0.16666667, %v5350_v58  ;;  %v1946_v44 = vsel %vm1861_vm15, %v1945_v19, %v5485_v25  ;;  %v5622_v46 = vsel %vm2157_vm1, nan, %v2892_v33 }
0x1a33   :  { %v1943_v42 = vxor.u32 2147483648, %v1942_v6  ;;  %v5624_v63 = vadd.f32 %v4034_v7, %v4033_v53  ;;  %v5626_v54 = vadd.f32 %v4037_v23, %v4036_v35  ;;  %v3912_v60 = vmul.f32 %v3905_v31, %v3628_v26 }
0x1a34   :  { %v4238_v50 = vadd.s32 4294967294, %v2030_v9  ;;  %vm1860_vm2 = vcmp.le.f32.partialorder %v5325_v38, 0.7853982  ;;  %v5630_v17 = vmul.f32 0.5, %v5032_v36  ;;  %v3889_v25 = vmul.f32 %v5389_v29, %v5622_v46 }
0x1a35   :  { %6861 = vst [vmem:[#allocation13_spill] sm:$0xff] %v5624_v63  ;;  %6862 = vst [vmem:[#allocation14_spill] sm:$0xff] %v5626_v54  ;;  %v1944_v47 = vsel %vm1861_vm15, %v1943_v42, %v1942_v6  ;;  %v1948_v3 = vsel %vm1860_vm2, 0, %v1946_v44  ;;  %v2048_v19 = vsub.s32 4, %v5561_v18  ;;  %v2018_v26 = vadd.s32 %v5514_v11, %v5510_v13  ;;  %v3973_v42 = vpop.permute.xlu1 %3972 }
0x1a36   :  { %v1947_v58 = vsel %vm1860_vm2, %v5060_v57, %v1944_v47  ;;  %vm4239_vm3 = vcmp.lt.s32.totalorder %v4238_v50, 0  ;;  %v3877_v51 = vsub.f32 1.0, %v3870_v20  ;;  %v3919_v31 = vmul.f32 %v5389_v29, %v3912_v60  ;;  %v3945_v20 = vpop.permute.xlu0 %3944 }
0x1a37   :  { %4713 = vcosq.f32 %v1947_v58  ;;  %v2033_v28 = vsel %vm4239_vm3, 0, %v4238_v50  ;;  %v2675_v6 = vadd.s32 3, %v1948_v3  ;;  %v3112_v7 = vand.u32 2139095040, %v5630_v17 }
0x1a38   :  { %4715 = vsinq.f32 %v1947_v58  ;;  %v2034_v53 = vsub.s32 32, %v2033_v28  ;;  %v2038_v33 = vsub.s32 4294967266, %v2033_v28  ;;  %vm1964_vm4 = vcmp.lt.s32.totalorder %v5077_v1, 0 }
0x1a39   :  { %v2035_v35 = vshll.u32 %v2026_v52, %v2033_v28  ;;  %v1952_v44 = vand.u32 3, %v1948_v3  ;;  %v2049_v50 = vsel %vm1964_vm4, %v2048_v19, %v5561_v18  ;;  %v3113_v13 = vshrl.u32 %v3112_v7, 23 }
0x1a3a   :  { %v2036_v9 = vshrl.u32 %v2018_v26, %v2034_v53  ;;  %v2039_v23 = vadd.s32 127, %v2038_v33  ;;  %v3898_v11 = vsel %vm3848_vm5, %v3877_v51, %v3889_v25  ;;  %v3926_v47 = vsel %vm3848_vm5, %v5048_v41, %v3919_v31 }
0x1a3b   :  { %vm1963_vm6 = vcmp.le.f32.partialorder %v5362_v32, 0.7853982  ;;  %v2676_v52 = vand.u32 3, %v2675_v6  ;;  %v4280_v58 = vadd.s32 4294967169, %v3113_v13  ;;  %v5650_v3 = vmul.f32 %v3973_v42, %v3926_v47 }
0x1a3c   :  { %v2037_v29 = vor.u32 %v2036_v9, %v2035_v35  ;;  %v2040_v60 = vshll.u32 %v2039_v23, 23  ;;  %vm1951_vm7 = vweird.f32 %v5060_v57  ;;  %v2051_v28 = vsel %vm1963_vm6, 0, %v2049_v50 }
0x1a3d   :  { %v5655_v25 = vmul.f32 %v3973_v42, %v3898_v11  ;;  %vm1953_vm8 = vcmp.lt.s32.totalorder %v1952_v44, 2  ;;  %v5657_v19 = vmul.f32 %v3945_v20, %v3898_v11  ;;  %v3119_v26 = vadd.s32 1, %v4280_v58 }
0x1a3e   :  { %v2041_v18 = vor.u32 4788187, %v2040_v60  ;;  %vm1954_vm9 = vcmp.eq.s32.totalorder %v1952_v44, 0  ;;  %vm1957_vm5 = vcmp.eq.s32.totalorder %v1952_v44, 2  ;;  %v2044_v41 = vcvt.s32.f32 %v2037_v29 }
0x1a3f   :  { %vm2677_vm10 = vcmp.lt.s32.totalorder %v2676_v52, 2  ;;  %v2779_v33 = vadd.s32 3, %v2051_v28  ;;  %v6810_v51 = vand.u32 2147483647, %v5630_v17  ;;  %vm3120_vm13 = vcmp.gt.s32.totalorder %v3119_v26, 0 }
0x1a40   :  { %v2042_v37 = vand.u32 2147483647, %v2041_v18  ;;  %v3121_v35 = vsel %vm3120_vm13, %v3119_v26, 0  ;;  %v5661_v9 = vmul.f32 0.5, %v5044_v39  ;;  %vm2678_vm14 = vcmp.eq.s32.totalorder %v2676_v52, 0 }
0x1a41   :  { %v4714_v53 = vpop.eup %4713  ;;  %vm2681_vm0 = vcmp.eq.s32.totalorder %v2676_v52, 2  ;;  %v3123_v42 = vand.u32 31, %v3121_v35  ;;  %v5664_v11 = vand.u32 3, %v2051_v28  ;;  %v5667_v18 = vand.u32 3, %v2779_v33 }
0x1a42   :  { %v4716_v31 = vpop.eup %4715  ;;  %v1958_v6 = vxor.u32 2147483648, %v4714_v53  ;;  %v2045_v7 = vmul.f32 %v2044_v41, %v2042_v37  ;;  %v3116_v26 = vand.u32 8388607, %v6810_v51  ;;  %v3216_v40 = vand.u32 2139095040, %v5661_v9 }
0x1a43   :  { %v1955_v23 = vxor.u32 2147483648, %v4716_v31  ;;  %v3124_v44 = vsub.s32 32, %v3123_v42  ;;  %vm2060_vm12 = vcmp.eq.s32.totalorder %v5664_v11, 2  ;;  %vm2785_vm11 = vcmp.eq.s32.totalorder %v5667_v18, 2 }
0x1a44   :  { %v1959_v50 = vsel %vm1957_vm5, %v1958_v6, %v4716_v31  ;;  %v2046_v13 = vxor.u32 2147483648, %v2045_v7  ;;  %v2683_v29 = vsel %vm2681_vm0, %v1958_v6, %v4716_v31  ;;  %vm2057_vm15 = vcmp.eq.s32.totalorder %v5664_v11, 0 }
0x1a45   :  { %v1956_v60 = vsel %vm1954_vm9, %v4714_v53, %v1955_v23  ;;  %v2680_v58 = vsel %vm2678_vm14, %v4714_v53, %v1955_v23  ;;  %vm2782_vm2 = vcmp.eq.s32.totalorder %v5667_v18, 0  ;;  %vm2056_vm3 = vcmp.lt.s32.totalorder %v5664_v11, 2 }
0x1a46   :  { %v1960_v37 = vsel %vm1953_vm8, %v1956_v60, %v1959_v50  ;;  %v2047_v41 = vsel %vm1964_vm4, %v2046_v13, %v2045_v7  ;;  %v2684_v4 = vsel %vm2677_vm10, %v2680_v58, %v2683_v29  ;;  %v5692_v7 = vmul.f32 %v3945_v20, %v3926_v47 }
0x1a47   :  { %v5678_v28 = vsel %vm1951_vm7, nan, %v1960_v37  ;;  %v2050_v53 = vsel %vm1963_vm6, %v5077_v1, %v2047_v41  ;;  %v5685_v33 = vsel %vm1951_vm7, nan, %v2684_v4  ;;  %v3117_v50 = vor.u32 8388608, %v3116_v26 }
0x1a48   :  { %6863 = vst [vmem:[#allocation15_spill] sm:$0xff] %v5678_v28  ;;  %4717 = vcosq.f32 %v2050_v53  ;;  %v6807_v31 = vsub.f32 0.0, %v5685_v33  ;;  %v4053_v52 = vmul.f32 %v5624_v63, %v5678_v28  ;;  %v4054_v6 = vmul.f32 %v5626_v54, %v5685_v33 }
0x1a49   :  { %4719 = vsinq.f32 %v2050_v53  ;;  %v4057_v23 = vmul.f32 %v5626_v54, %v5678_v28  ;;  %v3122_v29 = vshrl.u32 %v3121_v35, 5  ;;  %v3217_v60 = vshrl.u32 %v3216_v40, 23 }
0x1a4a   :  { %v5696_v13 = vadd.f32 %v4054_v6, %v4053_v52  ;;  %v4056_v4 = vmul.f32 %v5624_v63, %v6807_v31  ;;  %v3126_v58 = vshll.u32 %v6822_v5, %v3123_v42  ;;  %v3127_v37 = vshrl.u32 %v6819_v10, %v3124_v44 }
0x1a4b   :  { %v3129_v41 = vshll.u32 %v6819_v10, %v3123_v42  ;;  %v3130_v20 = vshrl.u32 %v6817_v12, %v3124_v44  ;;  %v3132_v26 = vshll.u32 %v6817_v12, %v3123_v42  ;;  %v3133_v53 = vshrl.u32 %v6811_v14, %v3124_v44 }
0x1a4c   :  { %6864 = vst [vmem:[#allocation16_spill] sm:$0xff] %v5696_v13  ;;  %v5707_v47 = vadd.f32 %v4057_v23, %v4056_v4  ;;  %v3128_v40 = vor.u32 %v3127_v37, %v3126_v58  ;;  %v3135_v52 = vshll.u32 %v6811_v14, %v3123_v42  ;;  %v3136_v6 = vshrl.u32 %v6813_v16, %v3124_v44 }
0x1a4d   :  { %v3131_v35 = vor.u32 %v3130_v20, %v3129_v41  ;;  %v3134_v31 = vor.u32 %v3133_v53, %v3132_v26  ;;  %v3138_v23 = vshll.u32 %v6813_v16, %v3123_v42  ;;  %v3139_v4 = vshrl.u32 %v6815_v22, %v3124_v44 }
0x1a4e   :  { %6865 = vst [vmem:[#allocation17_spill] sm:$0xff] %v5707_v47  ;;  %v4284_v24 = vadd.s32 4294967169, %v3217_v60  ;;  %vm2054_vm4 = vweird.f32 %v5077_v1  ;;  %v3137_v45 = vor.u32 %v3136_v6, %v3135_v52  ;;  %vm3141_vm6 = vcmp.lt.s32.totalorder %v3122_v29, 1 }
0x1a4f   :  { %vm3144_vm7 = vcmp.lt.s32.totalorder %v3122_v29, 4  ;;  %v3157_v51 = vshll.u32 %v3117_v50, 8  ;;  %v3125_v58 = vshrl.u32 %v6822_v5, %v3124_v44  ;;  %v3140_v37 = vor.u32 %v3139_v4, %v3138_v23 }
0x1a50   :  { %v3146_v41 = vsel %vm3144_vm7, %v3134_v31, 2102212464  ;;  %v3149_v20 = vsel %vm3141_vm6, %v3128_v40, %v3131_v35  ;;  %vm3142_vm8 = vcmp.lt.s32.totalorder %v3122_v29, 2  ;;  %vm3143_vm9 = vcmp.lt.s32.totalorder %v3122_v29, 3 }
0x1a51   :  { %v3150_v14 = vsel %vm3144_vm7, %v3137_v45, 920167782  ;;  %v3153_v26 = vsel %vm3141_vm6, %v3131_v35, %v3134_v31  ;;  %v3145_v42 = vsel %vm3141_vm6, %v3125_v58, %v3128_v40  ;;  %v3154_v22 = vsel %vm3144_vm7, %v3140_v37, 1326507024 }
0x1a52   :  { %v4718_v53 = vpop.eup %4717  ;;  %v3151_v16 = vsel %vm3143_vm9, %v3134_v31, %v3150_v14  ;;  %v3223_v60 = vadd.s32 1, %v4284_v24  ;;  %v3147_v52 = vsel %vm3143_vm9, %v3131_v35, %v3146_v41  ;;  %v3155_v50 = vsel %vm3143_vm9, %v3137_v45, %v3154_v22 }
0x1a53   :  { %v4720_v12 = vpop.eup %4719  ;;  %v2061_v10 = vxor.u32 2147483648, %v4718_v53  ;;  %v3152_v6 = vsel %vm3142_vm8, %v3149_v20, %v3151_v16  ;;  %v3156_v44 = vsel %vm3142_vm8, %v3153_v26, %v3155_v50  ;;  %vm2781_vm5 = vcmp.lt.s32.totalorder %v5667_v18, 2 }
0x1a54   :  { %v2058_v8 = vxor.u32 2147483648, %v4720_v12  ;;  %v5722_v23 = vmul.u32.u64.low %v3157_v51, %v3152_v6  ;;  %v5723_v4 = vmul.u32.u64.high %v3157_v51, %v3152_v6, %v5722_v23  ;;  %vm3224_vm10 = vcmp.gt.s32.totalorder %v3223_v60, 0 }
0x1a55   :  { %v2062_v5 = vsel %vm2060_vm12, %v2061_v10, %v4720_v12  ;;  %v2787_v14 = vsel %vm2785_vm11, %v2061_v10, %v4720_v12  ;;  %v5730_v24 = vmul.u32.u64.low %v3157_v51, %v3156_v44  ;;  %v5731_v31 = vmul.u32.u64.high %v3157_v51, %v3156_v44, %v5730_v24 }
0x1a56   :  { %v2059_v16 = vsel %vm2057_vm15, %v4718_v53, %v2058_v8  ;;  %v2784_v22 = vsel %vm2782_vm2, %v4718_v53, %v2058_v8  ;;  %v5742_v35 = vsub.f32 %v5657_v19, %v5650_v3  ;;  %v3148_v10 = vsel %vm3142_vm8, %v3145_v42, %v3147_v52 }
0x1a57   :  { %v2063_v45 = vsel %vm2056_vm3, %v2059_v16, %v2062_v5  ;;  %v2788_v40 = vsel %vm2781_vm5, %v2784_v22, %v2787_v14  ;;  %v3167_v8 = vadd.s32 1, %v5723_v4  ;;  %v3225_v18 = vsel %vm3224_vm10, %v3223_v60, 0 }
0x1a58   :  { %6866 = vst [vmem:[#allocation18_spill] sm:$0xff] %v5742_v35  ;;  %v5747_v12 = vsel %vm2054_vm4, nan, %v2063_v45  ;;  %v5751_v58 = vsel %vm2054_vm4, nan, %v2788_v40  ;;  %v5763_v29 = vadd.f32 %v5655_v25, %v5692_v7  ;;  %v6825_v37 = vand.u32 2147483647, %v5661_v9 }
0x1a59   :  { %6867 = vst [vmem:[#allocation19_spill] sm:$0xff] %v5747_v12  ;;  %6868 = vst [vmem:[#allocation20_spill] sm:$0xff] %v5751_v58  ;;  %v6824_v5 = vsub.f32 0.0, %v5751_v58  ;;  %v4073_v11 = vmul.f32 %v5696_v13, %v5747_v12  ;;  %v4074_v3 = vmul.f32 %v5707_v47, %v5751_v58  ;;  %v4077_v19 = vmul.f32 %v5707_v47, %v5747_v12 }
0x1a5a   :  { %6869 = vst [vmem:[#allocation21_spill] sm:$0xff] %v5763_v29  ;;  %v3164_v26 = vmul.u32 %v3157_v51, %v3148_v10  ;;  %vm3166_vm13 = vc.u32 %v5731_v31, %v5722_v23  ;;  %v3227_v42 = vand.u32 31, %v3225_v18  ;;  %v3220_v52 = vand.u32 8388607, %v6825_v37 }
0x1a5b   :  { %v5766_v41 = vadd.f32 %v4074_v3, %v4073_v11  ;;  %v4076_v20 = vmul.f32 %v5696_v13, %v6824_v5  ;;  %v3168_v53 = vsel %vm3166_vm13, %v3167_v8, %v5723_v4  ;;  %v6871_v44 = vmov 683565275  }
0x1a5c   :  { %v3169_v7 = vadd.s32 %v3168_v53, %v3164_v26  ;;  %v3228_v6 = vsub.s32 32, %v3227_v42  ;;  %v3230_v14 = vshll.u32 %v6871_v44, %v3227_v42  ;;  %v6872_v24 = vmov 2475754826  }
0x1a5d   :  { %v5774_v60 = vadd.f32 %v4077_v19, %v4076_v20  ;;  %v4099_v25 = vmul.f32 %v5766_v41, %v5742_v35  ;;  %v3233_v16 = vshll.u32 %v6872_v24, %v3227_v42  ;;  %v6873_v22 = vmov 2131351028  }
0x1a5e   :  { %v3170_v51 = vadd.s32 536870912, %v3169_v7  ;;  %v3231_v4 = vshrl.u32 %v6872_v24, %v3228_v6  ;;  %v3234_v45 = vshrl.u32 %v6873_v22, %v3228_v6  ;;  %v3236_v40 = vshll.u32 %v6873_v22, %v3227_v42 }
0x1a5f   :  { %6870 = vst [vmem:[#allocation22_spill] sm:$0xff] %v5774_v60  ;;  %v4100_v50 = vmul.f32 %v5774_v60, %v5763_v29  ;;  %v6874_v10 = vmov 2102212464   ;;  %v3226_v19 = vshrl.u32 %v3225_v18, 5  ;;  %v6876_v37 = vmov 920167782  }
0x1a60   :  { %v3237_v8 = vshrl.u32 %v6874_v10, %v3228_v6  ;;  %v3171_v3 = vshrl.u32 %v3170_v51, 30  ;;  %v3239_v20 = vshll.u32 %v6874_v10, %v3227_v42  ;;  %v3232_v26 = vor.u32 %v3231_v4, %v3230_v14 }
0x1a61   :  { %v5788_v11 = vadd.f32 %v4100_v50, %v4099_v25  ;;  %v3235_v53 = vor.u32 %v3234_v45, %v3233_v16  ;;  %v3240_v29 = vshrl.u32 %v6876_v37, %v3228_v6  ;;  %v3242_v12 = vshll.u32 %v6876_v37, %v3227_v42 }
0x1a62   :  { %v3238_v5 = vor.u32 %v3237_v8, %v3236_v40  ;;  %v3172_v35 = vshll.u32 %v3171_v3, 30  ;;  %v6877_v28 = vmov 1326507024   ;;  %vm3844_vm14 = vcmp.lt.f32.partialorder %v5169_v56, 0.0001 }
0x1a63   :  { %6875 = vst [vmem:[#allocation23_spill] sm:$0xff] %v5788_v11  ;;  %v3243_v61 = vshrl.u32 %v6877_v28, %v3228_v6  ;;  %v3221_v49 = vor.u32 8388608, %v3220_v52  ;;  %v3241_v27 = vor.u32 %v3240_v29, %v3239_v20  ;;  %vm3845_vm0 = vcmp.lt.f32.partialorder %v5219_v0, 0.0001 }
0x1a64   :  { %v3173_v25 = vsub.s32 %v3169_v7, %v3172_v35  ;;  %vm3245_vm12 = vcmp.lt.s32.totalorder %v3226_v19, 1  ;;  %vm3248_vm11 = vcmp.lt.s32.totalorder %v3226_v19, 4  ;;  %vm3247_vm15 = vcmp.lt.s32.totalorder %v3226_v19, 3 }
0x1a65   :  { %v3244_v18 = vor.u32 %v3243_v61, %v3242_v12  ;;  %v3250_v50 = vsel %vm3248_vm11, %v3238_v5, 2102212464  ;;  %v3253_v51 = vsel %vm3245_vm12, %v3232_v26, %v3235_v53  ;;  %v3254_v14 = vsel %vm3248_vm11, %v3241_v27, 920167782 }
0x1a66   :  { %v3175_v16 = vsub.s32 0, %v3173_v25  ;;  %v3229_v4 = vshrl.u32 %v6871_v44, %v3228_v6  ;;  %vm3246_vm2 = vcmp.lt.s32.totalorder %v3226_v19, 2  ;;  %v3255_v42 = vsel %vm3247_vm15, %v3238_v5, %v3254_v14 }
0x1a67   :  { %v3256_v45 = vsel %vm3246_vm2, %v3253_v51, %v3255_v42  ;;  %v3257_v40 = vsel %vm3245_vm12, %v3235_v53, %v3238_v5  ;;  %v3258_v8 = vsel %vm3248_vm11, %v3244_v18, 1326507024  ;;  %v3261_v52 = vshll.u32 %v3221_v49, 8 }
0x1a68   :  { %v4281_v29 = vmin.u32 %v3175_v16, %v3173_v25  ;;  %v3249_v20 = vsel %vm3245_vm12, %v3229_v4, %v3232_v26  ;;  %v3251_v11 = vsel %vm3247_vm15, %v3235_v53, %v3250_v50  ;;  %v3259_v35 = vsel %vm3247_vm15, %v3241_v27, %v3258_v8 }
0x1a69   :  { %v3260_v61 = vsel %vm3246_vm2, %v3257_v40, %v3259_v35  ;;  %v5797_v12 = vmul.u32.u64.low %v3261_v52, %v3256_v45  ;;  %v5798_v7 = vmul.u32.u64.high %v3261_v52, %v3256_v45, %v5797_v12  ;;  %v5802_v47 = vmul.f32 0.5, %v5060_v57 }
0x1a6a   :  { %v3177_v13 = vclz %v4281_v29  ;;  %v3851_v6 = vsel %vm3844_vm14, 1.0, %v5032_v36  ;;  %v3252_v5 = vsel %vm3246_vm2, %v3249_v20, %v3251_v11  ;;  %v3852_v27 = vsel %vm3845_vm0, 1.0, %v5044_v39 }
0x1a6b   :  { %v5807_v19 = vmul.u32.u64.low %v3261_v52, %v3260_v61  ;;  %v5808_v49 = vmul.u32.u64.high %v3261_v52, %v3260_v61, %v5807_v19  ;;  %v3195_v53 = vsub.s32 4, %v3171_v3  ;;  %v3858_v18 = vmul.f32 %v5032_v36, %v5032_v36 }
0x1a6c   :  { %v4282_v26 = vadd.s32 4294967294, %v3177_v13  ;;  %vm3111_vm3 = vcmp.lt.s32.totalorder %v5630_v17, 0  ;;  %4721 = vrcp.f32 %v3851_v6  ;;  %v3271_v50 = vadd.s32 1, %v5798_v7 }
0x1a6d   :  { %v3320_v51 = vand.u32 2139095040, %v5802_v47  ;;  %v3165_v11 = vadd.s32 %v5722_v23, %v5731_v31  ;;  %v3268_v14 = vmul.u32 %v3261_v52, %v3252_v5  ;;  %4723 = vrcp.f32 %v3852_v27 }
0x1a6e   :  { %vm4283_vm4 = vcmp.lt.s32.totalorder %v4282_v26, 0  ;;  %vm3270_vm6 = vc.u32 %v5808_v49, %v5797_v12  ;;  %v6838_v13 = vand.u32 2147483647, %v5802_v47  ;;  %v3196_v45 = vsel %vm3111_vm3, %v3195_v53, %v3171_v3 }
0x1a6f   :  { %v3180_v16 = vsel %vm4283_vm4, 0, %v4282_v26  ;;  %v3321_v36 = vshrl.u32 %v3320_v51, 23  ;;  %v3272_v40 = vsel %vm3270_vm6, %v3271_v50, %v5798_v7  ;;  %v5827_v8 = vand.u32 3, %v5314_v15 }
0x1a70   :  { %v3181_v4 = vsub.s32 32, %v3180_v16  ;;  %v3185_v42 = vsub.s32 4294967266, %v3180_v16  ;;  %v3273_v23 = vadd.s32 %v3272_v40, %v3268_v14  ;;  %v3859_v31 = vmul.f32 %v5044_v39, %v5044_v39 }
0x1a71   :  { %v4288_v52 = vadd.s32 4294967169, %v3321_v36  ;;  %v6878_v29 = vand.u32 2147483647, %v5630_v17  ;;  %v3182_v35 = vshll.u32 %v3173_v25, %v3180_v16  ;;  %v3324_v15 = vand.u32 8388607, %v6838_v13 }
0x1a72   :  { %v3183_v61 = vshrl.u32 %v3165_v11, %v3181_v4  ;;  %v3186_v6 = vadd.s32 127, %v3185_v42  ;;  %v3274_v7 = vadd.s32 536870912, %v3273_v23  ;;  %v5841_v27 = vmul.f32 0.16666667, %v3858_v18 }
0x1a73   :  { %vm5833_vm7 = vcmp.le.f32.partialorder %v6878_v29, 0.7853982  ;;  %v3327_v5 = vadd.s32 1, %v4288_v52  ;;  %v5845_v53 = vmul.f32 0.16666667, %v3859_v31  ;;  %vm2163_vm9 = vcmp.eq.s32.totalorder %v5827_v8, 2 }
0x1a74   :  { %v3198_v3 = vsel %vm5833_vm7, 0, %v3196_v45  ;;  %v3184_v19 = vor.u32 %v3183_v61, %v3182_v35  ;;  %v3187_v39 = vshll.u32 %v3186_v6, 23  ;;  %v5843_v26 = vshrl.u32 %v3274_v7, 30 }
0x1a75   :  { %vm3328_vm8 = vcmp.gt.s32.totalorder %v3327_v5, 0  ;;  %v3202_v50 = vadd.s32 3, %v3198_v3  ;;  %v3325_v16 = vor.u32 8388608, %v3324_v15  ;;  %v6881_v18 = vxor.u32 2147483648, %v5332_v59 }
0x1a76   :  { %v3188_v25 = vor.u32 4788187, %v3187_v39  ;;  %v3329_v51 = vsel %vm3328_vm8, %v3327_v5, 0  ;;  %v5847_v11 = vpop.eup %4721  ;;  %v3276_v14 = vshll.u32 %v5843_v26, 30  ;;  %v3191_v40 = vcvt.s32.f32 %v3184_v19 }
0x1a77   :  { %v3331_v36 = vand.u32 31, %v3329_v51  ;;  %v5851_v4 = vpop.eup %4723  ;;  %v5856_v42 = vsel %vm2163_vm9, %v6881_v18, %v5397_v43  ;;  %v5861_v52 = vmul.f32 %v5847_v11, %v5555_v48  ;;  %v5866_v3 = vand.u32 3, %v3202_v50 }
0x1a78   :  { %v3189_v45 = vand.u32 2147483647, %v3188_v25  ;;  %v5863_v29 = vsub.s32 %v3273_v23, %v3276_v14  ;;  %v3269_v7 = vadd.s32 %v5797_v12, %v5808_v49  ;;  %v5872_v15 = vmul.f32 %v5851_v4, %v5572_v30 }
0x1a79   :  { %v3332_v61 = vsub.s32 32, %v3331_v36  ;;  %v5876_v39 = vshll.u32 %v3325_v16, 8  ;;  %v5879_v23 = vmul.f32 0.5, %v5077_v1  ;;  %v3334_v50 = vshll.u32 %v6871_v44, %v3331_v36 }
0x1a7a   :  { %v3192_v6 = vmul.f32 %v3191_v40, %v3189_v45  ;;  %v3279_v5 = vsub.s32 0, %v5863_v29  ;;  %v3337_v18 = vshll.u32 %v6872_v24, %v3331_v36  ;;  %v3340_v45 = vshll.u32 %v6873_v22, %v3331_v36 }
0x1a7b   :  { %v3335_v19 = vshrl.u32 %v6872_v24, %v3332_v61  ;;  %v3338_v14 = vshrl.u32 %v6873_v22, %v3332_v61  ;;  %v3341_v12 = vshrl.u32 %v6874_v10, %v3332_v61  ;;  %v3344_v40 = vshrl.u32 %v6876_v37, %v3332_v61 }
0x1a7c   :  { %v3193_v25 = vxor.u32 2147483648, %v3192_v6  ;;  %v4285_v49 = vmin.u32 %v3279_v5, %v5863_v29  ;;  %v3330_v13 = vshrl.u32 %v3329_v51, 5  ;;  %v3343_v31 = vshll.u32 %v6874_v10, %v3331_v36 }
0x1a7d   :  { %v3336_v35 = vor.u32 %v3335_v19, %v3334_v50  ;;  %v3339_v62 = vor.u32 %v3338_v14, %v3337_v18  ;;  %v3342_v5 = vor.u32 %v3341_v12, %v3340_v45  ;;  %v3346_v54 = vshll.u32 %v6876_v37, %v3331_v36 }
0x1a7e   :  { %v3194_v16 = vsel %vm3111_vm3, %v3193_v25, %v3192_v6  ;;  %v3281_v48 = vclz %v4285_v49  ;;  %v3345_v58 = vor.u32 %v3344_v40, %v3343_v31  ;;  %v3347_v63 = vshrl.u32 %v6877_v28, %v3332_v61 }
0x1a7f   :  { %v3197_v30 = vsel %vm5833_vm7, %v5630_v17, %v3194_v16  ;;  %v3333_v51 = vshrl.u32 %v6871_v44, %v3332_v61  ;;  %v3424_v6 = vand.u32 2139095040, %v5879_v23  ;;  %vm3215_vm5 = vcmp.lt.s32.totalorder %v5661_v9, 0 }
0x1a80   :  { %4725 = vcosq.f32 %v3197_v30  ;;  %v4286_v60 = vadd.s32 4294967294, %v3281_v48  ;;  %v3348_v19 = vor.u32 %v3347_v63, %v3346_v54  ;;  %vm3349_vm10 = vcmp.lt.s32.totalorder %v3330_v13, 1 }
0x1a81   :  { %4727 = vsinq.f32 %v3197_v30  ;;  %vm3351_vm13 = vcmp.lt.s32.totalorder %v3330_v13, 3  ;;  %vm3352_vm12 = vcmp.lt.s32.totalorder %v3330_v13, 4  ;;  %v3357_v31 = vsel %vm3349_vm10, %v3336_v35, %v3339_v62 }
0x1a82   :  { %vm4287_vm11 = vcmp.lt.s32.totalorder %v4286_v60, 0  ;;  %v3354_v20 = vsel %vm3352_vm12, %v3342_v5, 2102212464  ;;  %v3358_v36 = vsel %vm3352_vm12, %v3345_v58, 920167782  ;;  %vm3350_vm15 = vcmp.lt.s32.totalorder %v3330_v13, 2 }
0x1a83   :  { %v3284_v25 = vsel %vm4287_vm11, 0, %v4286_v60  ;;  %v3353_v30 = vsel %vm3349_vm10, %v3333_v51, %v3336_v35  ;;  %v3359_v48 = vsel %vm3351_vm13, %v3342_v5, %v3358_v36  ;;  %v6882_v61 = vand.u32 2147483647, %v5661_v9 }
0x1a84   :  { %v3285_v63 = vsub.s32 32, %v3284_v25  ;;  %v3289_v54 = vsub.s32 4294967266, %v3284_v25  ;;  %v3355_v14 = vsel %vm3351_vm13, %v3339_v62, %v3354_v20  ;;  %v3361_v12 = vsel %vm3349_vm10, %v3339_v62, %v3342_v5 }
0x1a85   :  { %vm5904_vm2 = vcmp.le.f32.partialorder %v6882_v61, 0.7853982  ;;  %v3286_v49 = vshll.u32 %v5863_v29, %v3284_v25  ;;  %v3299_v18 = vsub.s32 4, %v5843_v26  ;;  %v3360_v60 = vsel %vm3350_vm15, %v3357_v31, %v3359_v48 }
0x1a86   :  { %v3362_v35 = vsel %vm3352_vm12, %v3348_v19, 1326507024  ;;  %vm3201_vm3 = vweird.f32 %v5630_v17  ;;  %v3287_v45 = vshrl.u32 %v3269_v7, %v3285_v63  ;;  %v3290_v40 = vadd.s32 127, %v3289_v54 }
0x1a87   :  { %v3363_v16 = vsel %vm3351_vm13, %v3345_v58, %v3362_v35  ;;  %v3425_v51 = vshrl.u32 %v3424_v6, 23  ;;  %v3356_v36 = vsel %vm3350_vm15, %v3353_v30, %v3355_v14  ;;  %vm2160_vm4 = vcmp.eq.s32.totalorder %v5827_v8, 0  ;;  %v3937_v6 = vpop.permute.xlu0 %3936 }
0x1a88   :  { %v3364_v20 = vsel %vm3350_vm15, %v3361_v12, %v3363_v16  ;;  %v5918_v62 = vmul.u32.u64.low %v5876_v39, %v3360_v60  ;;  %v5919_v29 = vmul.u32.u64.high %v5876_v39, %v3360_v60, %v5918_v62  ;;  %v3288_v5 = vor.u32 %v3287_v45, %v3286_v49 }
0x1a89   :  { %v3291_v31 = vshll.u32 %v3290_v40, 23  ;;  %v5923_v19 = vmul.u32.u64.low %v5876_v39, %v3364_v20  ;;  %v5924_v25 = vmul.u32.u64.high %v5876_v39, %v3364_v20, %v5923_v19  ;;  %vm3204_vm6 = vcmp.lt.s32.totalorder %v5866_v3, 2 }
0x1a8a   :  { %v4726_v7 = vpop.eup %4725  ;;  %vm3205_vm7 = vcmp.eq.s32.totalorder %v5866_v3, 0  ;;  %vm3208_vm8 = vcmp.eq.s32.totalorder %v5866_v3, 2  ;;  %v4292_v58 = vadd.s32 4294967169, %v3425_v51  ;;  %v3300_v61 = vsel %vm3215_vm5, %v3299_v18, %v5843_v26 }
0x1a8b   :  { %v4728_v13 = vpop.eup %4727  ;;  %v3209_v30 = vxor.u32 2147483648, %v4726_v7  ;;  %v3292_v48 = vor.u32 4788187, %v3291_v31  ;;  %v3421_v63 = vand.u32 2147483647, %v5879_v23  ;;  %v3372_v14 = vmul.u32 %v5876_v39, %v3356_v36 }
0x1a8c   :  { %v3206_v54 = vxor.u32 2147483648, %v4728_v13  ;;  %v3375_v12 = vadd.s32 1, %v5919_v29  ;;  %v3431_v49 = vadd.s32 1, %v4292_v58  ;;  %v3295_v45 = vcvt.s32.f32 %v3288_v5 }
0x1a8d   :  { %v3210_v60 = vsel %vm3208_vm8, %v3209_v30, %v4728_v13  ;;  %v3293_v35 = vand.u32 2147483647, %v3292_v48  ;;  %vm3374_vm9 = vc.u32 %v5924_v25, %v5918_v62  ;;  %v3302_v16 = vsel %vm5904_vm2, 0, %v3300_v61  ;;  %v3965_v13 = vpop.permute.xlu0 %3964 }
0x1a8e   :  { %v3207_v40 = vsel %vm3205_vm7, %v4726_v7, %v3206_v54  ;;  %v3376_v26 = vsel %vm3374_vm9, %v3375_v12, %v5919_v29  ;;  %vm3432_vm10 = vcmp.gt.s32.totalorder %v3431_v49, 0  ;;  %v6885_v5 = vsub.f32 1.0, %v5841_v27  ;;  %v5951_v7 = vpop.permute.xlu1 %3938 }
0x1a8f   :  { %v3211_v39 = vsel %vm3204_vm6, %v3207_v40, %v3210_v60  ;;  %v3296_v18 = vmul.f32 %v3295_v45, %v3293_v35  ;;  %v3377_v51 = vadd.s32 %v3376_v26, %v3372_v14  ;;  %v3433_v36 = vsel %vm3432_vm10, %v3431_v49, 0 }
0x1a90   :  { %v3212_v20 = vsel %vm3201_vm3, nan, %v3211_v39  ;;  %v3894_v31 = vsel %vm3844_vm14, %v6885_v5, %v5861_v52  ;;  %vm3846_vm13 = vcmp.lt.f32.partialorder %v5325_v38, 0.0001  ;;  %v3435_v19 = vand.u32 31, %v3433_v36 }
0x1a91   :  { %v3901_v29 = vmul.f32 2.0, %v3212_v20  ;;  %v3297_v3 = vxor.u32 2147483648, %v3296_v18  ;;  %v3306_v58 = vadd.s32 3, %v3302_v16  ;;  %v3378_v30 = vadd.s32 536870912, %v3377_v51 }
0x1a92   :  { %v6886_v48 = vxor.u32 2147483648, %v5397_v43  ;;  %v3957_v27 = vmul.f32 %v3937_v6, %v3894_v31  ;;  %v3428_v52 = vand.u32 8388607, %v3421_v63  ;;  %v3436_v54 = vsub.s32 32, %v3435_v19 }
0x1a93   :  { %v3908_v14 = vmul.f32 %v3901_v29, %v3212_v20  ;;  %v3298_v12 = vsel %vm3215_vm5, %v3297_v3, %v3296_v18  ;;  %v6887_v49 = vsub.f32 1.0, %v5845_v53  ;;  %v5971_v60 = vshrl.u32 %v3378_v30, 30 }
0x1a94   :  { %v5958_v61 = vsel %vm2160_vm4, %v5332_v59, %v6886_v48  ;;  %v3301_v59 = vsel %vm5904_vm2, %v5661_v9, %v3298_v12  ;;  %v4006_v45 = vmul.f32 %v3965_v13, %v3894_v31  ;;  %v5983_v40 = vsel %vm3846_vm13, 1.0, %v5060_v57 }
0x1a95   :  { %v5969_v43 = vsel %vm3845_vm0, %v6887_v49, %v5872_v15  ;;  %v3915_v53 = vmul.f32 %v5847_v11, %v3908_v14  ;;  %4729 = vcosq.f32 %v3301_v59  ;;  %v5986_v15 = vand.u32 3, %v3306_v58 }
0x1a96   :  { %v5978_v35 = vmul.f32 %v5951_v7, %v5969_v43  ;;  %v3380_v16 = vshll.u32 %v5971_v60, 30  ;;  %4731 = vsinq.f32 %v3301_v59  ;;  %v5990_v50 = vadd.s32 %v5918_v62, %v5924_v25 }
0x1a97   :  { %v3429_v26 = vor.u32 8388608, %v3428_v52  ;;  %v3439_v39 = vshrl.u32 %v6872_v24, %v3436_v54  ;;  %v3922_v18 = vsel %vm3844_vm14, %v5630_v17, %v3915_v53  ;;  %v3442_v11 = vshrl.u32 %v6873_v22, %v3436_v54 }
0x1a98   :  { %v5996_v20 = vsub.s32 %v3377_v51, %v3380_v16  ;;  %v3448_v5 = vshrl.u32 %v6876_v37, %v3436_v54  ;;  %v3999_v31 = vmul.f32 %v3937_v6, %v3922_v18  ;;  %v3985_v29 = vmul.f32 %v3965_v13, %v3922_v18 }
0x1a99   :  { %v3438_v3 = vshll.u32 %v6871_v44, %v3435_v19  ;;  %v3445_v62 = vshrl.u32 %v6874_v10, %v3436_v54  ;;  %vm3312_vm5 = vcmp.eq.s32.totalorder %v5986_v15, 2  ;;  %v6004_v58 = vshrl.u32 %v3433_v36, 5 }
0x1a9a   :  { %v3383_v25 = vsub.s32 0, %v5996_v20  ;;  %v3441_v56 = vshll.u32 %v6872_v24, %v3435_v19  ;;  %v3447_v17 = vshll.u32 %v6874_v10, %v3435_v19  ;;  %vm3309_vm14 = vcmp.eq.s32.totalorder %v5986_v15, 0 }
0x1a9b   :  { %v6009_v51 = vadd.f32 %v4006_v45, %v3999_v31  ;;  %v3440_v6 = vor.u32 %v3439_v39, %v3438_v3  ;;  %v3444_v13 = vshll.u32 %v6873_v22, %v3435_v19  ;;  %v3451_v30 = vshrl.u32 %v6877_v28, %v3436_v54 }
0x1a9c   :  { %vm3308_vm12 = vcmp.lt.s32.totalorder %v5986_v15, 2  ;;  %v4289_v48 = vmin.u32 %v3383_v25, %v5996_v20  ;;  %v3443_v52 = vor.u32 %v3442_v11, %v3441_v56  ;;  %v3449_v36 = vor.u32 %v3448_v5, %v3447_v17 }
0x1a9d   :  { %v3450_v14 = vshll.u32 %v6876_v37, %v3435_v19  ;;  %vm3305_vm11 = vweird.f32 %v5661_v9  ;;  %v6017_v12 = vsub.f32 %v3957_v27, %v3985_v29  ;;  %v4024_v49 = vmul.f32 0.0, %v6009_v51 }
0x1a9e   :  { %v3446_v59 = vor.u32 %v3445_v62, %v3444_v13  ;;  %v6020_v45 = vshll.u32 %v3429_v26, 8  ;;  %v3385_v53 = vclz %v4289_v48  ;;  %v3403_v16 = vsub.s32 4, %v5971_v60 }
0x1a9f   :  { %v3437_v39 = vshrl.u32 %v6871_v44, %v3436_v54  ;;  %v3452_v18 = vor.u32 %v3451_v30, %v3450_v14  ;;  %v6025_v11 = vadd.f32 %v4024_v49, %v6017_v12  ;;  %vm3453_vm15 = vcmp.lt.s32.totalorder %v6004_v58, 1  ;;  %v4730_v19 = vpop.eup %4729 }
0x1aa0   :  { %vm3454_vm2 = vcmp.lt.s32.totalorder %v6004_v58, 2  ;;  %vm3456_vm3 = vcmp.lt.s32.totalorder %v6004_v58, 4  ;;  %v4290_v27 = vadd.s32 4294967294, %v3385_v53  ;;  %vm3455_vm4 = vcmp.lt.s32.totalorder %v6004_v58, 3  ;;  %v4732_v31 = vpop.eup %4731 }
0x1aa1   :  { %v3461_v26 = vsel %vm3453_vm15, %v3440_v6, %v3443_v52  ;;  %v3462_v5 = vsel %vm3456_vm3, %v3449_v36, 920167782  ;;  %v3313_v54 = vxor.u32 2147483648, %v4730_v19  ;;  %v3458_v29 = vsel %vm3456_vm3, %v3446_v59, 2102212464 }
0x1aa2   :  { %v3463_v3 = vsel %vm3455_vm4, %v3446_v59, %v3462_v5  ;;  %v3465_v62 = vsel %vm3453_vm15, %v3443_v52, %v3446_v59  ;;  %v3310_v25 = vxor.u32 2147483648, %v4732_v31  ;;  %vm4291_vm6 = vcmp.lt.s32.totalorder %v4290_v27, 0 }
0x1aa3   :  { %v3464_v56 = vsel %vm3454_vm2, %v3461_v26, %v3463_v3  ;;  %v3466_v17 = vsel %vm3456_vm3, %v3452_v18, 1326507024  ;;  %v3314_v13 = vsel %vm3312_vm5, %v3313_v54, %v4732_v31  ;;  %v3388_v30 = vsel %vm4291_vm6, 0, %v4290_v27  ;;  %v3967_v54 = vpop.permute.xlu1 %3966 }
0x1aa4   :  { %v3457_v48 = vsel %vm3453_vm15, %v3437_v39, %v3440_v6  ;;  %v3467_v14 = vsel %vm3455_vm4, %v3449_v36, %v3466_v17  ;;  %v3311_v49 = vsel %vm3309_vm14, %v4730_v19, %v3310_v25  ;;  %v3389_v59 = vsub.s32 32, %v3388_v30 }
0x1aa5   :  { %v3393_v53 = vsub.s32 4294967266, %v3388_v30  ;;  %v3459_v5 = vsel %vm3455_vm4, %v3443_v52, %v3458_v29  ;;  %v3315_v18 = vsel %vm3308_vm12, %v3311_v49, %v3314_v13  ;;  %v3468_v27 = vsel %vm3454_vm2, %v3465_v62, %v3467_v14 }
0x1aa6   :  { %v6054_v26 = vmul.u32.u64.low %v6020_v45, %v3464_v56  ;;  %v6055_v6 = vmul.u32.u64.high %v6020_v45, %v3464_v56, %v6054_v26  ;;  %v3316_v36 = vsel %vm3305_vm11, nan, %v3315_v18  ;;  %v3390_v39 = vshll.u32 %v5996_v20, %v3388_v30 }
0x1aa7   :  { %v3391_v19 = vshrl.u32 %v5990_v50, %v3389_v59  ;;  %v3394_v31 = vadd.s32 127, %v3393_v53  ;;  %v3902_v52 = vmul.f32 2.0, %v3316_v36  ;;  %vm3319_vm7 = vcmp.lt.s32.totalorder %v5802_v47, 0 }
0x1aa8   :  { %v6064_v15 = vmul.u32.u64.low %v6020_v45, %v3468_v27  ;;  %v6065_v29 = vmul.u32.u64.high %v6020_v45, %v3468_v27, %v6064_v15  ;;  %v3860_v25 = vmul.f32 %v5060_v57, %v5060_v57  ;;  %v3460_v56 = vsel %vm3454_vm2, %v3457_v48, %v3459_v5 }
0x1aa9   :  { %v3392_v3 = vor.u32 %v3391_v19, %v3390_v39  ;;  %v3395_v62 = vshll.u32 %v3394_v31, 23  ;;  %v3909_v20 = vmul.f32 %v3902_v52, %v3316_v36  ;;  %4733 = vrcp.f32 %v5983_v40 }
0x1aaa   :  { %v3479_v50 = vadd.s32 1, %v6055_v6  ;;  %v2171_v17 = vand.u32 2139095040, %v5081_v2  ;;  %v4007_v13 = vmul.f32 %v3967_v54, %v5969_v43  ;;  %v6888_v30 = vand.u32 2147483647, %v5802_v47 }
0x1aab   :  { %v3396_v49 = vor.u32 4788187, %v3395_v62  ;;  %v3404_v57 = vsel %vm3319_vm7, %v3403_v16, %v5971_v60  ;;  %v3916_v58 = vmul.f32 %v5851_v4, %v3909_v20  ;;  %v3476_v40 = vmul.u32 %v6020_v45, %v3460_v56 }
0x1aac   :  { %vm6077_vm8 = vcmp.le.f32.partialorder %v6888_v30, 0.7853982  ;;  %vm3478_vm9 = vc.u32 %v6065_v29, %v6054_v26  ;;  %v2172_v48 = vshrl.u32 %v2171_v17, 23  ;;  %v3399_v59 = vcvt.s32.f32 %v3392_v3 }
0x1aad   :  { %v3397_v43 = vand.u32 2147483647, %v3396_v49  ;;  %v3868_v53 = vmul.f32 0.16666667, %v3860_v25  ;;  %v3480_v5 = vsel %vm3478_vm9, %v3479_v50, %v6055_v6  ;;  %v3923_v18 = vsel %vm3845_vm0, %v5661_v9, %v3916_v58  ;;  %v6131_v49 = vpop.permute.xlu1 %3968 }
0x1aae   :  { %v3406_v60 = vsel %vm6077_vm8, 0, %v3404_v57  ;;  %v3481_v16 = vadd.s32 %v3480_v5, %v3476_v40  ;;  %v4244_v4 = vadd.s32 4294967169, %v2172_v48  ;;  %v4000_v45 = vmul.f32 %v5951_v7, %v3923_v18 }
0x1aaf   :  { %v3986_v27 = vmul.f32 %v3967_v54, %v3923_v18  ;;  %v3400_v36 = vmul.f32 %v3399_v59, %v3397_v43  ;;  %v6096_v39 = vand.u32 2147483647, %v5081_v2  ;;  %vm2159_vm10 = vcmp.lt.s32.totalorder %v5827_v8, 2 }
0x1ab0   :  { %v3482_v19 = vadd.s32 536870912, %v3481_v16  ;;  %v2178_v31 = vadd.s32 1, %v4244_v4  ;;  %v6102_v0 = vadd.f32 %v4007_v13, %v4000_v45  ;;  %v2166_v52 = vsel %vm2159_vm10, %v5958_v61, %v5856_v42 }
0x1ab1   :  { %v6100_v6 = vsub.f32 %v5978_v35, %v3986_v27  ;;  %v3401_v9 = vxor.u32 2147483648, %v3400_v36  ;;  %v3410_v15 = vadd.s32 3, %v3406_v60  ;;  %v3875_v7 = vsub.f32 1.0, %v3868_v53 }
0x1ab2   :  { %v3483_v54 = vshrl.u32 %v3482_v19, 30  ;;  %v4040_v62 = vmul.f32 %v5602_v21, %v6102_v0  ;;  %v2175_v8 = vand.u32 8388607, %v6096_v39  ;;  %vm2179_vm0 = vcmp.gt.s32.totalorder %v2178_v31, 0 }
0x1ab3   :  { %v4039_v3 = vmul.f32 %v5590_v55, %v6100_v6  ;;  %v6111_v35 = vpop.eup %4733  ;;  %v3402_v25 = vsel %vm3319_vm7, %v3401_v9, %v3400_v36  ;;  %v6116_v42 = vmul.f32 0.5, %v5081_v2  ;;  %vm3847_vm5 = vcmp.lt.f32.partialorder %v5362_v32, 0.0001 }
0x1ab4   :  { %v3484_v56 = vshll.u32 %v3483_v54, 30  ;;  %v3507_v20 = vsub.s32 4, %v3483_v54  ;;  %v3405_v55 = vsel %vm6077_vm8, %v5802_v47, %v3402_v25  ;;  %v3885_v21 = vmul.f32 %v6111_v35, %v5685_v33 }
0x1ab5   :  { %v4041_v61 = vadd.f32 %v4040_v62, %v4039_v3  ;;  %4735 = vcosq.f32 %v3405_v55  ;;  %v6124_v50 = vand.u32 3, %v3410_v15  ;;  %v2180_v13 = vsel %vm2179_vm0, %v2178_v31, 0 }
0x1ab6   :  { %v6126_v17 = vsub.s32 %v3481_v16, %v3484_v56  ;;  %4737 = vsinq.f32 %v3405_v55  ;;  %vm3423_vm14 = vcmp.lt.s32.totalorder %v5879_v23, 0  ;;  %v2176_v14 = vor.u32 8388608, %v2175_v8 }
0x1ab7   :  { %v6129_v30 = vadd.f32 %v4041_v61, %v6025_v11  ;;  %v6136_v57 = vsel %vm2157_vm1, nan, %v2166_v52  ;;  %v6141_v40 = vsel %vm3423_vm14, %v3507_v20, %v3483_v54  ;;  %v3632_v48 = vand.u32 2139095040, %v6116_v42 }
0x1ab8   :  { %v3487_v58 = vsub.s32 0, %v6126_v17  ;;  %v6146_v11 = vsel %vm3846_vm13, %v3875_v7, %v3885_v21  ;;  %vm6150_vm12 = vcmp.le.f32.partialorder %v3421_v63, 0.7853982  ;;  %v6156_v34 = vmul.f32 %v5077_v1, %v5077_v1 }
0x1ab9   :  { %v2182_v59 = vand.u32 31, %v2180_v13  ;;  %vm3416_vm1 = vcmp.eq.s32.totalorder %v6124_v50, 2  ;;  %v6161_v53 = vmul.f32 %v6131_v49, %v6146_v11  ;;  %v6167_v63 = vsel %vm3847_vm5, 1.0, %v5077_v1 }
0x1aba   :  { %v4293_v5 = vmin.u32 %v3487_v58, %v6126_v17  ;;  %vm3413_vm11 = vcmp.eq.s32.totalorder %v6124_v50, 0  ;;  %v3477_v18 = vadd.s32 %v6054_v26, %v6065_v29  ;;  %v3510_v60 = vsel %vm6150_vm12, 0, %v6141_v40 }
0x1abb   :  { %v2183_v16 = vsub.s32 32, %v2182_v59  ;;  %v6175_v4 = vshll.u32 %v2176_v14, 8  ;;  %vm3412_vm15 = vcmp.lt.s32.totalorder %v6124_v50, 2  ;;  %v6178_v27 = vshrl.u32 %v2180_v13, 5 }
0x1abc   :  { %v3489_v45 = vclz %v4293_v5  ;;  %v2185_v1 = vshll.u32 %v6871_v44, %v2182_v59  ;;  %v3633_v36 = vshrl.u32 %v3632_v48, 23  ;;  %vm3409_vm2 = vweird.f32 %v5802_v47 }
0x1abd   :  { %v2186_v19 = vshrl.u32 %v6872_v24, %v2183_v16  ;;  %v2188_v26 = vshll.u32 %v6872_v24, %v2182_v59  ;;  %v2189_v29 = vshrl.u32 %v6873_v22, %v2183_v16  ;;  %v2192_v31 = vshrl.u32 %v6874_v10, %v2183_v16 }
0x1abe   :  { %v4294_v9 = vadd.s32 4294967294, %v3489_v45  ;;  %v2191_v52 = vshll.u32 %v6873_v22, %v2182_v59  ;;  %v2194_v15 = vshll.u32 %v6874_v10, %v2182_v59  ;;  %v2195_v7 = vshrl.u32 %v6876_v37, %v2183_v16 }
0x1abf   :  { %v2184_v54 = vshrl.u32 %v6871_v44, %v2183_v16  ;;  %v2187_v3 = vor.u32 %v2186_v19, %v2185_v1  ;;  %v2197_v62 = vshll.u32 %v6876_v37, %v2182_v59  ;;  %v2198_v8 = vshrl.u32 %v6877_v28, %v2183_v16  ;;  %v4736_v25 = vpop.eup %4735 }
0x1ac0   :  { %vm4295_vm3 = vcmp.lt.s32.totalorder %v4294_v9, 0  ;;  %v2190_v56 = vor.u32 %v2189_v29, %v2188_v26  ;;  %v2193_v20 = vor.u32 %v2192_v31, %v2191_v52  ;;  %v2196_v61 = vor.u32 %v2195_v7, %v2194_v15  ;;  %v4738_v55 = vpop.eup %4737 }
0x1ac1   :  { %v3417_v21 = vxor.u32 2147483648, %v4736_v25  ;;  %v3492_v13 = vsel %vm4295_vm3, 0, %v4294_v9  ;;  %vm2200_vm4 = vcmp.lt.s32.totalorder %v6178_v27, 1  ;;  %vm2201_vm6 = vcmp.lt.s32.totalorder %v6178_v27, 2 }
0x1ac2   :  { %v3414_v14 = vxor.u32 2147483648, %v4738_v55  ;;  %v3493_v58 = vsub.s32 32, %v3492_v13  ;;  %v3497_v48 = vsub.s32 4294967266, %v3492_v13  ;;  %v2199_v5 = vor.u32 %v2198_v8, %v2197_v62  ;;  %v3941_v8 = vpop.permute.xlu0 %3940 }
0x1ac3   :  { %v3418_v59 = vsel %vm3416_vm1, %v3417_v21, %v4738_v55  ;;  %v3494_v16 = vshll.u32 %v6126_v17, %v3492_v13  ;;  %vm2202_vm7 = vcmp.lt.s32.totalorder %v6178_v27, 3  ;;  %vm2203_vm8 = vcmp.lt.s32.totalorder %v6178_v27, 4 }
0x1ac4   :  { %v3415_v45 = vsel %vm3413_vm11, %v4736_v25, %v3414_v14  ;;  %v3495_v1 = vshrl.u32 %v3477_v18, %v3493_v58  ;;  %v3498_v19 = vadd.s32 127, %v3497_v48  ;;  %v2205_v26 = vsel %vm2203_vm8, %v2193_v20, 2102212464 }
0x1ac5   :  { %v3419_v29 = vsel %vm3412_vm15, %v3415_v45, %v3418_v59  ;;  %v2204_v31 = vsel %vm2200_vm4, %v2184_v54, %v2187_v3  ;;  %v2208_v17 = vsel %vm2200_vm4, %v2187_v3, %v2190_v56  ;;  %v2209_v9 = vsel %vm2203_vm8, %v2196_v61, 920167782 }
0x1ac6   :  { %v3420_v52 = vsel %vm3409_vm2, nan, %v3419_v29  ;;  %v3496_v18 = vor.u32 %v3495_v1, %v3494_v16  ;;  %v3499_v15 = vshll.u32 %v3498_v19, 23  ;;  %v2212_v7 = vsel %vm2200_vm4, %v2190_v56, %v2193_v20 }
0x1ac7   :  { %v3903_v62 = vmul.f32 2.0, %v3420_v52  ;;  %v2206_v50 = vsel %vm2202_vm7, %v2190_v56, %v2205_v26  ;;  %v2210_v54 = vsel %vm2202_vm7, %v2193_v20, %v2209_v9  ;;  %v2213_v3 = vsel %vm2203_vm8, %v2199_v5, 1326507024 }
0x1ac8   :  { %v3500_v25 = vor.u32 4788187, %v3499_v15  ;;  %v3503_v55 = vcvt.s32.f32 %v3496_v18  ;;  %v2211_v21 = vsel %vm2201_vm6, %v2208_v17, %v2210_v54  ;;  %v2214_v13 = vsel %vm2202_vm7, %v2196_v61, %v2213_v3  ;;  %v6894_v54 = vld [vmem:[#allocation13_spill] sm:$0xff]  ;;  %v6895_v3 = vld [vmem:[#allocation14_spill] sm:$0xff] }
0x1ac9   :  { %v3910_v14 = vmul.f32 %v3903_v62, %v3420_v52  ;;  %v2215_v58 = vsel %vm2201_vm6, %v2212_v7, %v2214_v13  ;;  %v6228_v56 = vmul.u32.u64.low %v6175_v4, %v2211_v21  ;;  %v6229_v48 = vmul.u32.u64.high %v6175_v4, %v2211_v21, %v6228_v56 }
0x1aca   :  { %v3501_v20 = vand.u32 2147483647, %v3500_v25  ;;  %v6233_v5 = vmul.u32.u64.low %v6175_v4, %v2215_v58  ;;  %v6234_v59 = vmul.u32.u64.high %v6175_v4, %v2215_v58, %v6233_v5  ;;  %v4300_v16 = vadd.s32 4294967169, %v3633_v36 }
0x1acb   :  { %v3917_v45 = vmul.f32 %v6111_v35, %v3910_v14  ;;  %v3959_v1 = vmul.f32 %v3941_v8, %v6146_v11  ;;  %4739 = vrcp.f32 %v6167_v63  ;;  %v2207_v61 = vsel %vm2201_vm6, %v2204_v31, %v2206_v50  ;;  %v6893_v63 = vld [vmem:[#allocation22_spill] sm:$0xff] }
0x1acc   :  { %v3504_v19 = vmul.f32 %v3503_v55, %v3501_v20  ;;  %v3629_v26 = vand.u32 2147483647, %v6116_v42  ;;  %v3639_v29 = vadd.s32 1, %v4300_v16  ;;  %v4093_v17 = vmul.f32 %v5766_v41, %v6136_v57 }
0x1acd   :  { %v3924_v36 = vsel %vm3846_vm13, %v5802_v47, %v3917_v45  ;;  %v3514_v35 = vadd.s32 3, %v3510_v60  ;;  %v2226_v11 = vadd.s32 1, %v6229_v48  ;;  %v4094_v27 = vmul.f32 %v6893_v63, %v5622_v46  ;;  %v6896_v45 = vld [vmem:[#allocation20_spill] sm:$0xff] }
0x1ace   :  { %v3987_v31 = vmul.f32 %v6131_v49, %v3924_v36  ;;  %v4001_v9 = vmul.f32 %v3941_v8, %v3924_v36  ;;  %v3505_v52 = vxor.u32 2147483648, %v3504_v19  ;;  %v2223_v18 = vmul.u32 %v6175_v4, %v2207_v61 }
0x1acf   :  { %vm2225_vm9 = vc.u32 %v6234_v59, %v6228_v56  ;;  %vm3640_vm13 = vcmp.gt.s32.totalorder %v3639_v29, 0  ;;  %v6851_v38 = vsub.f32 0.0, %v5622_v46  ;;  %v6259_v47 = vadd.f32 %v4094_v27, %v4093_v17 }
0x1ad0   :  { %v6261_v40 = vsub.f32 %v3959_v1, %v3987_v31  ;;  %v6264_v60 = vadd.f32 %v6161_v53, %v4001_v9  ;;  %v3506_v49 = vsel %vm3423_vm14, %v3505_v52, %v3504_v19  ;;  %v2227_v15 = vsel %vm2225_vm9, %v2226_v11, %v6229_v48 }
0x1ad1   :  { %v3509_v4 = vsel %vm6150_vm12, %v5879_v23, %v3506_v49  ;;  %v2228_v7 = vadd.s32 %v2227_v15, %v2223_v18  ;;  %v3641_v62 = vsel %vm3640_vm13, %v3639_v29, 0  ;;  %v6275_v50 = vmul.f32 %v5766_v41, %v6851_v38 }
0x1ad2   :  { %v4059_v53 = vmul.f32 %v6894_v54, %v6261_v40  ;;  %v4060_v8 = vmul.f32 %v6895_v3, %v6264_v60  ;;  %4741 = vcosq.f32 %v3509_v4  ;;  %v6282_v25 = vmul.f32 0.16666667, %v6156_v34 }
0x1ad3   :  { %v2229_v55 = vadd.s32 536870912, %v2228_v7  ;;  %v3643_v43 = vand.u32 31, %v3641_v62  ;;  %4743 = vsinq.f32 %v3509_v4  ;;  %v3636_v13 = vand.u32 8388607, %v3629_v26 }
0x1ad4   :  { %v4061_v21 = vadd.f32 %v4060_v8, %v4059_v53  ;;  %v6288_v41 = vmul.f32 %v6893_v63, %v6136_v57  ;;  %v3515_v58 = vand.u32 3, %v3514_v35  ;;  %v3876_v16 = vsub.f32 1.0, %v6282_v25 }
0x1ad5   :  { %v6290_v14 = vpop.eup %4739  ;;  %v6292_v48 = vshrl.u32 %v2229_v55, 30  ;;  %v3644_v20 = vsub.s32 32, %v3643_v43  ;;  %v3637_v61 = vor.u32 8388608, %v3636_v13  ;;  %vm3513_vm0 = vweird.f32 %v5879_v23 }
0x1ad6   :  { %v6295_v34 = vadd.f32 %v4061_v21, %v6129_v30  ;;  %v6301_v1 = vmul.f32 %v6290_v14, %v6896_v45  ;;  %vm3516_vm10 = vcmp.lt.s32.totalorder %v3515_v58, 2  ;;  %vm3517_vm14 = vcmp.eq.s32.totalorder %v3515_v58, 0 }
0x1ad7   :  { %v2231_v5 = vshll.u32 %v6292_v48, 30  ;;  %v3647_v29 = vshrl.u32 %v6872_v24, %v3644_v20  ;;  %v3650_v17 = vshrl.u32 %v6873_v22, %v3644_v20  ;;  %v3656_v36 = vshrl.u32 %v6876_v37, %v3644_v20 }
0x1ad8   :  { %v6309_v30 = vshrl.u32 %v3641_v62, 5  ;;  %v3653_v35 = vshrl.u32 %v6874_v10, %v3644_v20  ;;  %v3659_v11 = vshrl.u32 %v6877_v28, %v3644_v20  ;;  %v3646_v27 = vshll.u32 %v6871_v44, %v3643_v43 }
0x1ad9   :  { %v6303_v19 = vsub.s32 %v2228_v7, %v2231_v5  ;;  %v3649_v31 = vshll.u32 %v6872_v24, %v3643_v43  ;;  %v3655_v9 = vshll.u32 %v6874_v10, %v3643_v43  ;;  %vm3520_vm12 = vcmp.eq.s32.totalorder %v3515_v58, 2 }
0x1ada   :  { %v3652_v52 = vshll.u32 %v6873_v22, %v3643_v43  ;;  %v3658_v18 = vshll.u32 %v6876_v37, %v3643_v43  ;;  %v6319_v49 = vshll.u32 %v3637_v61, 8  ;;  %v3648_v7 = vor.u32 %v3647_v29, %v3646_v27 }
0x1adb   :  { %v2234_v63 = vsub.s32 0, %v6303_v19  ;;  %v3651_v62 = vor.u32 %v3650_v17, %v3649_v31  ;;  %v3657_v54 = vor.u32 %v3656_v36, %v3655_v9  ;;  %v2224_v8 = vadd.s32 %v6228_v56, %v6234_v59 }
0x1adc   :  { %v4742_v15 = vpop.eup %4741  ;;  %v3654_v55 = vor.u32 %v3653_v35, %v3652_v52  ;;  %v3660_v21 = vor.u32 %v3659_v11, %v3658_v18  ;;  %v3645_v38 = vshrl.u32 %v6871_v44, %v3644_v20  ;;  %vm3661_vm1 = vcmp.lt.s32.totalorder %v6309_v30, 1 }
0x1add   :  { %v4245_v4 = vmin.u32 %v2234_v63, %v6303_v19  ;;  %v4744_v53 = vpop.eup %4743  ;;  %v3521_v3 = vxor.u32 2147483648, %v4742_v15  ;;  %vm3662_vm11 = vcmp.lt.s32.totalorder %v6309_v30, 2  ;;  %vm3663_vm15 = vcmp.lt.s32.totalorder %v6309_v30, 3 }
0x1ade   :  { %v3518_v13 = vxor.u32 2147483648, %v4744_v53  ;;  %vm3664_vm2 = vcmp.lt.s32.totalorder %v6309_v30, 4  ;;  %v3669_v56 = vsel %vm3661_vm1, %v3648_v7, %v3651_v62  ;;  %v3673_v36 = vsel %vm3661_vm1, %v3651_v62, %v3654_v55 }
0x1adf   :  { %v2236_v5 = vclz %v4245_v4  ;;  %v3522_v43 = vsel %vm3520_vm12, %v3521_v3, %v4744_v53  ;;  %v3670_v59 = vsel %vm3664_vm2, %v3657_v54, 920167782  ;;  %v3674_v35 = vsel %vm3664_vm2, %v3660_v21, 1326507024  ;;  %v3971_v3 = vpop.permute.xlu1 %3970 }
0x1ae0   :  { %v3519_v61 = vsel %vm3517_vm14, %v4742_v15, %v3518_v13  ;;  %v3671_v20 = vsel %vm3663_vm15, %v3654_v55, %v3670_v59  ;;  %v3666_v63 = vsel %vm3664_vm2, %v3654_v55, 2102212464  ;;  %v3675_v27 = vsel %vm3663_vm15, %v3657_v54, %v3674_v35  ;;  %v3943_v54 = vpop.permute.xlu0 %3942 }
0x1ae1   :  { %v4246_v29 = vadd.s32 4294967294, %v2236_v5  ;;  %v3523_v17 = vsel %vm3516_vm10, %v3519_v61, %v3522_v43  ;;  %v3672_v58 = vsel %vm3662_vm11, %v3669_v56, %v3671_v20  ;;  %v3676_v52 = vsel %vm3662_vm11, %v3673_v36, %v3675_v27 }
0x1ae2   :  { %v3524_v11 = vsel %vm3513_vm0, nan, %v3523_v17  ;;  %v3665_v4 = vsel %vm3661_vm1, %v3645_v38, %v3648_v7  ;;  %v6350_v53 = vadd.f32 %v6288_v41, %v6275_v50  ;;  %v3667_v21 = vsel %vm3663_vm15, %v3651_v62, %v3666_v63 }
0x1ae3   :  { %vm4247_vm3 = vcmp.lt.s32.totalorder %v4246_v29, 0  ;;  %v3904_v31 = vmul.f32 2.0, %v3524_v11  ;;  %v6355_v13 = vmul.u32.u64.low %v6319_v49, %v3676_v52  ;;  %v6356_v5 = vmul.u32.u64.high %v6319_v49, %v3676_v52, %v6355_v13  ;;  %v6899_v52 = vld [vmem:[#allocation17_spill] sm:$0xff] }
0x1ae4   :  { %v2239_v9 = vsel %vm4247_vm3, 0, %v4246_v29  ;;  %v6359_v29 = vmul.u32.u64.low %v6319_v49, %v3672_v58  ;;  %v6360_v56 = vmul.u32.u64.high %v6319_v49, %v3672_v58, %v6359_v29  ;;  %v3897_v38 = vsel %vm3847_vm5, %v3876_v16, %v6301_v1  ;;  %v6897_v16 = vld [vmem:[#allocation7_spill] sm:$0xff] }
0x1ae5   :  { %v2240_v18 = vsub.s32 32, %v2239_v9  ;;  %v2244_v15 = vsub.s32 4294967266, %v2239_v9  ;;  %v3911_v55 = vmul.f32 %v3904_v31, %v3524_v11  ;;  %v2241_v41 = vshll.u32 %v6303_v19, %v2239_v9  ;;  %v6898_v9 = vld [vmem:[#allocation16_spill] sm:$0xff] }
0x1ae6   :  { %v4009_v7 = vmul.f32 %v3971_v3, %v3897_v38  ;;  %v3960_v62 = vmul.f32 %v3943_v54, %v3897_v38  ;;  %v3668_v20 = vsel %vm3662_vm11, %v3665_v4, %v3667_v21  ;;  %vm3686_vm4 = vc.u32 %v6356_v5, %v6359_v29 }
0x1ae7   :  { %v2242_v43 = vshrl.u32 %v2224_v8, %v2240_v18  ;;  %v2245_v61 = vadd.s32 127, %v2244_v15  ;;  %v3918_v50 = vmul.f32 %v6290_v14, %v3911_v55  ;;  %v3687_v14 = vadd.s32 1, %v6360_v56 }
0x1ae8   :  { %v2274_v1 = vand.u32 2139095040, %v6897_v16  ;;  %v3684_v30 = vmul.u32 %v6319_v49, %v3668_v20  ;;  %v6393_v49 = vand.u32 2147483647, %v6897_v16  ;;  %vm2169_vm6 = vcmp.le.f32.partialorder %v6096_v39, 0.7853982 }
0x1ae9   :  { %v2246_v59 = vshll.u32 %v2245_v61, 23  ;;  %v3925_v8 = vsel %vm3847_vm5, %v5879_v23, %v3918_v50  ;;  %v2243_v17 = vor.u32 %v2242_v43, %v2241_v41  ;;  %v2254_v23 = vsub.s32 4, %v6292_v48 }
0x1aea   :  { %v3988_v36 = vmul.f32 %v3971_v3, %v3925_v8  ;;  %v4002_v25 = vmul.f32 %v3943_v54, %v3925_v8  ;;  %v3688_v27 = vsel %vm3686_vm4, %v3687_v14, %v6360_v56  ;;  %v2275_v31 = vshrl.u32 %v2274_v1, 23 }
0x1aeb   :  { %v2247_v35 = vor.u32 4788187, %v2246_v59  ;;  %v2250_v63 = vcvt.s32.f32 %v2243_v17  ;;  %vm2170_vm5 = vcmp.lt.s32.totalorder %v5081_v2, 0  ;;  %v3689_v4 = vadd.s32 %v3688_v27, %v3684_v30 }
0x1aec   :  { %v6379_v19 = vsub.f32 %v3960_v62, %v3988_v36  ;;  %v6381_v11 = vadd.f32 %v4009_v7, %v4002_v25  ;;  %v4248_v3 = vadd.s32 4294967169, %v2275_v31  ;;  %v2255_v54 = vsel %vm2170_vm5, %v2254_v23, %v6292_v48  ;;  %v6900_v7 = vld [vmem:[#allocation23_spill] sm:$0xff] }
0x1aed   :  { %v2248_v32 = vand.u32 2147483647, %v2247_v35  ;;  %v3690_v13 = vadd.s32 536870912, %v3689_v4  ;;  %v2257_v41 = vsel %vm2169_vm6, 0, %v2255_v54  ;;  %v2278_v8 = vand.u32 8388607, %v6393_v49 }
0x1aee   :  { %v4079_v58 = vmul.f32 %v6898_v9, %v6379_v19  ;;  %v4080_v18 = vmul.f32 %v6899_v52, %v6381_v11  ;;  %v2281_v43 = vadd.s32 1, %v4248_v3  ;;  %v6403_v17 = vmul.f32 0.5, %v6897_v16 }
0x1aef   :  { %v2251_v15 = vmul.f32 %v2250_v63, %v2248_v32  ;;  %v3691_v38 = vshrl.u32 %v3690_v13, 30  ;;  %v6407_v36 = vand.u32 3, %v2257_v41  ;;  %vm3631_vm8 = vcmp.lt.s32.totalorder %v6116_v42, 0 }
0x1af0   :  { %v4081_v55 = vadd.f32 %v4080_v18, %v4079_v58  ;;  %vm2282_vm7 = vcmp.gt.s32.totalorder %v2281_v43, 0  ;;  %v6410_v35 = vadd.s32 3, %v2257_v41  ;;  %v2279_v1 = vor.u32 8388608, %v2278_v8 }
0x1af1   :  { %v2252_v21 = vxor.u32 2147483648, %v2251_v15  ;;  %v2283_v48 = vsel %vm2282_vm7, %v2281_v43, 0  ;;  %v3692_v59 = vshll.u32 %v3691_v38, 30  ;;  %v3736_v32 = vand.u32 2139095040, %v6403_v17 }
0x1af2   :  { %v4082_v61 = vadd.f32 %v4081_v55, %v6295_v34  ;;  %v2285_v34 = vand.u32 31, %v2283_v48  ;;  %v3715_v23 = vsub.s32 4, %v3691_v38  ;;  %vm6419_vm9 = vcmp.le.f32.partialorder %v3629_v26, 0.7853982 }
0x1af3   :  { %v2253_v56 = vsel %vm2170_vm5, %v2252_v21, %v2251_v15  ;;  %v6405_v20 = vsub.s32 %v3689_v4, %v3692_v59  ;;  %v6424_v58 = vshrl.u32 %v2283_v48, 5  ;;  %vm2266_vm13 = vcmp.eq.s32.totalorder %v6407_v36, 2 }
0x1af4   :  { %v2256_v50 = vsel %vm2169_vm6, %v5081_v2, %v2253_v56  ;;  %v6399_v62 = vadd.f32 %v6900_v7, %v4082_v61  ;;  %v2286_v25 = vsub.s32 32, %v2285_v34  ;;  %v2294_v52 = vshll.u32 %v6873_v22, %v2285_v34 }
0x1af5   :  { %4745 = vcosq.f32 %v2256_v50  ;;  %v3695_v14 = vsub.s32 0, %v6405_v20  ;;  %v2288_v15 = vshll.u32 %v6871_v44, %v2285_v34  ;;  %v2291_v4 = vshll.u32 %v6872_v24, %v2285_v34 }
0x1af6   :  { %4747 = vsinq.f32 %v2256_v50  ;;  %v2289_v63 = vshrl.u32 %v6872_v24, %v2286_v25  ;;  %v2292_v30 = vshrl.u32 %v6873_v22, %v2286_v25  ;;  %v2295_v27 = vshrl.u32 %v6874_v10, %v2286_v25 }
0x1af7   :  { %v4301_v9 = vmin.u32 %v3695_v14, %v6405_v20  ;;  %v2298_v18 = vshrl.u32 %v6876_v37, %v2286_v25  ;;  %v2297_v3 = vshll.u32 %v6874_v10, %v2285_v34  ;;  %v2301_v55 = vshrl.u32 %v6877_v28, %v2286_v25 }
0x1af8   :  { %v3685_v26 = vadd.s32 %v6359_v29, %v6356_v5  ;;  %v2296_v21 = vor.u32 %v2295_v27, %v2294_v52  ;;  %vm2263_vm10 = vcmp.eq.s32.totalorder %v6407_v36, 0  ;;  %vm3849_vm0 = vcmp.lt.f32.partialorder %v6096_v39, 0.0001  ;;  %v6907_v39 = vld [vmem:[#allocation10_spill] sm:$0xff] }
0x1af9   :  { %v3697_v54 = vclz %v4301_v9  ;;  %v2290_v13 = vor.u32 %v2289_v63, %v2288_v15  ;;  %v2293_v43 = vor.u32 %v2292_v30, %v2291_v4  ;;  %v2299_v61 = vor.u32 %v2298_v18, %v2297_v3 }
0x1afa   :  { %v2300_v56 = vshll.u32 %v6876_v37, %v2285_v34  ;;  %vm2306_vm14 = vcmp.lt.s32.totalorder %v6424_v58, 4  ;;  %v6441_v7 = vshll.u32 %v2279_v1, 8  ;;  %v3737_v48 = vshrl.u32 %v3736_v32, 23 }
0x1afb   :  { %v4302_v41 = vadd.s32 4294967294, %v3697_v54  ;;  %v3716_v29 = vsel %vm3631_vm8, %v3715_v23, %v3691_v38  ;;  %vm2303_vm12 = vcmp.lt.s32.totalorder %v6424_v58, 1  ;;  %v2312_v8 = vsel %vm2306_vm14, %v2299_v61, 920167782 }
0x1afc   :  { %v2302_v59 = vor.u32 %v2301_v55, %v2300_v56  ;;  %v2287_v34 = vshrl.u32 %v6871_v44, %v2286_v25  ;;  %vm2305_vm11 = vcmp.lt.s32.totalorder %v6424_v58, 3  ;;  %v2308_v14 = vsel %vm2306_vm14, %v2296_v21, 2102212464 }
0x1afd   :  { %vm4303_vm1 = vcmp.lt.s32.totalorder %v4302_v41, 0  ;;  %v2311_v38 = vsel %vm2303_vm12, %v2290_v13, %v2293_v43  ;;  %v2313_v23 = vsel %vm2305_vm11, %v2296_v21, %v2312_v8  ;;  %vm2304_vm15 = vcmp.lt.s32.totalorder %v6424_v58, 2 }
0x1afe   :  { %v3700_v32 = vsel %vm4303_vm1, 0, %v4302_v41  ;;  %v2315_v25 = vsel %vm2303_vm12, %v2293_v43, %v2296_v21  ;;  %vm2260_vm2 = vweird.f32 %v5081_v2  ;;  %v3718_v9 = vsel %vm6419_vm9, 0, %v3716_v29 }
0x1aff   :  { %v6438_v50 = vpop.eup %4745  ;;  %v3701_v30 = vsub.s32 32, %v3700_v32  ;;  %v3705_v27 = vsub.s32 4294967266, %v3700_v32  ;;  %v2307_v52 = vsel %vm2303_vm12, %v2287_v34, %v2290_v13  ;;  %v2316_v18 = vsel %vm2306_vm14, %v2302_v59, 1326507024 }
0x1b00   :  { %v6443_v5 = vpop.eup %4747  ;;  %v2267_v1 = vxor.u32 2147483648, %v6438_v50  ;;  %v2309_v4 = vsel %vm2305_vm11, %v2293_v43, %v2308_v14  ;;  %v2314_v3 = vsel %vm2304_vm15, %v2311_v38, %v2313_v23  ;;  %v2317_v55 = vsel %vm2305_vm11, %v2299_v61, %v2316_v18 }
0x1b01   :  { %v2264_v63 = vxor.u32 2147483648, %v6443_v5  ;;  %v3703_v15 = vshrl.u32 %v3685_v26, %v3701_v30  ;;  %v3702_v21 = vshll.u32 %v6405_v20, %v3700_v32  ;;  %v3706_v13 = vadd.s32 127, %v3705_v27 }
0x1b02   :  { %v2268_v54 = vsel %vm2266_vm13, %v2267_v1, %v6443_v5  ;;  %v2318_v56 = vsel %vm2304_vm15, %v2315_v25, %v2317_v55  ;;  %v4304_v29 = vadd.s32 4294967169, %v3737_v48  ;;  %vm2262_vm3 = vcmp.lt.s32.totalorder %v6407_v36, 2 }
0x1b03   :  { %v2265_v26 = vsel %vm2263_vm10, %v6438_v50, %v2264_v63  ;;  %v6486_v43 = vmul.u32.u64.low %v6441_v7, %v2318_v56  ;;  %v6487_v41 = vmul.u32.u64.high %v6441_v7, %v2318_v56, %v6486_v43  ;;  %v3704_v61 = vor.u32 %v3703_v15, %v3702_v21 }
0x1b04   :  { %v3707_v59 = vshll.u32 %v3706_v13, 23  ;;  %v6490_v8 = vmul.u32.u64.low %v6441_v7, %v2314_v3  ;;  %v6491_v34 = vmul.u32.u64.high %v6441_v7, %v2314_v3, %v6490_v8  ;;  %v2988_v20 = vand.u32 3, %v6410_v35 }
0x1b05   :  { %v3856_v14 = vsel %vm3849_vm0, 1.0, %v5081_v2  ;;  %v3743_v32 = vadd.s32 1, %v4304_v29  ;;  %v2269_v38 = vsel %vm2262_vm3, %v2265_v26, %v2268_v54  ;;  %v3863_v48 = vmul.f32 %v5081_v2, %v5081_v2 }
0x1b06   :  { %v3708_v23 = vor.u32 4788187, %v3707_v59  ;;  %v2310_v30 = vsel %vm2304_vm15, %v2307_v52, %v2309_v4  ;;  %v3722_v25 = vadd.s32 3, %v3718_v9  ;;  %vm2328_vm4 = vc.u32 %v6487_v41, %v6490_v8 }
0x1b07   :  { %v3733_v36 = vand.u32 2147483647, %v6403_v17  ;;  %vm3744_vm5 = vcmp.gt.s32.totalorder %v3743_v32, 0  ;;  %v3711_v27 = vcvt.s32.f32 %v3704_v61  ;;  %v2329_v18 = vadd.s32 1, %v6491_v34 }
0x1b08   :  { %v3709_v35 = vand.u32 2147483647, %v3708_v23  ;;  %v3745_v15 = vsel %vm3744_vm5, %v3743_v32, 0  ;;  %v6509_v3 = vsel %vm2260_vm2, nan, %v2269_v38  ;;  %vm2990_vm6 = vcmp.eq.s32.totalorder %v2988_v20, 0 }
0x1b09   :  { %v2326_v58 = vmul.u32 %v6441_v7, %v2310_v30  ;;  %v3747_v52 = vand.u32 31, %v3745_v15  ;;  %vm2993_vm7 = vcmp.eq.s32.totalorder %v2988_v20, 2  ;;  %v2330_v4 = vsel %vm2328_vm4, %v2329_v18, %v6491_v34 }
0x1b0a   :  { %v3712_v9 = vmul.f32 %v3711_v27, %v3709_v35  ;;  %v6515_v55 = vmul.f32 %v6259_v47, %v6509_v3  ;;  %v6517_v54 = vand.u32 3, %v3722_v25  ;;  %v3740_v13 = vand.u32 8388607, %v3733_v36 }
0x1b0b   :  { %v2331_v21 = vadd.s32 %v2330_v4, %v2326_v58  ;;  %v3748_v56 = vsub.s32 32, %v3747_v52  ;;  %v2992_v26 = vsel %vm2990_vm6, %v6438_v50, %v2264_v63  ;;  %v2995_v7 = vsel %vm2993_vm7, %v2267_v1, %v6443_v5 }
0x1b0c   :  { %v3713_v43 = vxor.u32 2147483648, %v3712_v9  ;;  %v6523_v29 = vshrl.u32 %v3745_v15, 5  ;;  %v3759_v32 = vshll.u32 %v6874_v10, %v3747_v52  ;;  %v3750_v63 = vshll.u32 %v6871_v44, %v3747_v52 }
0x1b0d   :  { %v2332_v61 = vadd.s32 536870912, %v2331_v21  ;;  %v3751_v59 = vshrl.u32 %v6872_v24, %v3748_v56  ;;  %v3754_v34 = vshrl.u32 %v6873_v22, %v3748_v56  ;;  %v3757_v23 = vshrl.u32 %v6874_v10, %v3748_v56 }
0x1b0e   :  { %v3714_v38 = vsel %vm3631_vm8, %v3713_v43, %v3712_v9  ;;  %v3760_v30 = vshrl.u32 %v6876_v37, %v3748_v56  ;;  %v3763_v50 = vshrl.u32 %v6877_v28, %v3748_v56  ;;  %v3753_v25 = vshll.u32 %v6872_v24, %v3747_v52 }
0x1b0f   :  { %v3717_v5 = vsel %vm6419_vm9, %v6116_v42, %v3714_v38  ;;  %v6536_v1 = vshrl.u32 %v2332_v61, 30  ;;  %v3756_v35 = vshll.u32 %v6873_v22, %v3747_v52  ;;  %v3762_v10 = vshll.u32 %v6876_v37, %v3747_v52 }
0x1b10   :  { %4749 = vcosq.f32 %v3717_v5  ;;  %v3761_v27 = vor.u32 %v3760_v30, %v3759_v32  ;;  %v3752_v28 = vor.u32 %v3751_v59, %v3750_v63  ;;  %v3755_v15 = vor.u32 %v3754_v34, %v3753_v25 }
0x1b11   :  { %4751 = vsinq.f32 %v3717_v5  ;;  %v2334_v18 = vshll.u32 %v6536_v1, 30  ;;  %vm2989_vm8 = vcmp.lt.s32.totalorder %v2988_v20, 2  ;;  %v3758_v31 = vor.u32 %v3757_v23, %v3756_v35 }
0x1b12   :  { %4753 = vrcp.f32 %v3856_v14  ;;  %v3764_v58 = vor.u32 %v3763_v50, %v3762_v10  ;;  %v2996_v9 = vsel %vm2989_vm8, %v2992_v26, %v2995_v7  ;;  %v3741_v43 = vor.u32 8388608, %v3740_v13 }
0x1b13   :  { %v6543_v4 = vsub.s32 %v2331_v21, %v2334_v18  ;;  %vm3768_vm9 = vcmp.lt.s32.totalorder %v6523_v29, 4  ;;  %v6546_v24 = vmul.f32 0.16666667, %v3863_v48  ;;  %vm3765_vm13 = vcmp.lt.s32.totalorder %v6523_v29, 1 }
0x1b14   :  { %v3774_v37 = vsel %vm3768_vm9, %v3761_v27, 920167782  ;;  %vm3725_vm10 = vcmp.eq.s32.totalorder %v6517_v54, 0  ;;  %vm3767_vm14 = vcmp.lt.s32.totalorder %v6523_v29, 3  ;;  %v3773_v20 = vsel %vm3765_vm13, %v3752_v28, %v3755_v15 }
0x1b15   :  { %v2337_v22 = vsub.s32 0, %v6543_v4  ;;  %v6558_v14 = vsel %vm2260_vm2, nan, %v2996_v9  ;;  %vm3724_vm12 = vcmp.lt.s32.totalorder %v6517_v54, 2  ;;  %v3775_v48 = vsel %vm3767_vm14, %v3758_v31, %v3774_v37 }
0x1b16   :  { %v3777_v52 = vsel %vm3765_vm13, %v3755_v15, %v3758_v31  ;;  %v3778_v21 = vsel %vm3768_vm9, %v3764_v58, 1326507024  ;;  %vm3721_vm1 = vweird.f32 %v6116_v42  ;;  %vm3766_vm11 = vcmp.lt.s32.totalorder %v6523_v29, 2 }
0x1b17   :  { %v4249_v13 = vmin.u32 %v2337_v22, %v6543_v4  ;;  %v3770_v2 = vsel %vm3768_vm9, %v3758_v31, 2102212464  ;;  %v3781_v26 = vshll.u32 %v3741_v43, 8  ;;  %v3749_v7 = vshrl.u32 %v6871_v44, %v3748_v56 }
0x1b18   :  { %v3776_v61 = vsel %vm3766_vm11, %v3773_v20, %v3775_v48  ;;  %v3779_v59 = vsel %vm3767_vm14, %v3761_v27, %v3778_v21  ;;  %v4114_v34 = vmul.f32 %v6350_v53, %v6558_v14  ;;  %v3771_v56 = vsel %vm3767_vm14, %v3755_v15, %v3770_v2 }
0x1b19   :  { %v2339_v32 = vclz %v4249_v13  ;;  %v3780_v38 = vsel %vm3766_vm11, %v3777_v52, %v3779_v59  ;;  %v6581_v23 = vmul.u32.u64.low %v3781_v26, %v3776_v61  ;;  %v6582_v30 = vmul.u32.u64.high %v3781_v26, %v3776_v61, %v6581_v23 }
0x1b1a   :  { %v4750_v50 = vpop.eup %4749  ;;  %v3769_v44 = vsel %vm3765_vm13, %v3749_v7, %v3752_v28  ;;  %v3934_v5 = vsub.f32 0.0, %v6558_v14  ;;  %v6591_v63 = vadd.f32 %v4114_v34, %v6515_v55  ;;  %vm3728_vm15 = vcmp.eq.s32.totalorder %v6517_v54, 2 }
0x1b1b   :  { %v4752_v25 = vpop.eup %4751  ;;  %v3729_v35 = vxor.u32 2147483648, %v4750_v50  ;;  %v4250_v27 = vadd.s32 4294967294, %v2339_v32  ;;  %v6593_v10 = vmul.u32.u64.low %v3781_v26, %v3780_v38  ;;  %v6594_v18 = vmul.u32.u64.high %v3781_v26, %v3780_v38, %v6593_v10  ;;  %v6903_v38 = vld [vmem:[#allocation8_spill] sm:$0xff] }
0x1b1c   :  { %v4754_v31 = vpop.eup %4753  ;;  %v3726_v58 = vxor.u32 2147483648, %v4752_v25  ;;  %v4116_v28 = vmul.f32 %v6259_v47, %v3934_v5  ;;  %v4117_v15 = vmul.f32 %v6350_v53, %v6509_v3  ;;  %v3772_v55 = vsel %vm3766_vm11, %v3769_v44, %v3771_v56 }
0x1b1d   :  { %v3730_v9 = vsel %vm3728_vm15, %v3729_v35, %v4752_v25  ;;  %vm4251_vm2 = vcmp.lt.s32.totalorder %v4250_v27, 0  ;;  %v3791_v43 = vadd.s32 1, %v6582_v30  ;;  %v3891_v22 = vmul.f32 %v4754_v31, %v6558_v14  ;;  %v3975_v25 = vpop.permute.xlu1 %3974  ;;  %v3947_v35 = vpop.permute.xlu0 %3946 }
0x1b1e   :  { %v3727_v37 = vsel %vm3725_vm10, %v4750_v50, %v3726_v58  ;;  %v2342_v20 = vsel %vm4251_vm2, 0, %v4250_v27  ;;  %v6608_v48 = vadd.f32 %v4117_v15, %v4116_v28  ;;  %v2327_v21 = vadd.s32 %v6490_v8, %v6487_v41 }
0x1b1f   :  { %v3731_v52 = vsel %vm3724_vm12, %v3727_v37, %v3730_v9  ;;  %v2343_v13 = vsub.s32 32, %v2342_v20  ;;  %v2347_v2 = vsub.s32 4294967266, %v2342_v20  ;;  %v2344_v7 = vshll.u32 %v6543_v4, %v2342_v20 }
0x1b20   :  { %v3732_v29 = vsel %vm3721_vm1, nan, %v3731_v52  ;;  %v3788_v61 = vmul.u32 %v3781_v26, %v3772_v55  ;;  %vm3790_vm3 = vc.u32 %v6594_v18, %v6581_v23  ;;  %v6904_v50 = vsub.f32 0.0, %v6903_v38  ;;  %v6905_v55 = vld [vmem:[#allocation9_spill] sm:$0xff] }
0x1b21   :  { %v3906_v59 = vmul.f32 2.0, %v3732_v29  ;;  %v2345_v34 = vshrl.u32 %v2327_v21, %v2343_v13  ;;  %v2348_v32 = vadd.s32 127, %v2347_v2  ;;  %v3792_v54 = vsel %vm3790_vm3, %v3791_v43, %v6582_v30 }
0x1b22   :  { %v4028_v44 = vmul.f32 0.0, %v6904_v50  ;;  %v3793_v41 = vadd.s32 %v3792_v54, %v3788_v61  ;;  %v3878_v8 = vsub.f32 1.0, %v6546_v24  ;;  %v6906_v61 = vld [vmem:[#allocation11_spill] sm:$0xff]  ;;  %vm2272_vm4 = vcmp.le.f32.partialorder %v6393_v49, 0.7853982 }
0x1b23   :  { %v3913_v56 = vmul.f32 %v3906_v59, %v3732_v29  ;;  %v2346_v27 = vor.u32 %v2345_v34, %v2344_v7  ;;  %v2349_v4 = vshll.u32 %v2348_v32, 23  ;;  %v6641_v59 = vadd.f32 %v6906_v61, %v6903_v38  ;;  %v6908_v32 = vld [vmem:[#allocation12_spill] sm:$0xff] }
0x1b24   :  { %v3794_v26 = vadd.s32 536870912, %v3793_v41  ;;  %v3899_v10 = vsel %vm3849_vm0, %v3878_v8, %v3891_v22  ;;  %v6628_v43 = vadd.f32 %v4028_v44, %v6905_v55  ;;  %vm2363_vm14 = vweird.f32 %v6897_v16 }
0x1b25   :  { %v3920_v58 = vmul.f32 %v4754_v31, %v3913_v56  ;;  %v2350_v28 = vor.u32 4788187, %v2349_v4  ;;  %v4011_v15 = vmul.f32 %v3975_v25, %v3899_v10  ;;  %v3962_v9 = vmul.f32 %v3947_v35, %v3899_v10 }
0x1b26   :  { %v6625_v30 = vshrl.u32 %v3794_v26, 30  ;;  %v2353_v20 = vcvt.s32.f32 %v2346_v27  ;;  %v2357_v31 = vsub.s32 4, %v6536_v1  ;;  %v4047_v54 = vmul.f32 %v6628_v43, %v6908_v32 }
0x1b27   :  { %v3927_v24 = vsel %vm3849_vm0, %v6116_v42, %v3920_v58  ;;  %v2351_v37 = vand.u32 2147483647, %v2350_v28  ;;  %v4044_v42 = vmul.f32 %v6628_v43, %v6907_v39  ;;  %vm2273_vm0 = vcmp.lt.s32.totalorder %v6897_v16, 0 }
0x1b28   :  { %v3990_v52 = vmul.f32 %v3975_v25, %v3927_v24  ;;  %v4004_v21 = vmul.f32 %v3947_v35, %v3927_v24  ;;  %v3796_v13 = vshll.u32 %v6625_v30, 30  ;;  %v2358_v38 = vsel %vm2273_vm0, %v2357_v31, %v6536_v1 }
0x1b29   :  { %v2354_v22 = vmul.f32 %v2353_v20, %v2351_v37  ;;  %v4043_v35 = vmul.f32 %v6641_v59, %v6908_v32  ;;  %v6909_v27 = vsub.f32 0.0, %v6907_v39  ;;  %v2360_v26 = vsel %vm2272_vm4, 0, %v2358_v38 }
0x1b2a   :  { %v6635_v2 = vsub.f32 %v3962_v9, %v3990_v52  ;;  %v6637_v29 = vadd.f32 %v4011_v15, %v4004_v21  ;;  %v3797_v7 = vsub.s32 %v3793_v41, %v3796_v13  ;;  %v3091_v28 = vadd.s32 3, %v2360_v26  ;;  %v6910_v9 = vld [vmem:[#allocation15_spill] sm:$0xff] }
0x1b2b   :  { %v2355_v34 = vxor.u32 2147483648, %v2354_v22  ;;  %v6663_v10 = vadd.f32 %v4044_v42, %v4043_v35  ;;  %v6911_v37 = vsub.f32 0.0, %v5685_v33  ;;  %v2364_v52 = vand.u32 3, %v2360_v26  ;;  %v6912_v35 = vld [vmem:[#allocation19_spill] sm:$0xff] }
0x1b2c   :  { %v4119_v50 = vmul.f32 %v6259_v47, %v6635_v2  ;;  %v4120_v44 = vmul.f32 %v6350_v53, %v6637_v29  ;;  %v3799_v8 = vsub.s32 0, %v3797_v7  ;;  %v4046_v47 = vmul.f32 %v6641_v59, %v6909_v27 }
0x1b2d   :  { %v2356_v41 = vsel %vm2273_vm0, %v2355_v34, %v2354_v22  ;;  %v4063_v55 = vmul.f32 %v6663_v10, %v6910_v9  ;;  %v3092_v13 = vand.u32 3, %v3091_v28  ;;  %v3789_v22 = vadd.s32 %v6581_v23, %v6594_v18 }
0x1b2e   :  { %v4121_v56 = vadd.f32 %v4120_v44, %v4119_v50  ;;  %v2359_v25 = vsel %vm2272_vm4, %v6897_v16, %v2356_v41  ;;  %v4305_v53 = vmin.u32 %v3799_v8, %v3797_v7  ;;  %v6665_v1 = vadd.f32 %v4047_v54, %v4046_v47 }
0x1b2f   :  { %4755 = vcosq.f32 %v2359_v25  ;;  %vm2365_vm6 = vcmp.lt.s32.totalorder %v2364_v52, 2  ;;  %vm2369_vm7 = vcmp.eq.s32.totalorder %v2364_v52, 2  ;;  %vm3097_vm8 = vcmp.eq.s32.totalorder %v3092_v13, 2 }
0x1b30   :  { %v6661_v4 = vadd.f32 %v4121_v56, %v6399_v62  ;;  %4757 = vsinq.f32 %v2359_v25  ;;  %v3801_v58 = vclz %v4305_v53  ;;  %v4064_v24 = vmul.f32 %v6665_v1, %v5685_v33 }
0x1b31   :  { %v4066_v62 = vmul.f32 %v6663_v10, %v6911_v37  ;;  %v4067_v20 = vmul.f32 %v6665_v1, %v6910_v9  ;;  %vm2366_vm9 = vcmp.eq.s32.totalorder %v2364_v52, 0  ;;  %vm3094_vm13 = vcmp.eq.s32.totalorder %v3092_v13, 0 }
0x1b32   :  { %v4306_v15 = vadd.s32 4294967294, %v3801_v58  ;;  %v6678_v42 = vadd.f32 %v4064_v24, %v4063_v55  ;;  %vm3093_vm10 = vcmp.lt.s32.totalorder %v3092_v13, 2  ;;  %v6913_v9 = vsub.f32 0.0, %v6896_v45 }
0x1b33   :  { %v6680_v50 = vadd.f32 %v4067_v20, %v4066_v62  ;;  %v3819_v52 = vsub.s32 4, %v6625_v30  ;;  %vm3735_vm12 = vcmp.lt.s32.totalorder %v6403_v17, 0  ;;  %vm6720_vm1 = vcmp.le.f32.partialorder %v3733_v36, 0.7853982 }
0x1b34   :  { %vm4307_vm5 = vcmp.lt.s32.totalorder %v4306_v15, 0  ;;  %v4083_v27 = vmul.f32 %v6678_v42, %v6912_v35  ;;  %v4086_v55 = vmul.f32 %v6678_v42, %v6913_v9  ;;  %vm3850_vm11 = vcmp.lt.f32.partialorder %v6393_v49, 0.0001 }
0x1b35   :  { %v3804_v21 = vsel %vm4307_vm5, 0, %v4306_v15  ;;  %v4084_v26 = vmul.f32 %v6680_v50, %v6896_v45  ;;  %v4087_v24 = vmul.f32 %v6680_v50, %v6912_v35  ;;  %v6706_v45 = vld [vmem:[%s6802_s1] sm:$0x3]  ;;  %v4050_v9 = vmul.f32 %v6628_v43, %v6102_v0 }
0x1b36   :  { %v3805_v31 = vsub.s32 32, %v3804_v21  ;;  %v3809_v61 = vsub.s32 4294967266, %v3804_v21  ;;  %v3806_v34 = vshll.u32 %v3797_v7, %v3804_v21  ;;  %vm3825_vm0 = vweird.f32 %v6403_v17 }
0x1b37   :  { %vm4174_vm4 = vcmask 39936   ;;  %vm4176_vm5 = vcmask 74752  }
0x1b38   :  { %v3807_v32 = vshrl.u32 %v3789_v22, %v3805_v31  ;;  %v3810_v54 = vadd.s32 127, %v3809_v61 }
0x1b39   :  { %v4756_v39 = vpop.eup %4755 }
0x1b3a   :  { %v4758_v33 = vpop.eup %4757  ;;  %v2370_v44 = vxor.u32 2147483648, %v4756_v39  ;;  %v3808_v38 = vor.u32 %v3807_v32, %v3806_v34  ;;  %v3811_v8 = vshll.u32 %v3810_v54, 23  ;;  %v6713_v34 = vadd.f32 %v4087_v24, %v4086_v55 }
0x1b3b   :  { %v2367_v41 = vxor.u32 2147483648, %v4758_v33  ;;  %v4070_v55 = vmul.f32 %v6665_v1, %v6264_v60  ;;  %v4090_v1 = vmul.f32 %v6680_v50, %v6381_v11 }
0x1b3c   :  { %v2371_v23 = vsel %vm2369_vm7, %v2370_v44, %v4758_v33  ;;  %v3099_v18 = vsel %vm3097_vm8, %v2370_v44, %v4758_v33  ;;  %v3812_v7 = vor.u32 4788187, %v3811_v8  ;;  %v3815_v15 = vcvt.s32.f32 %v3808_v38 }
0x1b3d   :  { %v2368_v56 = vsel %vm2366_vm9, %v4756_v39, %v2367_v41  ;;  %v3096_v25 = vsel %vm3094_vm13, %v4756_v39, %v2367_v41  ;;  %v6711_v39 = vadd.f32 %v4084_v26, %v4083_v27  ;;  %v3820_v44 = vsel %vm3735_vm12, %v3819_v52, %v6625_v30  ;;  %v6728_v41 = vld [vmem:[%s6802_s1 + $0x2] sm:$0x3]  ;;  %s4807_s1 = smov 5  }
0x1b3e   :  { %v2372_v47 = vsel %vm2365_vm6, %v2368_v56, %v2371_v23  ;;  %v3100_v53 = vsel %vm3093_vm10, %v3096_v25, %v3099_v18  ;;  %v3813_v28 = vand.u32 2147483647, %v3812_v7  ;;  %v3822_v36 = vsel %vm6720_vm1, 0, %v3820_v44 }
0x1b3f   :  { %v6688_v58 = vsel %vm2363_vm14, nan, %v3100_v53  ;;  %v6695_v37 = vsel %vm2363_vm14, nan, %v2372_v47  ;;  %v4103_v18 = vmul.f32 %v6711_v39, %v6136_v57  ;;  %v4104_v56 = vmul.f32 %v6713_v34, %v5622_v46 }
0x1b40   :  { %v3935_v62 = vsub.f32 0.0, %v6688_v58  ;;  %v3816_v20 = vmul.f32 %v3815_v15, %v3813_v28  ;;  %v4133_v21 = vmul.f32 %v6591_v63, %v6695_v37  ;;  %v4134_v13 = vmul.f32 %v6608_v48, %v6688_v58 }
0x1b41   :  { %v4137_v32 = vmul.f32 %v6608_v48, %v6695_v37  ;;  %v6916_v25 = vsub.f32 0.0, %v5622_v46  ;;  %v4107_v35 = vmul.f32 %v6713_v34, %v6136_v57  ;;  %v3857_v27 = vsel %vm3850_vm11, 1.0, %v6897_v16 }
0x1b42   :  { %v4136_v22 = vmul.f32 %v6591_v63, %v3935_v62  ;;  %v3817_v31 = vxor.u32 2147483648, %v3816_v20  ;;  %v4135_v61 = vadd.f32 %v4134_v13, %v4133_v21  ;;  %v3826_v53 = vadd.s32 3, %v3822_v36 }
0x1b43   :  { %v4106_v7 = vmul.f32 %v6711_v39, %v6916_v25  ;;  %v4105_v26 = vadd.f32 %v4104_v56, %v4103_v18  ;;  %v4030_v15 = vmul.f32 0.0, %v6017_v12  ;;  %v4049_v46 = vmul.f32 %v6641_v59, %v6100_v6  ;;  %v6917_v56 = vld [vmem:[#allocation18_spill] sm:$0xff] }
0x1b44   :  { %v3818_v33 = vsel %vm3735_vm12, %v3817_v31, %v3816_v20  ;;  %v4155_v38 = vmul.f32 %v6706_v45, %v4135_v61  ;;  %v4138_v23 = vadd.f32 %v4137_v32, %v4136_v22  ;;  %v4069_v57 = vmul.f32 %v6663_v10, %v6261_v40 }
0x1b45   :  { %v3821_v8 = vsel %vm6720_vm1, %v6403_v17, %v3818_v33  ;;  %v4108_v28 = vadd.f32 %v4107_v35, %v4106_v7  ;;  %v3827_v24 = vand.u32 3, %v3826_v53  ;;  %v3864_v52 = vmul.f32 %v6897_v16, %v6897_v16  ;;  %v6918_v7 = vld [vmem:[#allocation21_spill] sm:$0xff] }
0x1b46   :  { %4759 = vcosq.f32 %v3821_v8  ;;  %v4156_v30 = vmul.f32 %v6728_v41, %v4138_v23  ;;  %v4123_v21 = vmul.f32 %v4105_v26, %v6509_v3  ;;  %v4031_v6 = vadd.f32 %v4030_v15, %v6009_v51  ;;  %v3949_v23 = vpop.permute.xlu0 %3948 }
0x1b47   :  { %4761 = vsinq.f32 %v3821_v8  ;;  %v4124_v12 = vmul.f32 %v4108_v28, %v6558_v14  ;;  %v4126_v0 = vmul.f32 %v4105_v26, %v3934_v5  ;;  %v4127_v40 = vmul.f32 %v4108_v28, %v6509_v3  ;;  %v3977_v8 = vpop.permute.xlu1 %3976 }
0x1b48   :  { %v6750_v47 = vadd.f32 %v4156_v30, %v4155_v38  ;;  %4763 = vrcp.f32 %v3857_v27  ;;  %v4051_v43 = vadd.f32 %v4050_v9, %v4049_v46  ;;  %v4071_v60 = vadd.f32 %v4070_v55, %v4069_v57 }
0x1b49   :  { %vm3832_vm15 = vcmp.eq.s32.totalorder %v3827_v24, 2  ;;  %v4089_v16 = vmul.f32 %v6678_v42, %v6379_v19  ;;  %vm3829_vm2 = vcmp.eq.s32.totalorder %v3827_v24, 0  ;;  %vm3828_vm3 = vcmp.lt.s32.totalorder %v3827_v24, 2 }
0x1b4a   :  { %v3872_v31 = vmul.f32 0.16666667, %v3864_v52  ;;  %v4125_v61 = vadd.f32 %v4124_v12, %v4123_v21  ;;  %v4128_v3 = vadd.f32 %v4127_v40, %v4126_v0  ;;  %v4052_v32 = vadd.f32 %v4051_v43, %v4031_v6 }
0x1b4b   :  { %v4091_v33 = vadd.f32 %v4090_v1, %v4089_v16  ;;  %v4109_v25 = vmul.f32 %v6711_v39, %v6917_v56  ;;  %v4110_v35 = vmul.f32 %v6713_v34, %v6918_v7  ;;  %v4129_v46 = vmul.f32 %v4105_v26, %v6635_v2  ;;  %v6919_v16 = vld [vmem:[#allocation6_spill] sm:$0xff] }
0x1b4c   :  { %v4072_v42 = vadd.f32 %v4071_v60, %v4052_v32  ;;  %v3879_v38 = vsub.f32 1.0, %v3872_v31  ;;  %v4143_v11 = vmul.f32 %v4125_v61, %v6695_v37  ;;  %v4144_v36 = vmul.f32 %v4128_v3, %v6688_v58 }
0x1b4d   :  { %v4146_v30 = vmul.f32 %v4125_v61, %v3935_v62  ;;  %v4147_v18 = vmul.f32 %v4128_v3, %v6695_v37  ;;  %v4130_v9 = vmul.f32 %v4108_v28, %v6637_v29  ;;  %v4111_v55 = vadd.f32 %v4110_v35, %v4109_v25 }
0x1b4e   :  { %v4092_v27 = vadd.f32 %v4091_v33, %v4072_v42  ;;  %v4145_v62 = vadd.f32 %v4144_v36, %v4143_v11 }
0x1b4f   :  { %v4148_v39 = vadd.f32 %v4147_v18, %v4146_v30  ;;  %v4131_v52 = vadd.f32 %v4130_v9, %v4129_v46 }
0x1b50   :  { %v4760_v20 = vpop.eup %4759 }
0x1b51   :  { %v4762_v13 = vpop.eup %4761  ;;  %v3833_v59 = vxor.u32 2147483648, %v4760_v20  ;;  %v4160_v2 = vmul.f32 %v6728_v41, %v4148_v39 }
0x1b52   :  { %v3830_v10 = vxor.u32 2147483648, %v4762_v13  ;;  %v4764_v5 = vpop.eup %4763 }
0x1b53   :  { %v3834_v22 = vsel %vm3832_vm15, %v3833_v59, %v4762_v13  ;;  %v3893_v44 = vmul.f32 %v4764_v5, %v6688_v58  ;;  %v4159_v13 = vmul.f32 %v6706_v45, %v4145_v62 }
0x1b54   :  { %v3831_v51 = vsel %vm3829_vm2, %v4760_v20, %v3830_v10  ;;  %v4112_v20 = vadd.f32 %v4111_v55, %v4092_v27 }
0x1b55   :  { %v3835_v14 = vsel %vm3828_vm3, %v3831_v51, %v3834_v22  ;;  %v3900_v53 = vsel %vm3850_vm11, %v3879_v38, %v3893_v44  ;;  %v4161_v40 = vadd.f32 %v4160_v2, %v4159_v13 }
0x1b56   :  { %v3836_v54 = vsel %vm3825_vm0, nan, %v3835_v14  ;;  %v4012_v57 = vmul.f32 %v3977_v8, %v3900_v53  ;;  %v3963_v58 = vmul.f32 %v3949_v23, %v3900_v53 }
0x1b57   :  { %v3907_v19 = vmul.f32 2.0, %v3836_v54 }
0x1b59   :  { %v3914_v50 = vmul.f32 %v3907_v19, %v3836_v54 }
0x1b5b   :  { %v3921_v15 = vmul.f32 %v4764_v5, %v3914_v50 }
0x1b5d   :  { %v3928_v37 = vsel %vm3850_vm11, %v6403_v17, %v3921_v15  ;;  %v4132_v17 = vadd.f32 %v4131_v52, %v4112_v20 }
0x1b5e   :  { %v3991_v24 = vmul.f32 %v3977_v8, %v3928_v37  ;;  %v4005_v34 = vmul.f32 %v3949_v23, %v3928_v37 }
0x1b60   :  { %v3998_v21 = vsub.f32 %v3963_v58, %v3991_v24  ;;  %v4019_v12 = vadd.f32 %v4012_v57, %v4005_v34 }
0x1b62   :  { %v4139_v29 = vmul.f32 %v6591_v63, %v3998_v21  ;;  %v4140_v26 = vmul.f32 %v6608_v48, %v4019_v12  ;;  %v4149_v28 = vmul.f32 %v4125_v61, %v3998_v21  ;;  %v4150_v49 = vmul.f32 %v4128_v3, %v4019_v12 }
0x1b64   :  { %v4141_v6 = vadd.f32 %v4140_v26, %v4139_v29  ;;  %v4151_v59 = vadd.f32 %v4150_v49, %v4149_v28 }
0x1b66   :  { %v4152_v0 = vadd.f32 %v4151_v59, %v4132_v17  ;;  %v4142_v43 = vadd.f32 %v4141_v6, %v6661_v4 }
0x1b68   :  { %v4162_v60 = vadd.f32 %v4161_v40, %v4152_v0  ;;  %v4158_v10 = vadd.f32 %v6750_v47, %v4142_v43 }
0x1b6a   :  { %v4170_v45 = vrot.slane %v4162_v60, %v6919_v16 }
0x1b6c   :  { %4171 = vrot.lane.b32.xlu0 %v4170_v45, %s4807_s1 }
0x1bde   :  { %v4172_v63 = vpop.permute.xlu0 %4171 }
0x1bdf   :  { %v4175_v48 = vsel %vm4174_vm4, %v4158_v10, %v4172_v63 }
0x1be0   :  { %4177 = vst.msk [vmem:[%s6804_s3] sm:$0x3] %vm4176_vm5, %v4175_v48 }
0x1be1   :  { %4182 = vsyncpa [#allocation4], 1 }

</bundles_post_ra>
